<compile_context>
chip_gen: v5e
topology: v5e:2x2
jax: 0.10.0
libtpu: 0.0.40
codegen_flags: <defaults>
</compile_context>

<pallas_src>
import functools

import jax
import jax.numpy as jnp
from jax import lax
from jax.experimental import pallas as pl
from jax.experimental.pallas import tpu as pltpu

_EPS = 1e-5            # nn.BatchNorm2d default
_NEG_SLOPE = 0.2       # nn.LeakyReLU(0.2)


def _round_up(x, m):
    return (x + m - 1) // m * m


@functools.lru_cache(maxsize=1)
def _vmem_limit_bytes():
    # v5e/v6e: 128 MiB VMEM -> 96 MiB budget; v7x: 64 MiB VMEM -> 48 MiB budget.
    try:
        cap = pltpu.get_tpu_info().vmem_capacity_bytes
        return int(min(cap * 3 // 4, 96 * 1024 * 1024))
    except Exception:
        return 64 * 1024 * 1024


# ----------------------------------------------------------------------------
# Conv kernel: one (image, output-row) block per grid step, taps fully unrolled.
# ----------------------------------------------------------------------------
def _make_conv_kernel(n_wtaps, ow, has_bias, has_stats, apply_act):
    def kernel(*refs):
        x_refs = refs[0:4]                       # 4 padded input rows (bf16)
        w_ref = refs[4]                          # (4, n_wtaps, Cq, Coutp) bf16
        pos = 5
        b_ref = None
        if has_bias:
            b_ref = refs[pos]
            pos += 1
        y_ref = refs[pos]
        pos += 1
        stats_ref = refs[pos] if has_stats else None

        acc = None
        for r in range(4):                       # kernel-height taps
            row = x_refs[r][0, 0, :, :]          # (Wq, Cq) bf16
            for t in range(n_wtaps):             # kernel-width taps (paired if s=2)
                lhs = row[t:t + ow, :]           # static contiguous sublane slice
                d = jnp.dot(lhs, w_ref[r, t],
                            preferred_element_type=jnp.float32)
                acc = d if acc is None else acc + d

        if has_bias:
            acc = acc + b_ref[...]               # (1, Coutp) broadcasts over rows
        if apply_act:
            acc = jnp.where(acc > 0, acc, _NEG_SLOPE * acc)
        if has_stats:
            # Exact per-row partial sums for train-mode BatchNorm; single store.
            s1 = jnp.sum(acc, axis=0, keepdims=True)
            s2 = jnp.sum(acc * acc, axis=0, keepdims=True)
            stats_ref[0, 0, :, :] = jnp.concatenate([s1, s2], axis=0)
        y_ref[0, 0, :, :] = acc.astype(y_ref.dtype)

    return kernel


# ----------------------------------------------------------------------------
# BN (scale/shift) + LeakyReLU elementwise pass, bf16 in / bf16 out.
# ----------------------------------------------------------------------------
def _bn_act_kernel(y_ref, scale_ref, shift_ref, o_ref):
    v = y_ref[0, 0, :, :].astype(jnp.float32) * scale_ref[...] + shift_ref[...]
    o_ref[0, 0, :, :] = jnp.where(v > 0, v, _NEG_SLOPE * v).astype(o_ref.dtype)


def _bn_leakyrelu(y, scale, shift):
    N, OH, OW, Cp = y.shape
    return pl.pallas_call(
        _bn_act_kernel,
        out_shape=jax.ShapeDtypeStruct((N, OH, OW, Cp), jnp.bfloat16),
        grid_spec=pltpu.PrefetchScalarGridSpec(
            num_scalar_prefetch=0,
            grid=(N, OH),
            in_specs=[
                pl.BlockSpec((1, 1, OW, Cp), lambda n, oh: (n, oh, 0, 0)),
                pl.BlockSpec((1, Cp), lambda n, oh: (0, 0)),
                pl.BlockSpec((1, Cp), lambda n, oh: (0, 0)),
            ],
            out_specs=pl.BlockSpec((1, 1, OW, Cp), lambda n, oh: (n, oh, 0, 0)),
        ),
        compiler_params=pltpu.CompilerParams(
            dimension_semantics=("parallel", "parallel"),
            vmem_limit_bytes=_vmem_limit_bytes(),
        ),
    )(y, scale, shift)


# ----------------------------------------------------------------------------
# One conv layer: Conv(k=4, pad=1) [+ BN batch-stats] [+ LeakyReLU].
# NHWC bf16 in (channels zero-padded), NHWC out (channels padded to 128).
# ----------------------------------------------------------------------------
def _conv_layer(x, layer, *, is_final):
    N, H, W, Cin = x.shape
    s = layer["stride"]
    OH = (H + 2 - 4) // s + 1
    OW = (W + 2 - 4) // s + 1

    w = layer["w"]                               # (Cout, Cin_real, 4, 4) torch layout
    Cout, Cin_real = int(w.shape[0]), int(w.shape[1])
    assert Cin >= Cin_real
    Coutp = _round_up(Cout, 128)                 # lane-dense outputs (Cout=1 -> 128)

    # (Cout,Cin,kh,kw) -> (kh,kw,Cin,Cout); pad Cin to the (already padded)
    # activation channel count and Cout to a lane multiple.
    wt = jnp.transpose(w, (2, 3, 1, 0))
    wt = jnp.pad(wt, ((0, 0), (0, 0), (0, Cin - Cin_real), (0, Coutp - Cout)))

    # Spatial zero pad (+1 each side), built directly in bf16.
    xp = jnp.pad(x.astype(jnp.bfloat16), ((0, 0), (1, 1), (1, 1), (0, 0)))

    if s == 2:
        # Pair adjacent W columns into channels (free row-major reshape) so the
        # W-stride-2 becomes 2 contiguous taps over 2*Cin channels.
        Wp = W + 2
        if Wp % 2:
            xp = jnp.pad(xp, ((0, 0), (0, 0), (0, 1), (0, 0)))
            Wp += 1
        xq = xp.reshape(N, H + 2, Wp // 2, 2 * Cin)
        wq = wt.reshape(4, 2, 2 * Cin, Coutp)
        n_wtaps = 2
    else:
        xq = xp
        wq = wt
        n_wtaps = 4
    wq = wq.astype(jnp.bfloat16)

    use_bn = bool(layer["use_bn"])
    has_bias = not use_bn                        # bias cancels in train-mode BN
    apply_act = bool(layer["use_act"]) and not use_bn
    out_dtype = jnp.float32 if is_final else jnp.bfloat16

    Wq, Cq = int(xq.shape[2]), int(xq.shape[3])

    def _row_spec(r):
        def idx(n, oh, r=r, s=s):
            return (n, s * oh + r, 0, 0)         # block size 1 along N and H
        return pl.BlockSpec((1, 1, Wq, Cq), idx)

    in_specs = [_row_spec(r) for r in range(4)]
    in_specs.append(pl.BlockSpec(wq.shape, lambda n, oh: (0, 0, 0, 0)))
    inputs = [xq, xq, xq, xq, wq]
    if has_bias:
        b = jnp.pad(layer["b"], (0, Coutp - Cout)).reshape(1, Coutp)
        in_specs.append(pl.BlockSpec((1, Coutp), lambda n, oh: (0, 0)))
        inputs.append(b.astype(jnp.float32))

    out_shapes = [jax.ShapeDtypeStruct((N, OH, OW, Coutp), out_dtype)]
    out_specs = [pl.BlockSpec((1, 1, OW, Coutp), lambda n, oh: (n, oh, 0, 0))]
    if use_bn:
        out_shapes.append(jax.ShapeDtypeStruct((N, OH, 2, Coutp), jnp.float32))
        out_specs.append(pl.BlockSpec((1, 1, 2, Coutp), lambda n, oh: (n, oh, 0, 0)))

    kernel = _make_conv_kernel(n_wtaps, OW, has_bias, use_bn, apply_act)

    flops = 2 * N * OH * OW * (16 * Cin) * Coutp
    bytes_accessed = (4 * xq.size * xq.dtype.itemsize
                      + wq.size * wq.dtype.itemsize
                      + N * OH * OW * Coutp * jnp.dtype(out_dtype).itemsize)

    outs = pl.pallas_call(
        kernel,
        out_shape=tuple(out_shapes),
        grid_spec=pltpu.PrefetchScalarGridSpec(
            num_scalar_prefetch=0,
            grid=(N, OH),
            in_specs=in_specs,
            out_specs=tuple(out_specs),
        ),
        compiler_params=pltpu.CompilerParams(
            dimension_semantics=("parallel", "parallel"),
            vmem_limit_bytes=_vmem_limit_bytes(),
        ),
        cost_estimate=pl.CostEstimate(flops=int(flops), transcendentals=0,
                                      bytes_accessed=int(bytes_accessed)),
    )(*inputs)

    y = outs[0]
    if not use_bn:
        return y

    # Train-mode BatchNorm batch statistics (biased variance), per channel.
    stats = outs[1]
    cnt = float(N * OH * OW)
    tot = jnp.sum(stats, axis=(0, 1))            # (2, Coutp) f32
    mean = tot[0] / cnt
    var = jnp.maximum(tot[1] / cnt - mean * mean, 0.0)
    gamma = jnp.pad(layer["gamma"], (0, Coutp - Cout))   # padded channels -> 0
    beta = jnp.pad(layer["beta"], (0, Coutp - Cout))
    scale = gamma * lax.rsqrt(var + _EPS)
    shift = beta - mean * scale
    return _bn_leakyrelu(y, scale.reshape(1, Coutp).astype(jnp.float32),
                         shift.reshape(1, Coutp).astype(jnp.float32))


# ----------------------------------------------------------------------------
# Parameters mirroring PatchGANDiscriminator.__init__ (fresh module = BN train mode)
# ----------------------------------------------------------------------------
def init_patchgan_params(key, in_channel, num_layers, base_channel=64):
    layers = []

    def make_layer(key, cin, cout, stride, use_bn, use_act):
        kw, kb = jax.random.split(key)
        w = jax.random.normal(kw, (cout, cin, 4, 4), jnp.float32) * 0.05
        b = jax.random.normal(kb, (cout,), jnp.float32) * 0.01
        return dict(w=w, b=b,
                    gamma=jnp.ones((cout,), jnp.float32),
                    beta=jnp.zeros((cout,), jnp.float32),
                    stride=stride, use_bn=use_bn, use_act=use_act)

    out_channel = base_channel
    key, sub = jax.random.split(key)
    # in_conv: Conv(k4,s2,p1) + LeakyReLU (no BN)
    layers.append(make_layer(sub, in_channel, out_channel, 2, False, True))

    for _ in range(1, num_layers):
        cin = out_channel
        out_channel = min(2 * out_channel, base_channel * 8)
        key, sub = jax.random.split(key)
        layers.append(make_layer(sub, cin, out_channel, 2, True, True))

    cin = out_channel
    out_channel = min(2 ** num_layers * base_channel, base_channel * 8)
    key, sub = jax.random.split(key)
    layers.append(make_layer(sub, cin, out_channel, 1, True, True))

    # final_conv: Conv(k4,s1,p1) -> 1 channel, no BN, no activation
    key, sub = jax.random.split(key)
    layers.append(make_layer(sub, out_channel, 1, 1, False, False))
    return layers


def patchgan_forward(x_nchw, layers):
    # NCHW -> NHWC once; bf16 activations; channels stay zero-padded to 128
    # between layers; back to NCHW once at the end.
    x = jnp.transpose(x_nchw, (0, 2, 3, 1)).astype(jnp.bfloat16)
    for i, layer in enumerate(layers):
        x = _conv_layer(x, layer, is_final=(i == len(layers) - 1))
    out = x[..., :1]                              # real final channel (Cout = 1)
    return jnp.transpose(out, (0, 3, 1, 2)).astype(jnp.float32)


# ----------------------------------------------------------------------------
if __name__ == "__main__":
    key = jax.random.PRNGKey(0)
    k_x, k_p = jax.random.split(key)

    # Small, module-consistent config: in_channel=4, num_layers=2, base=16.
    # Spatial path: 16 -> 8 (s2) -> 4 (s2) -> 3 (s1) -> 2 (s1, final conv).
    N, C, H, W = 2, 4, 16, 16
    x = jax.random.normal(k_x, (N, C, H, W), jnp.float32)

    params = init_patchgan_params(k_p, in_channel=C, num_layers=2,
                                  base_channel=16)

    fwd = jax.jit(lambda inp: patchgan_forward(inp, params))
    out = jax.block_until_ready(fwd(x))

    assert out.shape == (N, 1, 2, 2), out.shape
    assert bool(jnp.all(jnp.isfinite(out)))
    print("KERNEL_OK")
</pallas_src>

<mosaic_0001>
module attributes {stable_mosaic.version = 11 : i64} {
  func.func @kernel(%arg0: i32, %arg1: i32, %arg2: memref<1x1x9x8xbf16, #tpu.memory_space<vmem>>, %arg3: memref<1x1x9x8xbf16, #tpu.memory_space<vmem>>, %arg4: memref<1x1x9x8xbf16, #tpu.memory_space<vmem>>, %arg5: memref<1x1x9x8xbf16, #tpu.memory_space<vmem>>, %arg6: memref<4x2x8x128xbf16, #tpu.memory_space<vmem>>, %arg7: memref<1x128xf32, #tpu.memory_space<vmem>>, %arg8: memref<1x1x8x128xbf16, #tpu.memory_space<vmem>>) attributes {dimension_semantics = [#tpu.dimension_semantics<parallel>, #tpu.dimension_semantics<parallel>], iteration_bounds = array<i64: 2, 8>, scalar_prefetch = 0 : i64, scratch_operands = 0 : i64, tpu.core_type = #tpu.core_type<tc>, window_params = [{transform_indices = @transform_0, window_bounds = array<i64: 1, 1, 9, 8>}, {transform_indices = @transform_1, window_bounds = array<i64: 1, 1, 9, 8>}, {transform_indices = @transform_2, window_bounds = array<i64: 1, 1, 9, 8>}, {transform_indices = @transform_3, window_bounds = array<i64: 1, 1, 9, 8>}, {pipeline_mode = #tpu.pipeline_mode<synchronous>, transform_indices = @transform_4, window_bounds = array<i64: 4, 2, 8, 128>}, {pipeline_mode = #tpu.pipeline_mode<synchronous>, transform_indices = @transform_5, window_bounds = array<i64: 1, 128>}, {transform_indices = @transform_6, window_bounds = array<i64: 1, 1, 8, 128>}]} {
    %c0 = arith.constant 0 : index
    %c0_0 = arith.constant 0 : index
    %c0_1 = arith.constant 0 : index
    %c0_2 = arith.constant 0 : index
    %0 = vector.load %arg2[%c0, %c0_0, %c0_1, %c0_2] : memref<1x1x9x8xbf16, #tpu.memory_space<vmem>>, vector<1x1x9x8xbf16>
    %1 = vector.shape_cast %0 : vector<1x1x9x8xbf16> to vector<9x8xbf16>
    %2 = vector.extract_strided_slice %1 {offsets = [0, 0], sizes = [8, 8], strides = [1, 1]} : vector<9x8xbf16> to vector<8x8xbf16>
    %c0_3 = arith.constant 0 : index
    %c0_4 = arith.constant 0 : index
    %c0_5 = arith.constant 0 : index
    %c0_6 = arith.constant 0 : index
    %3 = vector.load %arg6[%c0_3, %c0_4, %c0_5, %c0_6] : memref<4x2x8x128xbf16, #tpu.memory_space<vmem>>, vector<1x1x8x128xbf16>
    %4 = vector.shape_cast %3 : vector<1x1x8x128xbf16> to vector<8x128xbf16>
    %cst = arith.constant dense<0.000000e+00> : vector<8x128xf32>
    %5 = tpu.matmul %2, %4, %cst {dimension_numbers = #tpu.dot_dimension_numbers<[1], [0], [0], [1], [0, 0, 1, 1], [], []>} : vector<8x8xbf16>, vector<8x128xbf16>, vector<8x128xf32> -> vector<8x128xf32>
    %6 = vector.extract_strided_slice %1 {offsets = [1, 0], sizes = [8, 8], strides = [1, 1]} : vector<9x8xbf16> to vector<8x8xbf16>
    %c0_7 = arith.constant 0 : index
    %c1 = arith.constant 1 : index
    %c0_8 = arith.constant 0 : index
    %c0_9 = arith.constant 0 : index
    %7 = vector.load %arg6[%c0_7, %c1, %c0_8, %c0_9] : memref<4x2x8x128xbf16, #tpu.memory_space<vmem>>, vector<1x1x8x128xbf16>
    %8 = vector.shape_cast %7 : vector<1x1x8x128xbf16> to vector<8x128xbf16>
    %cst_10 = arith.constant dense<0.000000e+00> : vector<8x128xf32>
    %9 = tpu.matmul %6, %8, %cst_10 {dimension_numbers = #tpu.dot_dimension_numbers<[1], [0], [0], [1], [0, 0, 1, 1], [], []>} : vector<8x8xbf16>, vector<8x128xbf16>, vector<8x128xf32> -> vector<8x128xf32>
    %10 = arith.addf %5, %9 : vector<8x128xf32>
    %c0_11 = arith.constant 0 : index
    %c0_12 = arith.constant 0 : index
    %c0_13 = arith.constant 0 : index
    %c0_14 = arith.constant 0 : index
    %11 = vector.load %arg3[%c0_11, %c0_12, %c0_13, %c0_14] : memref<1x1x9x8xbf16, #tpu.memory_space<vmem>>, vector<1x1x9x8xbf16>
    %12 = vector.shape_cast %11 : vector<1x1x9x8xbf16> to vector<9x8xbf16>
    %13 = vector.extract_strided_slice %12 {offsets = [0, 0], sizes = [8, 8], strides = [1, 1]} : vector<9x8xbf16> to vector<8x8xbf16>
    %c1_15 = arith.constant 1 : index
    %c0_16 = arith.constant 0 : index
    %c0_17 = arith.constant 0 : index
    %c0_18 = arith.constant 0 : index
    %14 = vector.load %arg6[%c1_15, %c0_16, %c0_17, %c0_18] : memref<4x2x8x128xbf16, #tpu.memory_space<vmem>>, vector<1x1x8x128xbf16>
    %15 = vector.shape_cast %14 : vector<1x1x8x128xbf16> to vector<8x128xbf16>
    %cst_19 = arith.constant dense<0.000000e+00> : vector<8x128xf32>
    %16 = tpu.matmul %13, %15, %cst_19 {dimension_numbers = #tpu.dot_dimension_numbers<[1], [0], [0], [1], [0, 0, 1, 1], [], []>} : vector<8x8xbf16>, vector<8x128xbf16>, vector<8x128xf32> -> vector<8x128xf32>
    %17 = arith.addf %10, %16 : vector<8x128xf32>
    %18 = vector.extract_strided_slice %12 {offsets = [1, 0], sizes = [8, 8], strides = [1, 1]} : vector<9x8xbf16> to vector<8x8xbf16>
    %c1_20 = arith.constant 1 : index
    %c1_21 = arith.constant 1 : index
    %c0_22 = arith.constant 0 : index
    %c0_23 = arith.constant 0 : index
    %19 = vector.load %arg6[%c1_20, %c1_21, %c0_22, %c0_23] : memref<4x2x8x128xbf16, #tpu.memory_space<vmem>>, vector<1x1x8x128xbf16>
    %20 = vector.shape_cast %19 : vector<1x1x8x128xbf16> to vector<8x128xbf16>
    %cst_24 = arith.constant dense<0.000000e+00> : vector<8x128xf32>
    %21 = tpu.matmul %18, %20, %cst_24 {dimension_numbers = #tpu.dot_dimension_numbers<[1], [0], [0], [1], [0, 0, 1, 1], [], []>} : vector<8x8xbf16>, vector<8x128xbf16>, vector<8x128xf32> -> vector<8x128xf32>
    %22 = arith.addf %17, %21 : vector<8x128xf32>
    %c0_25 = arith.constant 0 : index
    %c0_26 = arith.constant 0 : index
    %c0_27 = arith.constant 0 : index
    %c0_28 = arith.constant 0 : index
    %23 = vector.load %arg4[%c0_25, %c0_26, %c0_27, %c0_28] : memref<1x1x9x8xbf16, #tpu.memory_space<vmem>>, vector<1x1x9x8xbf16>
    %24 = vector.shape_cast %23 : vector<1x1x9x8xbf16> to vector<9x8xbf16>
    %25 = vector.extract_strided_slice %24 {offsets = [0, 0], sizes = [8, 8], strides = [1, 1]} : vector<9x8xbf16> to vector<8x8xbf16>
    %c2 = arith.constant 2 : index
    %c0_29 = arith.constant 0 : index
    %c0_30 = arith.constant 0 : index
    %c0_31 = arith.constant 0 : index
    %26 = vector.load %arg6[%c2, %c0_29, %c0_30, %c0_31] : memref<4x2x8x128xbf16, #tpu.memory_space<vmem>>, vector<1x1x8x128xbf16>
    %27 = vector.shape_cast %26 : vector<1x1x8x128xbf16> to vector<8x128xbf16>
    %cst_32 = arith.constant dense<0.000000e+00> : vector<8x128xf32>
    %28 = tpu.matmul %25, %27, %cst_32 {dimension_numbers = #tpu.dot_dimension_numbers<[1], [0], [0], [1], [0, 0, 1, 1], [], []>} : vector<8x8xbf16>, vector<8x128xbf16>, vector<8x128xf32> -> vector<8x128xf32>
    %29 = arith.addf %22, %28 : vector<8x128xf32>
    %30 = vector.extract_strided_slice %24 {offsets = [1, 0], sizes = [8, 8], strides = [1, 1]} : vector<9x8xbf16> to vector<8x8xbf16>
    %c2_33 = arith.constant 2 : index
    %c1_34 = arith.constant 1 : index
    %c0_35 = arith.constant 0 : index
    %c0_36 = arith.constant 0 : index
    %31 = vector.load %arg6[%c2_33, %c1_34, %c0_35, %c0_36] : memref<4x2x8x128xbf16, #tpu.memory_space<vmem>>, vector<1x1x8x128xbf16>
    %32 = vector.shape_cast %31 : vector<1x1x8x128xbf16> to vector<8x128xbf16>
    %cst_37 = arith.constant dense<0.000000e+00> : vector<8x128xf32>
    %33 = tpu.matmul %30, %32, %cst_37 {dimension_numbers = #tpu.dot_dimension_numbers<[1], [0], [0], [1], [0, 0, 1, 1], [], []>} : vector<8x8xbf16>, vector<8x128xbf16>, vector<8x128xf32> -> vector<8x128xf32>
    %34 = arith.addf %29, %33 : vector<8x128xf32>
    %c0_38 = arith.constant 0 : index
    %c0_39 = arith.constant 0 : index
    %c0_40 = arith.constant 0 : index
    %c0_41 = arith.constant 0 : index
    %35 = vector.load %arg5[%c0_38, %c0_39, %c0_40, %c0_41] : memref<1x1x9x8xbf16, #tpu.memory_space<vmem>>, vector<1x1x9x8xbf16>
    %36 = vector.shape_cast %35 : vector<1x1x9x8xbf16> to vector<9x8xbf16>
    %37 = vector.extract_strided_slice %36 {offsets = [0, 0], sizes = [8, 8], strides = [1, 1]} : vector<9x8xbf16> to vector<8x8xbf16>
    %c3 = arith.constant 3 : index
    %c0_42 = arith.constant 0 : index
    %c0_43 = arith.constant 0 : index
    %c0_44 = arith.constant 0 : index
    %38 = vector.load %arg6[%c3, %c0_42, %c0_43, %c0_44] : memref<4x2x8x128xbf16, #tpu.memory_space<vmem>>, vector<1x1x8x128xbf16>
    %39 = vector.shape_cast %38 : vector<1x1x8x128xbf16> to vector<8x128xbf16>
    %cst_45 = arith.constant dense<0.000000e+00> : vector<8x128xf32>
    %40 = tpu.matmul %37, %39, %cst_45 {dimension_numbers = #tpu.dot_dimension_numbers<[1], [0], [0], [1], [0, 0, 1, 1], [], []>} : vector<8x8xbf16>, vector<8x128xbf16>, vector<8x128xf32> -> vector<8x128xf32>
    %41 = arith.addf %34, %40 : vector<8x128xf32>
    %42 = vector.extract_strided_slice %36 {offsets = [1, 0], sizes = [8, 8], strides = [1, 1]} : vector<9x8xbf16> to vector<8x8xbf16>
    %c3_46 = arith.constant 3 : index
    %c1_47 = arith.constant 1 : index
    %c0_48 = arith.constant 0 : index
    %c0_49 = arith.constant 0 : index
    %43 = vector.load %arg6[%c3_46, %c1_47, %c0_48, %c0_49] : memref<4x2x8x128xbf16, #tpu.memory_space<vmem>>, vector<1x1x8x128xbf16>
    %44 = vector.shape_cast %43 : vector<1x1x8x128xbf16> to vector<8x128xbf16>
    %cst_50 = arith.constant dense<0.000000e+00> : vector<8x128xf32>
    %45 = tpu.matmul %42, %44, %cst_50 {dimension_numbers = #tpu.dot_dimension_numbers<[1], [0], [0], [1], [0, 0, 1, 1], [], []>} : vector<8x8xbf16>, vector<8x128xbf16>, vector<8x128xf32> -> vector<8x128xf32>
    %46 = arith.addf %41, %45 : vector<8x128xf32>
    %c0_51 = arith.constant 0 : index
    %c0_52 = arith.constant 0 : index
    %47 = vector.load %arg7[%c0_51, %c0_52] : memref<1x128xf32, #tpu.memory_space<vmem>>, vector<1x128xf32>
    %48 = vector.broadcast %47 : vector<1x128xf32> to vector<8x128xf32>
    %49 = arith.addf %46, %48 : vector<8x128xf32>
    %cst_53 = arith.constant 0.000000e+00 : f32
    %50 = vector.broadcast %cst_53 : f32 to vector<8x128xf32>
    %51 = arith.cmpf ogt, %49, %50 : vector<8x128xf32>
    %cst_54 = arith.constant 2.000000e-01 : f32
    %52 = vector.broadcast %cst_54 : f32 to vector<8x128xf32>
    %53 = arith.mulf %52, %49 : vector<8x128xf32>
    %54 = arith.select %51, %49, %53 : vector<8x128xi1>, vector<8x128xf32>
    %55 = arith.truncf %54 : vector<8x128xf32> to vector<8x128xbf16>
    %c0_55 = arith.constant 0 : index
    %c0_56 = arith.constant 0 : index
    %c0_57 = arith.constant 0 : index
    %c0_58 = arith.constant 0 : index
    %56 = vector.load %arg8[%c0_55, %c0_56, %c0_57, %c0_58] : memref<1x1x8x128xbf16, #tpu.memory_space<vmem>>, vector<1x1x8x128xbf16>
    %57 = vector.shape_cast %56 : vector<1x1x8x128xbf16> to vector<8x128xbf16>
    %58 = vector.shape_cast %55 : vector<8x128xbf16> to vector<1x1x8x128xbf16>
    tpu.vector_store %arg8[%c0_55, %c0_56, %c0_57, %c0_58], %58 {strides = array<i32>} : memref<1x1x8x128xbf16, #tpu.memory_space<vmem>>, vector<1x1x8x128xbf16>,
    return
  }
  func.func @transform_0(%arg0: i32, %arg1: i32) -> (i32, i32, i32, i32) {
    %c2_i32 = arith.constant 2 : i32
    %0 = arith.muli %c2_i32, %arg1 : i32
    %c0_i32 = arith.constant 0 : i32
    %1 = arith.addi %0, %c0_i32 : i32
    %c0_i32_0 = arith.constant 0 : i32
    %c0_i32_1 = arith.constant 0 : i32
    %c0_i32_2 = arith.constant 0 : i32
    return %arg0, %1, %c0_i32_0, %c0_i32_1 : i32, i32, i32, i32
  }
  func.func @transform_1(%arg0: i32, %arg1: i32) -> (i32, i32, i32, i32) {
    %c2_i32 = arith.constant 2 : i32
    %0 = arith.muli %c2_i32, %arg1 : i32
    %c1_i32 = arith.constant 1 : i32
    %1 = arith.addi %0, %c1_i32 : i32
    %c0_i32 = arith.constant 0 : i32
    %c0_i32_0 = arith.constant 0 : i32
    %c0_i32_1 = arith.constant 0 : i32
    return %arg0, %1, %c0_i32, %c0_i32_0 : i32, i32, i32, i32
  }
  func.func @transform_2(%arg0: i32, %arg1: i32) -> (i32, i32, i32, i32) {
    %c2_i32 = arith.constant 2 : i32
    %0 = arith.muli %c2_i32, %arg1 : i32
    %c2_i32_0 = arith.constant 2 : i32
    %1 = arith.addi %0, %c2_i32_0 : i32
    %c0_i32 = arith.constant 0 : i32
    %c0_i32_1 = arith.constant 0 : i32
    %c0_i32_2 = arith.constant 0 : i32
    return %arg0, %1, %c0_i32, %c0_i32_1 : i32, i32, i32, i32
  }
  func.func @transform_3(%arg0: i32, %arg1: i32) -> (i32, i32, i32, i32) {
    %c2_i32 = arith.constant 2 : i32
    %0 = arith.muli %c2_i32, %arg1 : i32
    %c3_i32 = arith.constant 3 : i32
    %1 = arith.addi %0, %c3_i32 : i32
    %c0_i32 = arith.constant 0 : i32
    %c0_i32_0 = arith.constant 0 : i32
    %c0_i32_1 = arith.constant 0 : i32
    return %arg0, %1, %c0_i32, %c0_i32_0 : i32, i32, i32, i32
  }
  func.func @transform_4(%arg0: i32, %arg1: i32) -> (i32, i32, i32, i32) {
    %c0_i32 = arith.constant 0 : i32
    %c0_i32_0 = arith.constant 0 : i32
    %c0_i32_1 = arith.constant 0 : i32
    %c0_i32_2 = arith.constant 0 : i32
    %c0_i32_3 = arith.constant 0 : i32
    return %c0_i32, %c0_i32_0, %c0_i32_1, %c0_i32_2 : i32, i32, i32, i32
  }
  func.func @transform_5(%arg0: i32, %arg1: i32) -> (i32, i32) {
    %c0_i32 = arith.constant 0 : i32
    %c0_i32_0 = arith.constant 0 : i32
    %c0_i32_1 = arith.constant 0 : i32
    return %c0_i32, %c0_i32_0 : i32, i32
  }
  func.func @transform_6(%arg0: i32, %arg1: i32) -> (i32, i32, i32, i32) {
    %c0_i32 = arith.constant 0 : i32
    %c0_i32_0 = arith.constant 0 : i32
    %c0_i32_1 = arith.constant 0 : i32
    return %arg0, %arg1, %c0_i32, %c0_i32_0 : i32, i32, i32, i32
  }
}

module attributes {stable_mosaic.version = 11 : i64} {
  func.func @kernel(%arg0: i32, %arg1: i32, %arg2: memref<1x1x5x256xbf16, #tpu.memory_space<vmem>>, %arg3: memref<1x1x5x256xbf16, #tpu.memory_space<vmem>>, %arg4: memref<1x1x5x256xbf16, #tpu.memory_space<vmem>>, %arg5: memref<1x1x5x256xbf16, #tpu.memory_space<vmem>>, %arg6: memref<4x2x256x128xbf16, #tpu.memory_space<vmem>>, %arg7: memref<1x1x4x128xbf16, #tpu.memory_space<vmem>>, %arg8: memref<1x1x2x128xf32, #tpu.memory_space<vmem>>) attributes {dimension_semantics = [#tpu.dimension_semantics<parallel>, #tpu.dimension_semantics<parallel>], iteration_bounds = array<i64: 2, 4>, scalar_prefetch = 0 : i64, scratch_operands = 0 : i64, tpu.core_type = #tpu.core_type<tc>, window_params = [{transform_indices = @transform_0, window_bounds = array<i64: 1, 1, 5, 256>}, {transform_indices = @transform_1, window_bounds = array<i64: 1, 1, 5, 256>}, {transform_indices = @transform_2, window_bounds = array<i64: 1, 1, 5, 256>}, {transform_indices = @transform_3, window_bounds = array<i64: 1, 1, 5, 256>}, {pipeline_mode = #tpu.pipeline_mode<synchronous>, transform_indices = @transform_4, window_bounds = array<i64: 4, 2, 256, 128>}, {transform_indices = @transform_5, window_bounds = array<i64: 1, 1, 4, 128>}, {transform_indices = @transform_6, window_bounds = array<i64: 1, 1, 2, 128>}]} {
    %c0 = arith.constant 0 : index
    %c0_0 = arith.constant 0 : index
    %c0_1 = arith.constant 0 : index
    %c0_2 = arith.constant 0 : index
    %0 = vector.load %arg2[%c0, %c0_0, %c0_1, %c0_2] : memref<1x1x5x256xbf16, #tpu.memory_space<vmem>>, vector<1x1x5x256xbf16>
    %1 = vector.shape_cast %0 : vector<1x1x5x256xbf16> to vector<5x256xbf16>
    %2 = vector.extract_strided_slice %1 {offsets = [0, 0], sizes = [4, 256], strides = [1, 1]} : vector<5x256xbf16> to vector<4x256xbf16>
    %c0_3 = arith.constant 0 : index
    %c0_4 = arith.constant 0 : index
    %c0_5 = arith.constant 0 : index
    %c0_6 = arith.constant 0 : index
    %3 = vector.load %arg6[%c0_3, %c0_4, %c0_5, %c0_6] : memref<4x2x256x128xbf16, #tpu.memory_space<vmem>>, vector<1x1x256x128xbf16>
    %4 = vector.shape_cast %3 : vector<1x1x256x128xbf16> to vector<256x128xbf16>
    %cst = arith.constant dense<0.000000e+00> : vector<4x128xf32>
    %5 = tpu.matmul %2, %4, %cst {dimension_numbers = #tpu.dot_dimension_numbers<[1], [0], [0], [1], [0, 0, 1, 1], [], []>} : vector<4x256xbf16>, vector<256x128xbf16>, vector<4x128xf32> -> vector<4x128xf32>
    %6 = vector.extract_strided_slice %1 {offsets = [1, 0], sizes = [4, 256], strides = [1, 1]} : vector<5x256xbf16> to vector<4x256xbf16>
    %c0_7 = arith.constant 0 : index
    %c1 = arith.constant 1 : index
    %c0_8 = arith.constant 0 : index
    %c0_9 = arith.constant 0 : index
    %7 = vector.load %arg6[%c0_7, %c1, %c0_8, %c0_9] : memref<4x2x256x128xbf16, #tpu.memory_space<vmem>>, vector<1x1x256x128xbf16>
    %8 = vector.shape_cast %7 : vector<1x1x256x128xbf16> to vector<256x128xbf16>
    %cst_10 = arith.constant dense<0.000000e+00> : vector<4x128xf32>
    %9 = tpu.matmul %6, %8, %cst_10 {dimension_numbers = #tpu.dot_dimension_numbers<[1], [0], [0], [1], [0, 0, 1, 1], [], []>} : vector<4x256xbf16>, vector<256x128xbf16>, vector<4x128xf32> -> vector<4x128xf32>
    %10 = arith.addf %5, %9 : vector<4x128xf32>
    %c0_11 = arith.constant 0 : index
    %c0_12 = arith.constant 0 : index
    %c0_13 = arith.constant 0 : index
    %c0_14 = arith.constant 0 : index
    %11 = vector.load %arg3[%c0_11, %c0_12, %c0_13, %c0_14] : memref<1x1x5x256xbf16, #tpu.memory_space<vmem>>, vector<1x1x5x256xbf16>
    %12 = vector.shape_cast %11 : vector<1x1x5x256xbf16> to vector<5x256xbf16>
    %13 = vector.extract_strided_slice %12 {offsets = [0, 0], sizes = [4, 256], strides = [1, 1]} : vector<5x256xbf16> to vector<4x256xbf16>
    %c1_15 = arith.constant 1 : index
    %c0_16 = arith.constant 0 : index
    %c0_17 = arith.constant 0 : index
    %c0_18 = arith.constant 0 : index
    %14 = vector.load %arg6[%c1_15, %c0_16, %c0_17, %c0_18] : memref<4x2x256x128xbf16, #tpu.memory_space<vmem>>, vector<1x1x256x128xbf16>
    %15 = vector.shape_cast %14 : vector<1x1x256x128xbf16> to vector<256x128xbf16>
    %cst_19 = arith.constant dense<0.000000e+00> : vector<4x128xf32>
    %16 = tpu.matmul %13, %15, %cst_19 {dimension_numbers = #tpu.dot_dimension_numbers<[1], [0], [0], [1], [0, 0, 1, 1], [], []>} : vector<4x256xbf16>, vector<256x128xbf16>, vector<4x128xf32> -> vector<4x128xf32>
    %17 = arith.addf %10, %16 : vector<4x128xf32>
    %18 = vector.extract_strided_slice %12 {offsets = [1, 0], sizes = [4, 256], strides = [1, 1]} : vector<5x256xbf16> to vector<4x256xbf16>
    %c1_20 = arith.constant 1 : index
    %c1_21 = arith.constant 1 : index
    %c0_22 = arith.constant 0 : index
    %c0_23 = arith.constant 0 : index
    %19 = vector.load %arg6[%c1_20, %c1_21, %c0_22, %c0_23] : memref<4x2x256x128xbf16, #tpu.memory_space<vmem>>, vector<1x1x256x128xbf16>
    %20 = vector.shape_cast %19 : vector<1x1x256x128xbf16> to vector<256x128xbf16>
    %cst_24 = arith.constant dense<0.000000e+00> : vector<4x128xf32>
    %21 = tpu.matmul %18, %20, %cst_24 {dimension_numbers = #tpu.dot_dimension_numbers<[1], [0], [0], [1], [0, 0, 1, 1], [], []>} : vector<4x256xbf16>, vector<256x128xbf16>, vector<4x128xf32> -> vector<4x128xf32>
    %22 = arith.addf %17, %21 : vector<4x128xf32>
    %c0_25 = arith.constant 0 : index
    %c0_26 = arith.constant 0 : index
    %c0_27 = arith.constant 0 : index
    %c0_28 = arith.constant 0 : index
    %23 = vector.load %arg4[%c0_25, %c0_26, %c0_27, %c0_28] : memref<1x1x5x256xbf16, #tpu.memory_space<vmem>>, vector<1x1x5x256xbf16>
    %24 = vector.shape_cast %23 : vector<1x1x5x256xbf16> to vector<5x256xbf16>
    %25 = vector.extract_strided_slice %24 {offsets = [0, 0], sizes = [4, 256], strides = [1, 1]} : vector<5x256xbf16> to vector<4x256xbf16>
    %c2 = arith.constant 2 : index
    %c0_29 = arith.constant 0 : index
    %c0_30 = arith.constant 0 : index
    %c0_31 = arith.constant 0 : index
    %26 = vector.load %arg6[%c2, %c0_29, %c0_30, %c0_31] : memref<4x2x256x128xbf16, #tpu.memory_space<vmem>>, vector<1x1x256x128xbf16>
    %27 = vector.shape_cast %26 : vector<1x1x256x128xbf16> to vector<256x128xbf16>
    %cst_32 = arith.constant dense<0.000000e+00> : vector<4x128xf32>
    %28 = tpu.matmul %25, %27, %cst_32 {dimension_numbers = #tpu.dot_dimension_numbers<[1], [0], [0], [1], [0, 0, 1, 1], [], []>} : vector<4x256xbf16>, vector<256x128xbf16>, vector<4x128xf32> -> vector<4x128xf32>
    %29 = arith.addf %22, %28 : vector<4x128xf32>
    %30 = vector.extract_strided_slice %24 {offsets = [1, 0], sizes = [4, 256], strides = [1, 1]} : vector<5x256xbf16> to vector<4x256xbf16>
    %c2_33 = arith.constant 2 : index
    %c1_34 = arith.constant 1 : index
    %c0_35 = arith.constant 0 : index
    %c0_36 = arith.constant 0 : index
    %31 = vector.load %arg6[%c2_33, %c1_34, %c0_35, %c0_36] : memref<4x2x256x128xbf16, #tpu.memory_space<vmem>>, vector<1x1x256x128xbf16>
    %32 = vector.shape_cast %31 : vector<1x1x256x128xbf16> to vector<256x128xbf16>
    %cst_37 = arith.constant dense<0.000000e+00> : vector<4x128xf32>
    %33 = tpu.matmul %30, %32, %cst_37 {dimension_numbers = #tpu.dot_dimension_numbers<[1], [0], [0], [1], [0, 0, 1, 1], [], []>} : vector<4x256xbf16>, vector<256x128xbf16>, vector<4x128xf32> -> vector<4x128xf32>
    %34 = arith.addf %29, %33 : vector<4x128xf32>
    %c0_38 = arith.constant 0 : index
    %c0_39 = arith.constant 0 : index
    %c0_40 = arith.constant 0 : index
    %c0_41 = arith.constant 0 : index
    %35 = vector.load %arg5[%c0_38, %c0_39, %c0_40, %c0_41] : memref<1x1x5x256xbf16, #tpu.memory_space<vmem>>, vector<1x1x5x256xbf16>
    %36 = vector.shape_cast %35 : vector<1x1x5x256xbf16> to vector<5x256xbf16>
    %37 = vector.extract_strided_slice %36 {offsets = [0, 0], sizes = [4, 256], strides = [1, 1]} : vector<5x256xbf16> to vector<4x256xbf16>
    %c3 = arith.constant 3 : index
    %c0_42 = arith.constant 0 : index
    %c0_43 = arith.constant 0 : index
    %c0_44 = arith.constant 0 : index
    %38 = vector.load %arg6[%c3, %c0_42, %c0_43, %c0_44] : memref<4x2x256x128xbf16, #tpu.memory_space<vmem>>, vector<1x1x256x128xbf16>
    %39 = vector.shape_cast %38 : vector<1x1x256x128xbf16> to vector<256x128xbf16>
    %cst_45 = arith.constant dense<0.000000e+00> : vector<4x128xf32>
    %40 = tpu.matmul %37, %39, %cst_45 {dimension_numbers = #tpu.dot_dimension_numbers<[1], [0], [0], [1], [0, 0, 1, 1], [], []>} : vector<4x256xbf16>, vector<256x128xbf16>, vector<4x128xf32> -> vector<4x128xf32>
    %41 = arith.addf %34, %40 : vector<4x128xf32>
    %42 = vector.extract_strided_slice %36 {offsets = [1, 0], sizes = [4, 256], strides = [1, 1]} : vector<5x256xbf16> to vector<4x256xbf16>
    %c3_46 = arith.constant 3 : index
    %c1_47 = arith.constant 1 : index
    %c0_48 = arith.constant 0 : index
    %c0_49 = arith.constant 0 : index
    %43 = vector.load %arg6[%c3_46, %c1_47, %c0_48, %c0_49] : memref<4x2x256x128xbf16, #tpu.memory_space<vmem>>, vector<1x1x256x128xbf16>
    %44 = vector.shape_cast %43 : vector<1x1x256x128xbf16> to vector<256x128xbf16>
    %cst_50 = arith.constant dense<0.000000e+00> : vector<4x128xf32>
    %45 = tpu.matmul %42, %44, %cst_50 {dimension_numbers = #tpu.dot_dimension_numbers<[1], [0], [0], [1], [0, 0, 1, 1], [], []>} : vector<4x256xbf16>, vector<256x128xbf16>, vector<4x128xf32> -> vector<4x128xf32>
    %46 = arith.addf %41, %45 : vector<4x128xf32>
    %cst_51 = arith.constant dense<0.000000e+00> : vector<128xf32>
    %47 = vector.multi_reduction <add>, %46, %cst_51 [0] : vector<4x128xf32> to vector<128xf32>
    %48 = vector.shape_cast %47 : vector<128xf32> to vector<1x128xf32>
    %49 = arith.mulf %46, %46 : vector<4x128xf32>
    %cst_52 = arith.constant dense<0.000000e+00> : vector<128xf32>
    %50 = vector.multi_reduction <add>, %49, %cst_52 [0] : vector<4x128xf32> to vector<128xf32>
    %51 = vector.shape_cast %50 : vector<128xf32> to vector<1x128xf32>
    %52 = tpu.concatenate %48, %51 in 0 : vector<1x128xf32>, vector<1x128xf32> -> vector<2x128xf32>
    %c0_53 = arith.constant 0 : index
    %c0_54 = arith.constant 0 : index
    %c0_55 = arith.constant 0 : index
    %c0_56 = arith.constant 0 : index
    %53 = vector.load %arg8[%c0_53, %c0_54, %c0_55, %c0_56] : memref<1x1x2x128xf32, #tpu.memory_space<vmem>>, vector<1x1x2x128xf32>
    %54 = vector.shape_cast %53 : vector<1x1x2x128xf32> to vector<2x128xf32>
    %55 = vector.shape_cast %52 : vector<2x128xf32> to vector<1x1x2x128xf32>
    tpu.vector_store %arg8[%c0_53, %c0_54, %c0_55, %c0_56], %55 {strides = array<i32>} : memref<1x1x2x128xf32, #tpu.memory_space<vmem>>, vector<1x1x2x128xf32>,
    %56 = arith.truncf %46 : vector<4x128xf32> to vector<4x128xbf16>
    %c0_57 = arith.constant 0 : index
    %c0_58 = arith.constant 0 : index
    %c0_59 = arith.constant 0 : index
    %c0_60 = arith.constant 0 : index
    %57 = vector.load %arg7[%c0_57, %c0_58, %c0_59, %c0_60] : memref<1x1x4x128xbf16, #tpu.memory_space<vmem>>, vector<1x1x4x128xbf16>
    %58 = vector.shape_cast %57 : vector<1x1x4x128xbf16> to vector<4x128xbf16>
    %59 = vector.shape_cast %56 : vector<4x128xbf16> to vector<1x1x4x128xbf16>
    tpu.vector_store %arg7[%c0_57, %c0_58, %c0_59, %c0_60], %59 {strides = array<i32>} : memref<1x1x4x128xbf16, #tpu.memory_space<vmem>>, vector<1x1x4x128xbf16>,
    return
  }
  func.func @transform_0(%arg0: i32, %arg1: i32) -> (i32, i32, i32, i32) {
    %c2_i32 = arith.constant 2 : i32
    %0 = arith.muli %c2_i32, %arg1 : i32
    %c0_i32 = arith.constant 0 : i32
    %1 = arith.addi %0, %c0_i32 : i32
    %c0_i32_0 = arith.constant 0 : i32
    %c0_i32_1 = arith.constant 0 : i32
    %c0_i32_2 = arith.constant 0 : i32
    return %arg0, %1, %c0_i32_0, %c0_i32_1 : i32, i32, i32, i32
  }
  func.func @transform_1(%arg0: i32, %arg1: i32) -> (i32, i32, i32, i32) {
    %c2_i32 = arith.constant 2 : i32
    %0 = arith.muli %c2_i32, %arg1 : i32
    %c1_i32 = arith.constant 1 : i32
    %1 = arith.addi %0, %c1_i32 : i32
    %c0_i32 = arith.constant 0 : i32
    %c0_i32_0 = arith.constant 0 : i32
    %c0_i32_1 = arith.constant 0 : i32
    return %arg0, %1, %c0_i32, %c0_i32_0 : i32, i32, i32, i32
  }
  func.func @transform_2(%arg0: i32, %arg1: i32) -> (i32, i32, i32, i32) {
    %c2_i32 = arith.constant 2 : i32
    %0 = arith.muli %c2_i32, %arg1 : i32
    %c2_i32_0 = arith.constant 2 : i32
    %1 = arith.addi %0, %c2_i32_0 : i32
    %c0_i32 = arith.constant 0 : i32
    %c0_i32_1 = arith.constant 0 : i32
    %c0_i32_2 = arith.constant 0 : i32
    return %arg0, %1, %c0_i32, %c0_i32_1 : i32, i32, i32, i32
  }
  func.func @transform_3(%arg0: i32, %arg1: i32) -> (i32, i32, i32, i32) {
    %c2_i32 = arith.constant 2 : i32
    %0 = arith.muli %c2_i32, %arg1 : i32
    %c3_i32 = arith.constant 3 : i32
    %1 = arith.addi %0, %c3_i32 : i32
    %c0_i32 = arith.constant 0 : i32
    %c0_i32_0 = arith.constant 0 : i32
    %c0_i32_1 = arith.constant 0 : i32
    return %arg0, %1, %c0_i32, %c0_i32_0 : i32, i32, i32, i32
  }
  func.func @transform_4(%arg0: i32, %arg1: i32) -> (i32, i32, i32, i32) {
    %c0_i32 = arith.constant 0 : i32
    %c0_i32_0 = arith.constant 0 : i32
    %c0_i32_1 = arith.constant 0 : i32
    %c0_i32_2 = arith.constant 0 : i32
    %c0_i32_3 = arith.constant 0 : i32
    return %c0_i32, %c0_i32_0, %c0_i32_1, %c0_i32_2 : i32, i32, i32, i32
  }
  func.func @transform_5(%arg0: i32, %arg1: i32) -> (i32, i32, i32, i32) {
    %c0_i32 = arith.constant 0 : i32
    %c0_i32_0 = arith.constant 0 : i32
    %c0_i32_1 = arith.constant 0 : i32
    return %arg0, %arg1, %c0_i32, %c0_i32_0 : i32, i32, i32, i32
  }
  func.func @transform_6(%arg0: i32, %arg1: i32) -> (i32, i32, i32, i32) {
    %c0_i32 = arith.constant 0 : i32
    %c0_i32_0 = arith.constant 0 : i32
    %c0_i32_1 = arith.constant 0 : i32
    return %arg0, %arg1, %c0_i32, %c0_i32_0 : i32, i32, i32, i32
  }
}

module attributes {stable_mosaic.version = 11 : i64} {
  func.func @_bn_act_kernel(%arg0: i32, %arg1: i32, %arg2: memref<1x1x4x128xbf16, #tpu.memory_space<vmem>>, %arg3: memref<1x128xf32, #tpu.memory_space<vmem>>, %arg4: memref<1x128xf32, #tpu.memory_space<vmem>>, %arg5: memref<1x1x4x128xbf16, #tpu.memory_space<vmem>>) attributes {dimension_semantics = [#tpu.dimension_semantics<parallel>, #tpu.dimension_semantics<parallel>], iteration_bounds = array<i64: 2, 4>, scalar_prefetch = 0 : i64, scratch_operands = 0 : i64, tpu.core_type = #tpu.core_type<tc>, window_params = [{transform_indices = @transform_0, window_bounds = array<i64: 1, 1, 4, 128>}, {pipeline_mode = #tpu.pipeline_mode<synchronous>, transform_indices = @transform_1, window_bounds = array<i64: 1, 128>}, {pipeline_mode = #tpu.pipeline_mode<synchronous>, transform_indices = @transform_2, window_bounds = array<i64: 1, 128>}, {transform_indices = @transform_3, window_bounds = array<i64: 1, 1, 4, 128>}]} {
    %c0 = arith.constant 0 : index
    %c0_0 = arith.constant 0 : index
    %c0_1 = arith.constant 0 : index
    %c0_2 = arith.constant 0 : index
    %0 = vector.load %arg2[%c0, %c0_0, %c0_1, %c0_2] : memref<1x1x4x128xbf16, #tpu.memory_space<vmem>>, vector<1x1x4x128xbf16>
    %1 = vector.shape_cast %0 : vector<1x1x4x128xbf16> to vector<4x128xbf16>
    %2 = arith.extf %1 : vector<4x128xbf16> to vector<4x128xf32>
    %c0_3 = arith.constant 0 : index
    %c0_4 = arith.constant 0 : index
    %3 = vector.load %arg3[%c0_3, %c0_4] : memref<1x128xf32, #tpu.memory_space<vmem>>, vector<1x128xf32>
    %4 = vector.broadcast %3 : vector<1x128xf32> to vector<4x128xf32>
    %5 = arith.mulf %2, %4 : vector<4x128xf32>
    %c0_5 = arith.constant 0 : index
    %c0_6 = arith.constant 0 : index
    %6 = vector.load %arg4[%c0_5, %c0_6] : memref<1x128xf32, #tpu.memory_space<vmem>>, vector<1x128xf32>
    %7 = vector.broadcast %6 : vector<1x128xf32> to vector<4x128xf32>
    %8 = arith.addf %5, %7 : vector<4x128xf32>
    %cst = arith.constant 0.000000e+00 : f32
    %9 = vector.broadcast %cst : f32 to vector<4x128xf32>
    %10 = arith.cmpf ogt, %8, %9 : vector<4x128xf32>
    %cst_7 = arith.constant 2.000000e-01 : f32
    %11 = vector.broadcast %cst_7 : f32 to vector<4x128xf32>
    %12 = arith.mulf %11, %8 : vector<4x128xf32>
    %13 = arith.select %10, %8, %12 : vector<4x128xi1>, vector<4x128xf32>
    %14 = arith.truncf %13 : vector<4x128xf32> to vector<4x128xbf16>
    %c0_8 = arith.constant 0 : index
    %c0_9 = arith.constant 0 : index
    %c0_10 = arith.constant 0 : index
    %c0_11 = arith.constant 0 : index
    %15 = vector.load %arg5[%c0_8, %c0_9, %c0_10, %c0_11] : memref<1x1x4x128xbf16, #tpu.memory_space<vmem>>, vector<1x1x4x128xbf16>
    %16 = vector.shape_cast %15 : vector<1x1x4x128xbf16> to vector<4x128xbf16>
    %17 = vector.shape_cast %14 : vector<4x128xbf16> to vector<1x1x4x128xbf16>
    tpu.vector_store %arg5[%c0_8, %c0_9, %c0_10, %c0_11], %17 {strides = array<i32>} : memref<1x1x4x128xbf16, #tpu.memory_space<vmem>>, vector<1x1x4x128xbf16>,
    return
  }
  func.func @transform_0(%arg0: i32, %arg1: i32) -> (i32, i32, i32, i32) {
    %c0_i32 = arith.constant 0 : i32
    %c0_i32_0 = arith.constant 0 : i32
    %c0_i32_1 = arith.constant 0 : i32
    return %arg0, %arg1, %c0_i32, %c0_i32_0 : i32, i32, i32, i32
  }
  func.func @transform_1(%arg0: i32, %arg1: i32) -> (i32, i32) {
    %c0_i32 = arith.constant 0 : i32
    %c0_i32_0 = arith.constant 0 : i32
    %c0_i32_1 = arith.constant 0 : i32
    return %c0_i32, %c0_i32_0 : i32, i32
  }
  func.func @transform_2(%arg0: i32, %arg1: i32) -> (i32, i32) {
    %c0_i32 = arith.constant 0 : i32
    %c0_i32_0 = arith.constant 0 : i32
    %c0_i32_1 = arith.constant 0 : i32
    return %c0_i32, %c0_i32_0 : i32, i32
  }
  func.func @transform_3(%arg0: i32, %arg1: i32) -> (i32, i32, i32, i32) {
    %c0_i32 = arith.constant 0 : i32
    %c0_i32_0 = arith.constant 0 : i32
    %c0_i32_1 = arith.constant 0 : i32
    return %arg0, %arg1, %c0_i32, %c0_i32_0 : i32, i32, i32, i32
  }
}

module attributes {stable_mosaic.version = 11 : i64} {
  func.func @kernel(%arg0: i32, %arg1: i32, %arg2: memref<1x1x6x128xbf16, #tpu.memory_space<vmem>>, %arg3: memref<1x1x6x128xbf16, #tpu.memory_space<vmem>>, %arg4: memref<1x1x6x128xbf16, #tpu.memory_space<vmem>>, %arg5: memref<1x1x6x128xbf16, #tpu.memory_space<vmem>>, %arg6: memref<4x4x128x128xbf16, #tpu.memory_space<vmem>>, %arg7: memref<1x1x3x128xbf16, #tpu.memory_space<vmem>>, %arg8: memref<1x1x2x128xf32, #tpu.memory_space<vmem>>) attributes {dimension_semantics = [#tpu.dimension_semantics<parallel>, #tpu.dimension_semantics<parallel>], iteration_bounds = array<i64: 2, 3>, scalar_prefetch = 0 : i64, scratch_operands = 0 : i64, tpu.core_type = #tpu.core_type<tc>, window_params = [{transform_indices = @transform_0, window_bounds = array<i64: 1, 1, 6, 128>}, {transform_indices = @transform_1, window_bounds = array<i64: 1, 1, 6, 128>}, {transform_indices = @transform_2, window_bounds = array<i64: 1, 1, 6, 128>}, {transform_indices = @transform_3, window_bounds = array<i64: 1, 1, 6, 128>}, {pipeline_mode = #tpu.pipeline_mode<synchronous>, transform_indices = @transform_4, window_bounds = array<i64: 4, 4, 128, 128>}, {transform_indices = @transform_5, window_bounds = array<i64: 1, 1, 3, 128>}, {transform_indices = @transform_6, window_bounds = array<i64: 1, 1, 2, 128>}]} {
    %c0 = arith.constant 0 : index
    %c0_0 = arith.constant 0 : index
    %c0_1 = arith.constant 0 : index
    %c0_2 = arith.constant 0 : index
    %0 = vector.load %arg2[%c0, %c0_0, %c0_1, %c0_2] : memref<1x1x6x128xbf16, #tpu.memory_space<vmem>>, vector<1x1x6x128xbf16>
    %1 = vector.shape_cast %0 : vector<1x1x6x128xbf16> to vector<6x128xbf16>
    %2 = vector.extract_strided_slice %1 {offsets = [0, 0], sizes = [3, 128], strides = [1, 1]} : vector<6x128xbf16> to vector<3x128xbf16>
    %c0_3 = arith.constant 0 : index
    %c0_4 = arith.constant 0 : index
    %c0_5 = arith.constant 0 : index
    %c0_6 = arith.constant 0 : index
    %3 = vector.load %arg6[%c0_3, %c0_4, %c0_5, %c0_6] : memref<4x4x128x128xbf16, #tpu.memory_space<vmem>>, vector<1x1x128x128xbf16>
    %4 = vector.shape_cast %3 : vector<1x1x128x128xbf16> to vector<128x128xbf16>
    %cst = arith.constant dense<0.000000e+00> : vector<3x128xf32>
    %5 = tpu.matmul %2, %4, %cst {dimension_numbers = #tpu.dot_dimension_numbers<[1], [0], [0], [1], [0, 0, 1, 1], [], []>} : vector<3x128xbf16>, vector<128x128xbf16>, vector<3x128xf32> -> vector<3x128xf32>
    %6 = vector.extract_strided_slice %1 {offsets = [1, 0], sizes = [3, 128], strides = [1, 1]} : vector<6x128xbf16> to vector<3x128xbf16>
    %c0_7 = arith.constant 0 : index
    %c1 = arith.constant 1 : index
    %c0_8 = arith.constant 0 : index
    %c0_9 = arith.constant 0 : index
    %7 = vector.load %arg6[%c0_7, %c1, %c0_8, %c0_9] : memref<4x4x128x128xbf16, #tpu.memory_space<vmem>>, vector<1x1x128x128xbf16>
    %8 = vector.shape_cast %7 : vector<1x1x128x128xbf16> to vector<128x128xbf16>
    %cst_10 = arith.constant dense<0.000000e+00> : vector<3x128xf32>
    %9 = tpu.matmul %6, %8, %cst_10 {dimension_numbers = #tpu.dot_dimension_numbers<[1], [0], [0], [1], [0, 0, 1, 1], [], []>} : vector<3x128xbf16>, vector<128x128xbf16>, vector<3x128xf32> -> vector<3x128xf32>
    %10 = arith.addf %5, %9 : vector<3x128xf32>
    %11 = vector.extract_strided_slice %1 {offsets = [2, 0], sizes = [3, 128], strides = [1, 1]} : vector<6x128xbf16> to vector<3x128xbf16>
    %c0_11 = arith.constant 0 : index
    %c2 = arith.constant 2 : index
    %c0_12 = arith.constant 0 : index
    %c0_13 = arith.constant 0 : index
    %12 = vector.load %arg6[%c0_11, %c2, %c0_12, %c0_13] : memref<4x4x128x128xbf16, #tpu.memory_space<vmem>>, vector<1x1x128x128xbf16>
    %13 = vector.shape_cast %12 : vector<1x1x128x128xbf16> to vector<128x128xbf16>
    %cst_14 = arith.constant dense<0.000000e+00> : vector<3x128xf32>
    %14 = tpu.matmul %11, %13, %cst_14 {dimension_numbers = #tpu.dot_dimension_numbers<[1], [0], [0], [1], [0, 0, 1, 1], [], []>} : vector<3x128xbf16>, vector<128x128xbf16>, vector<3x128xf32> -> vector<3x128xf32>
    %15 = arith.addf %10, %14 : vector<3x128xf32>
    %16 = vector.extract_strided_slice %1 {offsets = [3, 0], sizes = [3, 128], strides = [1, 1]} : vector<6x128xbf16> to vector<3x128xbf16>
    %c0_15 = arith.constant 0 : index
    %c3 = arith.constant 3 : index
    %c0_16 = arith.constant 0 : index
    %c0_17 = arith.constant 0 : index
    %17 = vector.load %arg6[%c0_15, %c3, %c0_16, %c0_17] : memref<4x4x128x128xbf16, #tpu.memory_space<vmem>>, vector<1x1x128x128xbf16>
    %18 = vector.shape_cast %17 : vector<1x1x128x128xbf16> to vector<128x128xbf16>
    %cst_18 = arith.constant dense<0.000000e+00> : vector<3x128xf32>
    %19 = tpu.matmul %16, %18, %cst_18 {dimension_numbers = #tpu.dot_dimension_numbers<[1], [0], [0], [1], [0, 0, 1, 1], [], []>} : vector<3x128xbf16>, vector<128x128xbf16>, vector<3x128xf32> -> vector<3x128xf32>
    %20 = arith.addf %15, %19 : vector<3x128xf32>
    %c0_19 = arith.constant 0 : index
    %c0_20 = arith.constant 0 : index
    %c0_21 = arith.constant 0 : index
    %c0_22 = arith.constant 0 : index
    %21 = vector.load %arg3[%c0_19, %c0_20, %c0_21, %c0_22] : memref<1x1x6x128xbf16, #tpu.memory_space<vmem>>, vector<1x1x6x128xbf16>
    %22 = vector.shape_cast %21 : vector<1x1x6x128xbf16> to vector<6x128xbf16>
    %23 = vector.extract_strided_slice %22 {offsets = [0, 0], sizes = [3, 128], strides = [1, 1]} : vector<6x128xbf16> to vector<3x128xbf16>
    %c1_23 = arith.constant 1 : index
    %c0_24 = arith.constant 0 : index
    %c0_25 = arith.constant 0 : index
    %c0_26 = arith.constant 0 : index
    %24 = vector.load %arg6[%c1_23, %c0_24, %c0_25, %c0_26] : memref<4x4x128x128xbf16, #tpu.memory_space<vmem>>, vector<1x1x128x128xbf16>
    %25 = vector.shape_cast %24 : vector<1x1x128x128xbf16> to vector<128x128xbf16>
    %cst_27 = arith.constant dense<0.000000e+00> : vector<3x128xf32>
    %26 = tpu.matmul %23, %25, %cst_27 {dimension_numbers = #tpu.dot_dimension_numbers<[1], [0], [0], [1], [0, 0, 1, 1], [], []>} : vector<3x128xbf16>, vector<128x128xbf16>, vector<3x128xf32> -> vector<3x128xf32>
    %27 = arith.addf %20, %26 : vector<3x128xf32>
    %28 = vector.extract_strided_slice %22 {offsets = [1, 0], sizes = [3, 128], strides = [1, 1]} : vector<6x128xbf16> to vector<3x128xbf16>
    %c1_28 = arith.constant 1 : index
    %c1_29 = arith.constant 1 : index
    %c0_30 = arith.constant 0 : index
    %c0_31 = arith.constant 0 : index
    %29 = vector.load %arg6[%c1_28, %c1_29, %c0_30, %c0_31] : memref<4x4x128x128xbf16, #tpu.memory_space<vmem>>, vector<1x1x128x128xbf16>
    %30 = vector.shape_cast %29 : vector<1x1x128x128xbf16> to vector<128x128xbf16>
    %cst_32 = arith.constant dense<0.000000e+00> : vector<3x128xf32>
    %31 = tpu.matmul %28, %30, %cst_32 {dimension_numbers = #tpu.dot_dimension_numbers<[1], [0], [0], [1], [0, 0, 1, 1], [], []>} : vector<3x128xbf16>, vector<128x128xbf16>, vector<3x128xf32> -> vector<3x128xf32>
    %32 = arith.addf %27, %31 : vector<3x128xf32>
    %33 = vector.extract_strided_slice %22 {offsets = [2, 0], sizes = [3, 128], strides = [1, 1]} : vector<6x128xbf16> to vector<3x128xbf16>
    %c1_33 = arith.constant 1 : index
    %c2_34 = arith.constant 2 : index
    %c0_35 = arith.constant 0 : index
    %c0_36 = arith.constant 0 : index
    %34 = vector.load %arg6[%c1_33, %c2_34, %c0_35, %c0_36] : memref<4x4x128x128xbf16, #tpu.memory_space<vmem>>, vector<1x1x128x128xbf16>
    %35 = vector.shape_cast %34 : vector<1x1x128x128xbf16> to vector<128x128xbf16>
    %cst_37 = arith.constant dense<0.000000e+00> : vector<3x128xf32>
    %36 = tpu.matmul %33, %35, %cst_37 {dimension_numbers = #tpu.dot_dimension_numbers<[1], [0], [0], [1], [0, 0, 1, 1], [], []>} : vector<3x128xbf16>, vector<128x128xbf16>, vector<3x128xf32> -> vector<3x128xf32>
    %37 = arith.addf %32, %36 : vector<3x128xf32>
    %38 = vector.extract_strided_slice %22 {offsets = [3, 0], sizes = [3, 128], strides = [1, 1]} : vector<6x128xbf16> to vector<3x128xbf16>
    %c1_38 = arith.constant 1 : index
    %c3_39 = arith.constant 3 : index
    %c0_40 = arith.constant 0 : index
    %c0_41 = arith.constant 0 : index
    %39 = vector.load %arg6[%c1_38, %c3_39, %c0_40, %c0_41] : memref<4x4x128x128xbf16, #tpu.memory_space<vmem>>, vector<1x1x128x128xbf16>
    %40 = vector.shape_cast %39 : vector<1x1x128x128xbf16> to vector<128x128xbf16>
    %cst_42 = arith.constant dense<0.000000e+00> : vector<3x128xf32>
    %41 = tpu.matmul %38, %40, %cst_42 {dimension_numbers = #tpu.dot_dimension_numbers<[1], [0], [0], [1], [0, 0, 1, 1], [], []>} : vector<3x128xbf16>, vector<128x128xbf16>, vector<3x128xf32> -> vector<3x128xf32>
    %42 = arith.addf %37, %41 : vector<3x128xf32>
    %c0_43 = arith.constant 0 : index
    %c0_44 = arith.constant 0 : index
    %c0_45 = arith.constant 0 : index
    %c0_46 = arith.constant 0 : index
    %43 = vector.load %arg4[%c0_43, %c0_44, %c0_45, %c0_46] : memref<1x1x6x128xbf16, #tpu.memory_space<vmem>>, vector<1x1x6x128xbf16>
    %44 = vector.shape_cast %43 : vector<1x1x6x128xbf16> to vector<6x128xbf16>
    %45 = vector.extract_strided_slice %44 {offsets = [0, 0], sizes = [3, 128], strides = [1, 1]} : vector<6x128xbf16> to vector<3x128xbf16>
    %c2_47 = arith.constant 2 : index
    %c0_48 = arith.constant 0 : index
    %c0_49 = arith.constant 0 : index
    %c0_50 = arith.constant 0 : index
    %46 = vector.load %arg6[%c2_47, %c0_48, %c0_49, %c0_50] : memref<4x4x128x128xbf16, #tpu.memory_space<vmem>>, vector<1x1x128x128xbf16>
    %47 = vector.shape_cast %46 : vector<1x1x128x128xbf16> to vector<128x128xbf16>
    %cst_51 = arith.constant dense<0.000000e+00> : vector<3x128xf32>
    %48 = tpu.matmul %45, %47, %cst_51 {dimension_numbers = #tpu.dot_dimension_numbers<[1], [0], [0], [1], [0, 0, 1, 1], [], []>} : vector<3x128xbf16>, vector<128x128xbf16>, vector<3x128xf32> -> vector<3x128xf32>
    %49 = arith.addf %42, %48 : vector<3x128xf32>
    %50 = vector.extract_strided_slice %44 {offsets = [1, 0], sizes = [3, 128], strides = [1, 1]} : vector<6x128xbf16> to vector<3x128xbf16>
    %c2_52 = arith.constant 2 : index
    %c1_53 = arith.constant 1 : index
    %c0_54 = arith.constant 0 : index
    %c0_55 = arith.constant 0 : index
    %51 = vector.load %arg6[%c2_52, %c1_53, %c0_54, %c0_55] : memref<4x4x128x128xbf16, #tpu.memory_space<vmem>>, vector<1x1x128x128xbf16>
    %52 = vector.shape_cast %51 : vector<1x1x128x128xbf16> to vector<128x128xbf16>
    %cst_56 = arith.constant dense<0.000000e+00> : vector<3x128xf32>
    %53 = tpu.matmul %50, %52, %cst_56 {dimension_numbers = #tpu.dot_dimension_numbers<[1], [0], [0], [1], [0, 0, 1, 1], [], []>} : vector<3x128xbf16>, vector<128x128xbf16>, vector<3x128xf32> -> vector<3x128xf32>
    %54 = arith.addf %49, %53 : vector<3x128xf32>
    %55 = vector.extract_strided_slice %44 {offsets = [2, 0], sizes = [3, 128], strides = [1, 1]} : vector<6x128xbf16> to vector<3x128xbf16>
    %c2_57 = arith.constant 2 : index
    %c2_58 = arith.constant 2 : index
    %c0_59 = arith.constant 0 : index
    %c0_60 = arith.constant 0 : index
    %56 = vector.load %arg6[%c2_57, %c2_58, %c0_59, %c0_60] : memref<4x4x128x128xbf16, #tpu.memory_space<vmem>>, vector<1x1x128x128xbf16>
    %57 = vector.shape_cast %56 : vector<1x1x128x128xbf16> to vector<128x128xbf16>
    %cst_61 = arith.constant dense<0.000000e+00> : vector<3x128xf32>
    %58 = tpu.matmul %55, %57, %cst_61 {dimension_numbers = #tpu.dot_dimension_numbers<[1], [0], [0], [1], [0, 0, 1, 1], [], []>} : vector<3x128xbf16>, vector<128x128xbf16>, vector<3x128xf32> -> vector<3x128xf32>
    %59 = arith.addf %54, %58 : vector<3x128xf32>
    %60 = vector.extract_strided_slice %44 {offsets = [3, 0], sizes = [3, 128], strides = [1, 1]} : vector<6x128xbf16> to vector<3x128xbf16>
    %c2_62 = arith.constant 2 : index
    %c3_63 = arith.constant 3 : index
    %c0_64 = arith.constant 0 : index
    %c0_65 = arith.constant 0 : index
    %61 = vector.load %arg6[%c2_62, %c3_63, %c0_64, %c0_65] : memref<4x4x128x128xbf16, #tpu.memory_space<vmem>>, vector<1x1x128x128xbf16>
    %62 = vector.shape_cast %61 : vector<1x1x128x128xbf16> to vector<128x128xbf16>
    %cst_66 = arith.constant dense<0.000000e+00> : vector<3x128xf32>
    %63 = tpu.matmul %60, %62, %cst_66 {dimension_numbers = #tpu.dot_dimension_numbers<[1], [0], [0], [1], [0, 0, 1, 1], [], []>} : vector<3x128xbf16>, vector<128x128xbf16>, vector<3x128xf32> -> vector<3x128xf32>
    %64 = arith.addf %59, %63 : vector<3x128xf32>
    %c0_67 = arith.constant 0 : index
    %c0_68 = arith.constant 0 : index
    %c0_69 = arith.constant 0 : index
    %c0_70 = arith.constant 0 : index
    %65 = vector.load %arg5[%c0_67, %c0_68, %c0_69, %c0_70] : memref<1x1x6x128xbf16, #tpu.memory_space<vmem>>, vector<1x1x6x128xbf16>
    %66 = vector.shape_cast %65 : vector<1x1x6x128xbf16> to vector<6x128xbf16>
    %67 = vector.extract_strided_slice %66 {offsets = [0, 0], sizes = [3, 128], strides = [1, 1]} : vector<6x128xbf16> to vector<3x128xbf16>
    %c3_71 = arith.constant 3 : index
    %c0_72 = arith.constant 0 : index
    %c0_73 = arith.constant 0 : index
    %c0_74 = arith.constant 0 : index
    %68 = vector.load %arg6[%c3_71, %c0_72, %c0_73, %c0_74] : memref<4x4x128x128xbf16, #tpu.memory_space<vmem>>, vector<1x1x128x128xbf16>
    %69 = vector.shape_cast %68 : vector<1x1x128x128xbf16> to vector<128x128xbf16>
    %cst_75 = arith.constant dense<0.000000e+00> : vector<3x128xf32>
    %70 = tpu.matmul %67, %69, %cst_75 {dimension_numbers = #tpu.dot_dimension_numbers<[1], [0], [0], [1], [0, 0, 1, 1], [], []>} : vector<3x128xbf16>, vector<128x128xbf16>, vector<3x128xf32> -> vector<3x128xf32>
    %71 = arith.addf %64, %70 : vector<3x128xf32>
    %72 = vector.extract_strided_slice %66 {offsets = [1, 0], sizes = [3, 128], strides = [1, 1]} : vector<6x128xbf16> to vector<3x128xbf16>
    %c3_76 = arith.constant 3 : index
    %c1_77 = arith.constant 1 : index
    %c0_78 = arith.constant 0 : index
    %c0_79 = arith.constant 0 : index
    %73 = vector.load %arg6[%c3_76, %c1_77, %c0_78, %c0_79] : memref<4x4x128x128xbf16, #tpu.memory_space<vmem>>, vector<1x1x128x128xbf16>
    %74 = vector.shape_cast %73 : vector<1x1x128x128xbf16> to vector<128x128xbf16>
    %cst_80 = arith.constant dense<0.000000e+00> : vector<3x128xf32>
    %75 = tpu.matmul %72, %74, %cst_80 {dimension_numbers = #tpu.dot_dimension_numbers<[1], [0], [0], [1], [0, 0, 1, 1], [], []>} : vector<3x128xbf16>, vector<128x128xbf16>, vector<3x128xf32> -> vector<3x128xf32>
    %76 = arith.addf %71, %75 : vector<3x128xf32>
    %77 = vector.extract_strided_slice %66 {offsets = [2, 0], sizes = [3, 128], strides = [1, 1]} : vector<6x128xbf16> to vector<3x128xbf16>
    %c3_81 = arith.constant 3 : index
    %c2_82 = arith.constant 2 : index
    %c0_83 = arith.constant 0 : index
    %c0_84 = arith.constant 0 : index
    %78 = vector.load %arg6[%c3_81, %c2_82, %c0_83, %c0_84] : memref<4x4x128x128xbf16, #tpu.memory_space<vmem>>, vector<1x1x128x128xbf16>
    %79 = vector.shape_cast %78 : vector<1x1x128x128xbf16> to vector<128x128xbf16>
    %cst_85 = arith.constant dense<0.000000e+00> : vector<3x128xf32>
    %80 = tpu.matmul %77, %79, %cst_85 {dimension_numbers = #tpu.dot_dimension_numbers<[1], [0], [0], [1], [0, 0, 1, 1], [], []>} : vector<3x128xbf16>, vector<128x128xbf16>, vector<3x128xf32> -> vector<3x128xf32>
    %81 = arith.addf %76, %80 : vector<3x128xf32>
    %82 = vector.extract_strided_slice %66 {offsets = [3, 0], sizes = [3, 128], strides = [1, 1]} : vector<6x128xbf16> to vector<3x128xbf16>
    %c3_86 = arith.constant 3 : index
    %c3_87 = arith.constant 3 : index
    %c0_88 = arith.constant 0 : index
    %c0_89 = arith.constant 0 : index
    %83 = vector.load %arg6[%c3_86, %c3_87, %c0_88, %c0_89] : memref<4x4x128x128xbf16, #tpu.memory_space<vmem>>, vector<1x1x128x128xbf16>
    %84 = vector.shape_cast %83 : vector<1x1x128x128xbf16> to vector<128x128xbf16>
    %cst_90 = arith.constant dense<0.000000e+00> : vector<3x128xf32>
    %85 = tpu.matmul %82, %84, %cst_90 {dimension_numbers = #tpu.dot_dimension_numbers<[1], [0], [0], [1], [0, 0, 1, 1], [], []>} : vector<3x128xbf16>, vector<128x128xbf16>, vector<3x128xf32> -> vector<3x128xf32>
    %86 = arith.addf %81, %85 : vector<3x128xf32>
    %cst_91 = arith.constant dense<0.000000e+00> : vector<128xf32>
    %87 = vector.multi_reduction <add>, %86, %cst_91 [0] : vector<3x128xf32> to vector<128xf32>
    %88 = vector.shape_cast %87 : vector<128xf32> to vector<1x128xf32>
    %89 = arith.mulf %86, %86 : vector<3x128xf32>
    %cst_92 = arith.constant dense<0.000000e+00> : vector<128xf32>
    %90 = vector.multi_reduction <add>, %89, %cst_92 [0] : vector<3x128xf32> to vector<128xf32>
    %91 = vector.shape_cast %90 : vector<128xf32> to vector<1x128xf32>
    %92 = tpu.concatenate %88, %91 in 0 : vector<1x128xf32>, vector<1x128xf32> -> vector<2x128xf32>
    %c0_93 = arith.constant 0 : index
    %c0_94 = arith.constant 0 : index
    %c0_95 = arith.constant 0 : index
    %c0_96 = arith.constant 0 : index
    %93 = vector.load %arg8[%c0_93, %c0_94, %c0_95, %c0_96] : memref<1x1x2x128xf32, #tpu.memory_space<vmem>>, vector<1x1x2x128xf32>
    %94 = vector.shape_cast %93 : vector<1x1x2x128xf32> to vector<2x128xf32>
    %95 = vector.shape_cast %92 : vector<2x128xf32> to vector<1x1x2x128xf32>
    tpu.vector_store %arg8[%c0_93, %c0_94, %c0_95, %c0_96], %95 {strides = array<i32>} : memref<1x1x2x128xf32, #tpu.memory_space<vmem>>, vector<1x1x2x128xf32>,
    %96 = arith.truncf %86 : vector<3x128xf32> to vector<3x128xbf16>
    %c0_97 = arith.constant 0 : index
    %c0_98 = arith.constant 0 : index
    %c0_99 = arith.constant 0 : index
    %c0_100 = arith.constant 0 : index
    %97 = vector.load %arg7[%c0_97, %c0_98, %c0_99, %c0_100] : memref<1x1x3x128xbf16, #tpu.memory_space<vmem>>, vector<1x1x3x128xbf16>
    %98 = vector.shape_cast %97 : vector<1x1x3x128xbf16> to vector<3x128xbf16>
    %99 = vector.shape_cast %96 : vector<3x128xbf16> to vector<1x1x3x128xbf16>
    tpu.vector_store %arg7[%c0_97, %c0_98, %c0_99, %c0_100], %99 {strides = array<i32>} : memref<1x1x3x128xbf16, #tpu.memory_space<vmem>>, vector<1x1x3x128xbf16>,
    return
  }
  func.func @transform_0(%arg0: i32, %arg1: i32) -> (i32, i32, i32, i32) {
    %c1_i32 = arith.constant 1 : i32
    %0 = arith.muli %c1_i32, %arg1 : i32
    %c0_i32 = arith.constant 0 : i32
    %1 = arith.addi %0, %c0_i32 : i32
    %c0_i32_0 = arith.constant 0 : i32
    %c0_i32_1 = arith.constant 0 : i32
    %c0_i32_2 = arith.constant 0 : i32
    return %arg0, %1, %c0_i32_0, %c0_i32_1 : i32, i32, i32, i32
  }
  func.func @transform_1(%arg0: i32, %arg1: i32) -> (i32, i32, i32, i32) {
    %c1_i32 = arith.constant 1 : i32
    %0 = arith.muli %c1_i32, %arg1 : i32
    %c1_i32_0 = arith.constant 1 : i32
    %1 = arith.addi %0, %c1_i32_0 : i32
    %c0_i32 = arith.constant 0 : i32
    %c0_i32_1 = arith.constant 0 : i32
    %c0_i32_2 = arith.constant 0 : i32
    return %arg0, %1, %c0_i32, %c0_i32_1 : i32, i32, i32, i32
  }
  func.func @transform_2(%arg0: i32, %arg1: i32) -> (i32, i32, i32, i32) {
    %c1_i32 = arith.constant 1 : i32
    %0 = arith.muli %c1_i32, %arg1 : i32
    %c2_i32 = arith.constant 2 : i32
    %1 = arith.addi %0, %c2_i32 : i32
    %c0_i32 = arith.constant 0 : i32
    %c0_i32_0 = arith.constant 0 : i32
    %c0_i32_1 = arith.constant 0 : i32
    return %arg0, %1, %c0_i32, %c0_i32_0 : i32, i32, i32, i32
  }
  func.func @transform_3(%arg0: i32, %arg1: i32) -> (i32, i32, i32, i32) {
    %c1_i32 = arith.constant 1 : i32
    %0 = arith.muli %c1_i32, %arg1 : i32
    %c3_i32 = arith.constant 3 : i32
    %1 = arith.addi %0, %c3_i32 : i32
    %c0_i32 = arith.constant 0 : i32
    %c0_i32_0 = arith.constant 0 : i32
    %c0_i32_1 = arith.constant 0 : i32
    return %arg0, %1, %c0_i32, %c0_i32_0 : i32, i32, i32, i32
  }
  func.func @transform_4(%arg0: i32, %arg1: i32) -> (i32, i32, i32, i32) {
    %c0_i32 = arith.constant 0 : i32
    %c0_i32_0 = arith.constant 0 : i32
    %c0_i32_1 = arith.constant 0 : i32
    %c0_i32_2 = arith.constant 0 : i32
    %c0_i32_3 = arith.constant 0 : i32
    return %c0_i32, %c0_i32_0, %c0_i32_1, %c0_i32_2 : i32, i32, i32, i32
  }
  func.func @transform_5(%arg0: i32, %arg1: i32) -> (i32, i32, i32, i32) {
    %c0_i32 = arith.constant 0 : i32
    %c0_i32_0 = arith.constant 0 : i32
    %c0_i32_1 = arith.constant 0 : i32
    return %arg0, %arg1, %c0_i32, %c0_i32_0 : i32, i32, i32, i32
  }
  func.func @transform_6(%arg0: i32, %arg1: i32) -> (i32, i32, i32, i32) {
    %c0_i32 = arith.constant 0 : i32
    %c0_i32_0 = arith.constant 0 : i32
    %c0_i32_1 = arith.constant 0 : i32
    return %arg0, %arg1, %c0_i32, %c0_i32_0 : i32, i32, i32, i32
  }
}

module attributes {stable_mosaic.version = 11 : i64} {
  func.func @kernel(%arg0: i32, %arg1: i32, %arg2: memref<1x1x5x128xbf16, #tpu.memory_space<vmem>>, %arg3: memref<1x1x5x128xbf16, #tpu.memory_space<vmem>>, %arg4: memref<1x1x5x128xbf16, #tpu.memory_space<vmem>>, %arg5: memref<1x1x5x128xbf16, #tpu.memory_space<vmem>>, %arg6: memref<4x4x128x128xbf16, #tpu.memory_space<vmem>>, %arg7: memref<1x128xf32, #tpu.memory_space<vmem>>, %arg8: memref<1x1x2x128xf32, #tpu.memory_space<vmem>>) attributes {dimension_semantics = [#tpu.dimension_semantics<parallel>, #tpu.dimension_semantics<parallel>], iteration_bounds = array<i64: 2, 2>, scalar_prefetch = 0 : i64, scratch_operands = 0 : i64, tpu.core_type = #tpu.core_type<tc>, window_params = [{transform_indices = @transform_0, window_bounds = array<i64: 1, 1, 5, 128>}, {transform_indices = @transform_1, window_bounds = array<i64: 1, 1, 5, 128>}, {transform_indices = @transform_2, window_bounds = array<i64: 1, 1, 5, 128>}, {transform_indices = @transform_3, window_bounds = array<i64: 1, 1, 5, 128>}, {pipeline_mode = #tpu.pipeline_mode<synchronous>, transform_indices = @transform_4, window_bounds = array<i64: 4, 4, 128, 128>}, {pipeline_mode = #tpu.pipeline_mode<synchronous>, transform_indices = @transform_5, window_bounds = array<i64: 1, 128>}, {transform_indices = @transform_6, window_bounds = array<i64: 1, 1, 2, 128>}]} {
    %c0 = arith.constant 0 : index
    %c0_0 = arith.constant 0 : index
    %c0_1 = arith.constant 0 : index
    %c0_2 = arith.constant 0 : index
    %0 = vector.load %arg2[%c0, %c0_0, %c0_1, %c0_2] : memref<1x1x5x128xbf16, #tpu.memory_space<vmem>>, vector<1x1x5x128xbf16>
    %1 = vector.shape_cast %0 : vector<1x1x5x128xbf16> to vector<5x128xbf16>
    %2 = vector.extract_strided_slice %1 {offsets = [0, 0], sizes = [2, 128], strides = [1, 1]} : vector<5x128xbf16> to vector<2x128xbf16>
    %c0_3 = arith.constant 0 : index
    %c0_4 = arith.constant 0 : index
    %c0_5 = arith.constant 0 : index
    %c0_6 = arith.constant 0 : index
    %3 = vector.load %arg6[%c0_3, %c0_4, %c0_5, %c0_6] : memref<4x4x128x128xbf16, #tpu.memory_space<vmem>>, vector<1x1x128x128xbf16>
    %4 = vector.shape_cast %3 : vector<1x1x128x128xbf16> to vector<128x128xbf16>
    %cst = arith.constant dense<0.000000e+00> : vector<2x128xf32>
    %5 = tpu.matmul %2, %4, %cst {dimension_numbers = #tpu.dot_dimension_numbers<[1], [0], [0], [1], [0, 0, 1, 1], [], []>} : vector<2x128xbf16>, vector<128x128xbf16>, vector<2x128xf32> -> vector<2x128xf32>
    %6 = vector.extract_strided_slice %1 {offsets = [1, 0], sizes = [2, 128], strides = [1, 1]} : vector<5x128xbf16> to vector<2x128xbf16>
    %c0_7 = arith.constant 0 : index
    %c1 = arith.constant 1 : index
    %c0_8 = arith.constant 0 : index
    %c0_9 = arith.constant 0 : index
    %7 = vector.load %arg6[%c0_7, %c1, %c0_8, %c0_9] : memref<4x4x128x128xbf16, #tpu.memory_space<vmem>>, vector<1x1x128x128xbf16>
    %8 = vector.shape_cast %7 : vector<1x1x128x128xbf16> to vector<128x128xbf16>
    %cst_10 = arith.constant dense<0.000000e+00> : vector<2x128xf32>
    %9 = tpu.matmul %6, %8, %cst_10 {dimension_numbers = #tpu.dot_dimension_numbers<[1], [0], [0], [1], [0, 0, 1, 1], [], []>} : vector<2x128xbf16>, vector<128x128xbf16>, vector<2x128xf32> -> vector<2x128xf32>
    %10 = arith.addf %5, %9 : vector<2x128xf32>
    %11 = vector.extract_strided_slice %1 {offsets = [2, 0], sizes = [2, 128], strides = [1, 1]} : vector<5x128xbf16> to vector<2x128xbf16>
    %c0_11 = arith.constant 0 : index
    %c2 = arith.constant 2 : index
    %c0_12 = arith.constant 0 : index
    %c0_13 = arith.constant 0 : index
    %12 = vector.load %arg6[%c0_11, %c2, %c0_12, %c0_13] : memref<4x4x128x128xbf16, #tpu.memory_space<vmem>>, vector<1x1x128x128xbf16>
    %13 = vector.shape_cast %12 : vector<1x1x128x128xbf16> to vector<128x128xbf16>
    %cst_14 = arith.constant dense<0.000000e+00> : vector<2x128xf32>
    %14 = tpu.matmul %11, %13, %cst_14 {dimension_numbers = #tpu.dot_dimension_numbers<[1], [0], [0], [1], [0, 0, 1, 1], [], []>} : vector<2x128xbf16>, vector<128x128xbf16>, vector<2x128xf32> -> vector<2x128xf32>
    %15 = arith.addf %10, %14 : vector<2x128xf32>
    %16 = vector.extract_strided_slice %1 {offsets = [3, 0], sizes = [2, 128], strides = [1, 1]} : vector<5x128xbf16> to vector<2x128xbf16>
    %c0_15 = arith.constant 0 : index
    %c3 = arith.constant 3 : index
    %c0_16 = arith.constant 0 : index
    %c0_17 = arith.constant 0 : index
    %17 = vector.load %arg6[%c0_15, %c3, %c0_16, %c0_17] : memref<4x4x128x128xbf16, #tpu.memory_space<vmem>>, vector<1x1x128x128xbf16>
    %18 = vector.shape_cast %17 : vector<1x1x128x128xbf16> to vector<128x128xbf16>
    %cst_18 = arith.constant dense<0.000000e+00> : vector<2x128xf32>
    %19 = tpu.matmul %16, %18, %cst_18 {dimension_numbers = #tpu.dot_dimension_numbers<[1], [0], [0], [1], [0, 0, 1, 1], [], []>} : vector<2x128xbf16>, vector<128x128xbf16>, vector<2x128xf32> -> vector<2x128xf32>
    %20 = arith.addf %15, %19 : vector<2x128xf32>
    %c0_19 = arith.constant 0 : index
    %c0_20 = arith.constant 0 : index
    %c0_21 = arith.constant 0 : index
    %c0_22 = arith.constant 0 : index
    %21 = vector.load %arg3[%c0_19, %c0_20, %c0_21, %c0_22] : memref<1x1x5x128xbf16, #tpu.memory_space<vmem>>, vector<1x1x5x128xbf16>
    %22 = vector.shape_cast %21 : vector<1x1x5x128xbf16> to vector<5x128xbf16>
    %23 = vector.extract_strided_slice %22 {offsets = [0, 0], sizes = [2, 128], strides = [1, 1]} : vector<5x128xbf16> to vector<2x128xbf16>
    %c1_23 = arith.constant 1 : index
    %c0_24 = arith.constant 0 : index
    %c0_25 = arith.constant 0 : index
    %c0_26 = arith.constant 0 : index
    %24 = vector.load %arg6[%c1_23, %c0_24, %c0_25, %c0_26] : memref<4x4x128x128xbf16, #tpu.memory_space<vmem>>, vector<1x1x128x128xbf16>
    %25 = vector.shape_cast %24 : vector<1x1x128x128xbf16> to vector<128x128xbf16>
    %cst_27 = arith.constant dense<0.000000e+00> : vector<2x128xf32>
    %26 = tpu.matmul %23, %25, %cst_27 {dimension_numbers = #tpu.dot_dimension_numbers<[1], [0], [0], [1], [0, 0, 1, 1], [], []>} : vector<2x128xbf16>, vector<128x128xbf16>, vector<2x128xf32> -> vector<2x128xf32>
    %27 = arith.addf %20, %26 : vector<2x128xf32>
    %28 = vector.extract_strided_slice %22 {offsets = [1, 0], sizes = [2, 128], strides = [1, 1]} : vector<5x128xbf16> to vector<2x128xbf16>
    %c1_28 = arith.constant 1 : index
    %c1_29 = arith.constant 1 : index
    %c0_30 = arith.constant 0 : index
    %c0_31 = arith.constant 0 : index
    %29 = vector.load %arg6[%c1_28, %c1_29, %c0_30, %c0_31] : memref<4x4x128x128xbf16, #tpu.memory_space<vmem>>, vector<1x1x128x128xbf16>
    %30 = vector.shape_cast %29 : vector<1x1x128x128xbf16> to vector<128x128xbf16>
    %cst_32 = arith.constant dense<0.000000e+00> : vector<2x128xf32>
    %31 = tpu.matmul %28, %30, %cst_32 {dimension_numbers = #tpu.dot_dimension_numbers<[1], [0], [0], [1], [0, 0, 1, 1], [], []>} : vector<2x128xbf16>, vector<128x128xbf16>, vector<2x128xf32> -> vector<2x128xf32>
    %32 = arith.addf %27, %31 : vector<2x128xf32>
    %33 = vector.extract_strided_slice %22 {offsets = [2, 0], sizes = [2, 128], strides = [1, 1]} : vector<5x128xbf16> to vector<2x128xbf16>
    %c1_33 = arith.constant 1 : index
    %c2_34 = arith.constant 2 : index
    %c0_35 = arith.constant 0 : index
    %c0_36 = arith.constant 0 : index
    %34 = vector.load %arg6[%c1_33, %c2_34, %c0_35, %c0_36] : memref<4x4x128x128xbf16, #tpu.memory_space<vmem>>, vector<1x1x128x128xbf16>
    %35 = vector.shape_cast %34 : vector<1x1x128x128xbf16> to vector<128x128xbf16>
    %cst_37 = arith.constant dense<0.000000e+00> : vector<2x128xf32>
    %36 = tpu.matmul %33, %35, %cst_37 {dimension_numbers = #tpu.dot_dimension_numbers<[1], [0], [0], [1], [0, 0, 1, 1], [], []>} : vector<2x128xbf16>, vector<128x128xbf16>, vector<2x128xf32> -> vector<2x128xf32>
    %37 = arith.addf %32, %36 : vector<2x128xf32>
    %38 = vector.extract_strided_slice %22 {offsets = [3, 0], sizes = [2, 128], strides = [1, 1]} : vector<5x128xbf16> to vector<2x128xbf16>
    %c1_38 = arith.constant 1 : index
    %c3_39 = arith.constant 3 : index
    %c0_40 = arith.constant 0 : index
    %c0_41 = arith.constant 0 : index
    %39 = vector.load %arg6[%c1_38, %c3_39, %c0_40, %c0_41] : memref<4x4x128x128xbf16, #tpu.memory_space<vmem>>, vector<1x1x128x128xbf16>
    %40 = vector.shape_cast %39 : vector<1x1x128x128xbf16> to vector<128x128xbf16>
    %cst_42 = arith.constant dense<0.000000e+00> : vector<2x128xf32>
    %41 = tpu.matmul %38, %40, %cst_42 {dimension_numbers = #tpu.dot_dimension_numbers<[1], [0], [0], [1], [0, 0, 1, 1], [], []>} : vector<2x128xbf16>, vector<128x128xbf16>, vector<2x128xf32> -> vector<2x128xf32>
    %42 = arith.addf %37, %41 : vector<2x128xf32>
    %c0_43 = arith.constant 0 : index
    %c0_44 = arith.constant 0 : index
    %c0_45 = arith.constant 0 : index
    %c0_46 = arith.constant 0 : index
    %43 = vector.load %arg4[%c0_43, %c0_44, %c0_45, %c0_46] : memref<1x1x5x128xbf16, #tpu.memory_space<vmem>>, vector<1x1x5x128xbf16>
    %44 = vector.shape_cast %43 : vector<1x1x5x128xbf16> to vector<5x128xbf16>
    %45 = vector.extract_strided_slice %44 {offsets = [0, 0], sizes = [2, 128], strides = [1, 1]} : vector<5x128xbf16> to vector<2x128xbf16>
    %c2_47 = arith.constant 2 : index
    %c0_48 = arith.constant 0 : index
    %c0_49 = arith.constant 0 : index
    %c0_50 = arith.constant 0 : index
    %46 = vector.load %arg6[%c2_47, %c0_48, %c0_49, %c0_50] : memref<4x4x128x128xbf16, #tpu.memory_space<vmem>>, vector<1x1x128x128xbf16>
    %47 = vector.shape_cast %46 : vector<1x1x128x128xbf16> to vector<128x128xbf16>
    %cst_51 = arith.constant dense<0.000000e+00> : vector<2x128xf32>
    %48 = tpu.matmul %45, %47, %cst_51 {dimension_numbers = #tpu.dot_dimension_numbers<[1], [0], [0], [1], [0, 0, 1, 1], [], []>} : vector<2x128xbf16>, vector<128x128xbf16>, vector<2x128xf32> -> vector<2x128xf32>
    %49 = arith.addf %42, %48 : vector<2x128xf32>
    %50 = vector.extract_strided_slice %44 {offsets = [1, 0], sizes = [2, 128], strides = [1, 1]} : vector<5x128xbf16> to vector<2x128xbf16>
    %c2_52 = arith.constant 2 : index
    %c1_53 = arith.constant 1 : index
    %c0_54 = arith.constant 0 : index
    %c0_55 = arith.constant 0 : index
    %51 = vector.load %arg6[%c2_52, %c1_53, %c0_54, %c0_55] : memref<4x4x128x128xbf16, #tpu.memory_space<vmem>>, vector<1x1x128x128xbf16>
    %52 = vector.shape_cast %51 : vector<1x1x128x128xbf16> to vector<128x128xbf16>
    %cst_56 = arith.constant dense<0.000000e+00> : vector<2x128xf32>
    %53 = tpu.matmul %50, %52, %cst_56 {dimension_numbers = #tpu.dot_dimension_numbers<[1], [0], [0], [1], [0, 0, 1, 1], [], []>} : vector<2x128xbf16>, vector<128x128xbf16>, vector<2x128xf32> -> vector<2x128xf32>
    %54 = arith.addf %49, %53 : vector<2x128xf32>
    %55 = vector.extract_strided_slice %44 {offsets = [2, 0], sizes = [2, 128], strides = [1, 1]} : vector<5x128xbf16> to vector<2x128xbf16>
    %c2_57 = arith.constant 2 : index
    %c2_58 = arith.constant 2 : index
    %c0_59 = arith.constant 0 : index
    %c0_60 = arith.constant 0 : index
    %56 = vector.load %arg6[%c2_57, %c2_58, %c0_59, %c0_60] : memref<4x4x128x128xbf16, #tpu.memory_space<vmem>>, vector<1x1x128x128xbf16>
    %57 = vector.shape_cast %56 : vector<1x1x128x128xbf16> to vector<128x128xbf16>
    %cst_61 = arith.constant dense<0.000000e+00> : vector<2x128xf32>
    %58 = tpu.matmul %55, %57, %cst_61 {dimension_numbers = #tpu.dot_dimension_numbers<[1], [0], [0], [1], [0, 0, 1, 1], [], []>} : vector<2x128xbf16>, vector<128x128xbf16>, vector<2x128xf32> -> vector<2x128xf32>
    %59 = arith.addf %54, %58 : vector<2x128xf32>
    %60 = vector.extract_strided_slice %44 {offsets = [3, 0], sizes = [2, 128], strides = [1, 1]} : vector<5x128xbf16> to vector<2x128xbf16>
    %c2_62 = arith.constant 2 : index
    %c3_63 = arith.constant 3 : index
    %c0_64 = arith.constant 0 : index
    %c0_65 = arith.constant 0 : index
    %61 = vector.load %arg6[%c2_62, %c3_63, %c0_64, %c0_65] : memref<4x4x128x128xbf16, #tpu.memory_space<vmem>>, vector<1x1x128x128xbf16>
    %62 = vector.shape_cast %61 : vector<1x1x128x128xbf16> to vector<128x128xbf16>
    %cst_66 = arith.constant dense<0.000000e+00> : vector<2x128xf32>
    %63 = tpu.matmul %60, %62, %cst_66 {dimension_numbers = #tpu.dot_dimension_numbers<[1], [0], [0], [1], [0, 0, 1, 1], [], []>} : vector<2x128xbf16>, vector<128x128xbf16>, vector<2x128xf32> -> vector<2x128xf32>
    %64 = arith.addf %59, %63 : vector<2x128xf32>
    %c0_67 = arith.constant 0 : index
    %c0_68 = arith.constant 0 : index
    %c0_69 = arith.constant 0 : index
    %c0_70 = arith.constant 0 : index
    %65 = vector.load %arg5[%c0_67, %c0_68, %c0_69, %c0_70] : memref<1x1x5x128xbf16, #tpu.memory_space<vmem>>, vector<1x1x5x128xbf16>
    %66 = vector.shape_cast %65 : vector<1x1x5x128xbf16> to vector<5x128xbf16>
    %67 = vector.extract_strided_slice %66 {offsets = [0, 0], sizes = [2, 128], strides = [1, 1]} : vector<5x128xbf16> to vector<2x128xbf16>
    %c3_71 = arith.constant 3 : index
    %c0_72 = arith.constant 0 : index
    %c0_73 = arith.constant 0 : index
    %c0_74 = arith.constant 0 : index
    %68 = vector.load %arg6[%c3_71, %c0_72, %c0_73, %c0_74] : memref<4x4x128x128xbf16, #tpu.memory_space<vmem>>, vector<1x1x128x128xbf16>
    %69 = vector.shape_cast %68 : vector<1x1x128x128xbf16> to vector<128x128xbf16>
    %cst_75 = arith.constant dense<0.000000e+00> : vector<2x128xf32>
    %70 = tpu.matmul %67, %69, %cst_75 {dimension_numbers = #tpu.dot_dimension_numbers<[1], [0], [0], [1], [0, 0, 1, 1], [], []>} : vector<2x128xbf16>, vector<128x128xbf16>, vector<2x128xf32> -> vector<2x128xf32>
    %71 = arith.addf %64, %70 : vector<2x128xf32>
    %72 = vector.extract_strided_slice %66 {offsets = [1, 0], sizes = [2, 128], strides = [1, 1]} : vector<5x128xbf16> to vector<2x128xbf16>
    %c3_76 = arith.constant 3 : index
    %c1_77 = arith.constant 1 : index
    %c0_78 = arith.constant 0 : index
    %c0_79 = arith.constant 0 : index
    %73 = vector.load %arg6[%c3_76, %c1_77, %c0_78, %c0_79] : memref<4x4x128x128xbf16, #tpu.memory_space<vmem>>, vector<1x1x128x128xbf16>
    %74 = vector.shape_cast %73 : vector<1x1x128x128xbf16> to vector<128x128xbf16>
    %cst_80 = arith.constant dense<0.000000e+00> : vector<2x128xf32>
    %75 = tpu.matmul %72, %74, %cst_80 {dimension_numbers = #tpu.dot_dimension_numbers<[1], [0], [0], [1], [0, 0, 1, 1], [], []>} : vector<2x128xbf16>, vector<128x128xbf16>, vector<2x128xf32> -> vector<2x128xf32>
    %76 = arith.addf %71, %75 : vector<2x128xf32>
    %77 = vector.extract_strided_slice %66 {offsets = [2, 0], sizes = [2, 128], strides = [1, 1]} : vector<5x128xbf16> to vector<2x128xbf16>
    %c3_81 = arith.constant 3 : index
    %c2_82 = arith.constant 2 : index
    %c0_83 = arith.constant 0 : index
    %c0_84 = arith.constant 0 : index
    %78 = vector.load %arg6[%c3_81, %c2_82, %c0_83, %c0_84] : memref<4x4x128x128xbf16, #tpu.memory_space<vmem>>, vector<1x1x128x128xbf16>
    %79 = vector.shape_cast %78 : vector<1x1x128x128xbf16> to vector<128x128xbf16>
    %cst_85 = arith.constant dense<0.000000e+00> : vector<2x128xf32>
    %80 = tpu.matmul %77, %79, %cst_85 {dimension_numbers = #tpu.dot_dimension_numbers<[1], [0], [0], [1], [0, 0, 1, 1], [], []>} : vector<2x128xbf16>, vector<128x128xbf16>, vector<2x128xf32> -> vector<2x128xf32>
    %81 = arith.addf %76, %80 : vector<2x128xf32>
    %82 = vector.extract_strided_slice %66 {offsets = [3, 0], sizes = [2, 128], strides = [1, 1]} : vector<5x128xbf16> to vector<2x128xbf16>
    %c3_86 = arith.constant 3 : index
    %c3_87 = arith.constant 3 : index
    %c0_88 = arith.constant 0 : index
    %c0_89 = arith.constant 0 : index
    %83 = vector.load %arg6[%c3_86, %c3_87, %c0_88, %c0_89] : memref<4x4x128x128xbf16, #tpu.memory_space<vmem>>, vector<1x1x128x128xbf16>
    %84 = vector.shape_cast %83 : vector<1x1x128x128xbf16> to vector<128x128xbf16>
    %cst_90 = arith.constant dense<0.000000e+00> : vector<2x128xf32>
    %85 = tpu.matmul %82, %84, %cst_90 {dimension_numbers = #tpu.dot_dimension_numbers<[1], [0], [0], [1], [0, 0, 1, 1], [], []>} : vector<2x128xbf16>, vector<128x128xbf16>, vector<2x128xf32> -> vector<2x128xf32>
    %86 = arith.addf %81, %85 : vector<2x128xf32>
    %c0_91 = arith.constant 0 : index
    %c0_92 = arith.constant 0 : index
    %87 = vector.load %arg7[%c0_91, %c0_92] : memref<1x128xf32, #tpu.memory_space<vmem>>, vector<1x128xf32>
    %88 = vector.broadcast %87 : vector<1x128xf32> to vector<2x128xf32>
    %89 = arith.addf %86, %88 : vector<2x128xf32>
    %c0_93 = arith.constant 0 : index
    %c0_94 = arith.constant 0 : index
    %c0_95 = arith.constant 0 : index
    %c0_96 = arith.constant 0 : index
    %90 = vector.load %arg8[%c0_93, %c0_94, %c0_95, %c0_96] : memref<1x1x2x128xf32, #tpu.memory_space<vmem>>, vector<1x1x2x128xf32>
    %91 = vector.shape_cast %90 : vector<1x1x2x128xf32> to vector<2x128xf32>
    %92 = vector.shape_cast %89 : vector<2x128xf32> to vector<1x1x2x128xf32>
    tpu.vector_store %arg8[%c0_93, %c0_94, %c0_95, %c0_96], %92 {strides = array<i32>} : memref<1x1x2x128xf32, #tpu.memory_space<vmem>>, vector<1x1x2x128xf32>,
    return
  }
  func.func @transform_0(%arg0: i32, %arg1: i32) -> (i32, i32, i32, i32) {
    %c1_i32 = arith.constant 1 : i32
    %0 = arith.muli %c1_i32, %arg1 : i32
    %c0_i32 = arith.constant 0 : i32
    %1 = arith.addi %0, %c0_i32 : i32
    %c0_i32_0 = arith.constant 0 : i32
    %c0_i32_1 = arith.constant 0 : i32
    %c0_i32_2 = arith.constant 0 : i32
    return %arg0, %1, %c0_i32_0, %c0_i32_1 : i32, i32, i32, i32
  }
  func.func @transform_1(%arg0: i32, %arg1: i32) -> (i32, i32, i32, i32) {
    %c1_i32 = arith.constant 1 : i32
    %0 = arith.muli %c1_i32, %arg1 : i32
    %c1_i32_0 = arith.constant 1 : i32
    %1 = arith.addi %0, %c1_i32_0 : i32
    %c0_i32 = arith.constant 0 : i32
    %c0_i32_1 = arith.constant 0 : i32
    %c0_i32_2 = arith.constant 0 : i32
    return %arg0, %1, %c0_i32, %c0_i32_1 : i32, i32, i32, i32
  }
  func.func @transform_2(%arg0: i32, %arg1: i32) -> (i32, i32, i32, i32) {
    %c1_i32 = arith.constant 1 : i32
    %0 = arith.muli %c1_i32, %arg1 : i32
    %c2_i32 = arith.constant 2 : i32
    %1 = arith.addi %0, %c2_i32 : i32
    %c0_i32 = arith.constant 0 : i32
    %c0_i32_0 = arith.constant 0 : i32
    %c0_i32_1 = arith.constant 0 : i32
    return %arg0, %1, %c0_i32, %c0_i32_0 : i32, i32, i32, i32
  }
  func.func @transform_3(%arg0: i32, %arg1: i32) -> (i32, i32, i32, i32) {
    %c1_i32 = arith.constant 1 : i32
    %0 = arith.muli %c1_i32, %arg1 : i32
    %c3_i32 = arith.constant 3 : i32
    %1 = arith.addi %0, %c3_i32 : i32
    %c0_i32 = arith.constant 0 : i32
    %c0_i32_0 = arith.constant 0 : i32
    %c0_i32_1 = arith.constant 0 : i32
    return %arg0, %1, %c0_i32, %c0_i32_0 : i32, i32, i32, i32
  }
  func.func @transform_4(%arg0: i32, %arg1: i32) -> (i32, i32, i32, i32) {
    %c0_i32 = arith.constant 0 : i32
    %c0_i32_0 = arith.constant 0 : i32
    %c0_i32_1 = arith.constant 0 : i32
    %c0_i32_2 = arith.constant 0 : i32
    %c0_i32_3 = arith.constant 0 : i32
    return %c0_i32, %c0_i32_0, %c0_i32_1, %c0_i32_2 : i32, i32, i32, i32
  }
  func.func @transform_5(%arg0: i32, %arg1: i32) -> (i32, i32) {
    %c0_i32 = arith.constant 0 : i32
    %c0_i32_0 = arith.constant 0 : i32
    %c0_i32_1 = arith.constant 0 : i32
    return %c0_i32, %c0_i32_0 : i32, i32
  }
  func.func @transform_6(%arg0: i32, %arg1: i32) -> (i32, i32, i32, i32) {
    %c0_i32 = arith.constant 0 : i32
    %c0_i32_0 = arith.constant 0 : i32
    %c0_i32_1 = arith.constant 0 : i32
    return %arg0, %arg1, %c0_i32, %c0_i32_0 : i32, i32, i32, i32
  }
}

module attributes {stable_mosaic.version = 11 : i64} {
  func.func @_bn_act_kernel(%arg0: i32, %arg1: i32, %arg2: memref<1x1x3x128xbf16, #tpu.memory_space<vmem>>, %arg3: memref<1x128xf32, #tpu.memory_space<vmem>>, %arg4: memref<1x128xf32, #tpu.memory_space<vmem>>, %arg5: memref<1x1x3x128xbf16, #tpu.memory_space<vmem>>) attributes {dimension_semantics = [#tpu.dimension_semantics<parallel>, #tpu.dimension_semantics<parallel>], iteration_bounds = array<i64: 2, 3>, scalar_prefetch = 0 : i64, scratch_operands = 0 : i64, tpu.core_type = #tpu.core_type<tc>, window_params = [{transform_indices = @transform_0, window_bounds = array<i64: 1, 1, 3, 128>}, {pipeline_mode = #tpu.pipeline_mode<synchronous>, transform_indices = @transform_1, window_bounds = array<i64: 1, 128>}, {pipeline_mode = #tpu.pipeline_mode<synchronous>, transform_indices = @transform_2, window_bounds = array<i64: 1, 128>}, {transform_indices = @transform_3, window_bounds = array<i64: 1, 1, 3, 128>}]} {
    %c0 = arith.constant 0 : index
    %c0_0 = arith.constant 0 : index
    %c0_1 = arith.constant 0 : index
    %c0_2 = arith.constant 0 : index
    %0 = vector.load %arg2[%c0, %c0_0, %c0_1, %c0_2] : memref<1x1x3x128xbf16, #tpu.memory_space<vmem>>, vector<1x1x3x128xbf16>
    %1 = vector.shape_cast %0 : vector<1x1x3x128xbf16> to vector<3x128xbf16>
    %2 = arith.extf %1 : vector<3x128xbf16> to vector<3x128xf32>
    %c0_3 = arith.constant 0 : index
    %c0_4 = arith.constant 0 : index
    %3 = vector.load %arg3[%c0_3, %c0_4] : memref<1x128xf32, #tpu.memory_space<vmem>>, vector<1x128xf32>
    %4 = vector.broadcast %3 : vector<1x128xf32> to vector<3x128xf32>
    %5 = arith.mulf %2, %4 : vector<3x128xf32>
    %c0_5 = arith.constant 0 : index
    %c0_6 = arith.constant 0 : index
    %6 = vector.load %arg4[%c0_5, %c0_6] : memref<1x128xf32, #tpu.memory_space<vmem>>, vector<1x128xf32>
    %7 = vector.broadcast %6 : vector<1x128xf32> to vector<3x128xf32>
    %8 = arith.addf %5, %7 : vector<3x128xf32>
    %cst = arith.constant 0.000000e+00 : f32
    %9 = vector.broadcast %cst : f32 to vector<3x128xf32>
    %10 = arith.cmpf ogt, %8, %9 : vector<3x128xf32>
    %cst_7 = arith.constant 2.000000e-01 : f32
    %11 = vector.broadcast %cst_7 : f32 to vector<3x128xf32>
    %12 = arith.mulf %11, %8 : vector<3x128xf32>
    %13 = arith.select %10, %8, %12 : vector<3x128xi1>, vector<3x128xf32>
    %14 = arith.truncf %13 : vector<3x128xf32> to vector<3x128xbf16>
    %c0_8 = arith.constant 0 : index
    %c0_9 = arith.constant 0 : index
    %c0_10 = arith.constant 0 : index
    %c0_11 = arith.constant 0 : index
    %15 = vector.load %arg5[%c0_8, %c0_9, %c0_10, %c0_11] : memref<1x1x3x128xbf16, #tpu.memory_space<vmem>>, vector<1x1x3x128xbf16>
    %16 = vector.shape_cast %15 : vector<1x1x3x128xbf16> to vector<3x128xbf16>
    %17 = vector.shape_cast %14 : vector<3x128xbf16> to vector<1x1x3x128xbf16>
    tpu.vector_store %arg5[%c0_8, %c0_9, %c0_10, %c0_11], %17 {strides = array<i32>} : memref<1x1x3x128xbf16, #tpu.memory_space<vmem>>, vector<1x1x3x128xbf16>,
    return
  }
  func.func @transform_0(%arg0: i32, %arg1: i32) -> (i32, i32, i32, i32) {
    %c0_i32 = arith.constant 0 : i32
    %c0_i32_0 = arith.constant 0 : i32
    %c0_i32_1 = arith.constant 0 : i32
    return %arg0, %arg1, %c0_i32, %c0_i32_0 : i32, i32, i32, i32
  }
  func.func @transform_1(%arg0: i32, %arg1: i32) -> (i32, i32) {
    %c0_i32 = arith.constant 0 : i32
    %c0_i32_0 = arith.constant 0 : i32
    %c0_i32_1 = arith.constant 0 : i32
    return %c0_i32, %c0_i32_0 : i32, i32
  }
  func.func @transform_2(%arg0: i32, %arg1: i32) -> (i32, i32) {
    %c0_i32 = arith.constant 0 : i32
    %c0_i32_0 = arith.constant 0 : i32
    %c0_i32_1 = arith.constant 0 : i32
    return %c0_i32, %c0_i32_0 : i32, i32
  }
  func.func @transform_3(%arg0: i32, %arg1: i32) -> (i32, i32, i32, i32) {
    %c0_i32 = arith.constant 0 : i32
    %c0_i32_0 = arith.constant 0 : i32
    %c0_i32_1 = arith.constant 0 : i32
    return %arg0, %arg1, %c0_i32, %c0_i32_0 : i32, i32, i32, i32
  }
}

</mosaic_0001>

<bundles_post_ra>
// kernel: _lambda_.6
= control target key start
LH: loop header
LB: loop body
LE: loop exit
PB: predicated region body
PF: predicated region fallthrough
CT: control target
= control target key end

     0   :  { %11 = vsyncpa [#allocation3], 0  ;;  %s1304_s0 = inlined_call_operand.vmem [shape: bf16[2,18,9,8], index: 0, kind: input, shape index: {}, may-alias: {0,1,2,3}]   ;;  %s1305_s1 = inlined_call_operand.vmem [shape: bf16[2,18,9,8], index: 1, kind: input, shape index: {}, may-alias: {0,1,2,3}]   ;;  %s1306_s2 = inlined_call_operand.vmem [shape: bf16[2,18,9,8], index: 2, kind: input, shape index: {}, may-alias: {0,1,2,3}]   ;;  %s1307_s3 = inlined_call_operand.vmem [shape: bf16[2,18,9,8], index: 3, kind: input, shape index: {}, may-alias: {0,1,2,3}]   ;;  %s1308_s4 = inlined_call_operand.hbm [shape: bf16[4,2,8,128], index: 4, kind: input, shape index: {}]   ;;  %s1309_s5 = inlined_call_operand.hbm [shape: f32[1,128], index: 5, kind: input, shape index: {}]   ;;  %s1310_s6 = inlined_call_operand.vmem [shape: bf16[2,8,8,128], index: 6, kind: output, shape index: {}]  }
   0x1   :  { %12 = vsyncpa [#allocation5], 0  ;;  %s1159_s21 = smov 0   ;;  %s1161_s22 = smov 0  }
   0x2   :  { %s1163_s23 = smov 0   ;;  %s1165_s24 = smov 0  }
   0x3   :  { %s1167_s25 = smov 0  }
   0x4 LB: > { %s886_s26 = sadd.s32 4294967295, %s1118_s25   ;;  %s27_s27 = sadd.s32 1, %s1110_s23  ;;  %s1118_s25 = sphi %s1167_s25, %s18_s25   ;;  %s1114_s24 = sphi %s1165_s24, %s1317_s24   ;;  %s1110_s23 = sphi %s1163_s23, %s1316_s23   ;;  %s1106_s22 = sphi %s1161_s22, %s1315_s22   ;;  %s1102_s21 = sphi %s1159_s21, %s1314_s21  }
   0x5   : > { %p28_p0 = scmp.ge.s32.totalorder %s27_s27, 8  ;;  %s30_s28 = sadd.s32 1, %s1114_s24 }
   0x6   : > { %p896_p1 = scmp.ge.s32.totalorder %s1118_s25, 1  ;;  %p231_p2 = scmp.lt.s32.totalorder %s1118_s25, 17 }
   0x7   : > { %s1319_s27 = smov (%p28_p0, %s27_s27), 0  ;;  %s1321_s28 = smov (!%p28_p0, %s30_s28), %s1114_s24 }
   0x8   : > { %p1192_p3 = pnand %p896_p1, %p231_p2  ;;  %p32_p4 = scmp.ge.s32.totalorder %s1321_s28, 2 }
   0x9   : > { %p1196_p5 = scmp.eq.s32.totalorder %s886_s26, 0  ;;  %s242_s9 = sshll.u32 %s1308_s4, 4  ;;  %s243_s9 = int_to_ptr.hbm [resolvable:$true] %s242_s9 }
   0xa   : > { %p956_p6 = pneg %p1192_p3  ;;  %s1323_s28 = smov (%p32_p4, %s1321_s28), 0 }
   0xb   : > { %s1120_s10 = smov [#allocation2]   ;;  %s1121_s12 = smov 64  }
   0xc   : > { %s244_s11 = sshll.u32 %s1120_s10, 4  ;;  %p957_p7 = pnand %p1196_p5, %p956_p6  ;;  %s245_s11 = int_to_ptr.vmem [resolvable:$true] %s244_s11 }
   0xd   : > { %s1122_s13 = smov 4   ;;  %s257_s16 = sshll.u32 %s1309_s5, 4  ;;  %s258_s16 = int_to_ptr.hbm [resolvable:$true] %s257_s16 }
   0xe   : > { %959 = dma.hbm_to_vmem [thread:$0]  (!%p957_p7), %s243_s9, 512, %s245_s11, [#allocation3], %s1121_s12, %s1121_s12, %s1122_s13  }
   0xf   : > { %s1123_s17 = smov [#allocation4]   ;;  %334 = sbr.rel (%p1192_p3) target bundleno = 203 (0xcb), region = 44 }
  0x10   : > { %s259_s18 = sshll.u32 %s1123_s17, 4  ;;  %s260_s18 = int_to_ptr.vmem [resolvable:$true] %s259_s18 }
  0x11   : > { %962 = dma.hbm_to_vmem [thread:$0]  (!%p957_p7), %s258_s16, 16, %s260_s18, [#allocation5]  }
  0x14   : > { %1093 = dma.done.wait (%p1196_p5), [#allocation3], 512  }
  0x15   : > { %1095 = vsyncadd (%p1196_p5), [#allocation3], 4294966784 }
  0x16   : > { %1097 = dma.done.wait (%p1196_p5), [#allocation5], 16  }
  0x17   : > { %1099 = vsyncadd (%p1196_p5), [#allocation5], 4294967280  ;;  %s1223_s19 = sshll.u32 %s1102_s21, 1  ;;  %p412_p8 = scmp.lt.s32.totalorder %s1106_s22, 1  ;;  %vm491_vm0 = vcmask 1043456   ;;  %vm487_vm1 = vcmask 64512  }
  0x18   : > { %s423_s20 = sadd.s32 1, %s1223_s19  ;;  %p414_p9 = scmp.lt.s32.totalorder %s1223_s19, 17  ;;  %v530_v0 = vld [vmem:[#allocation2 + $0x8] sm:$0xf]  ;;  %v472_v1 = vld [vmem:[#allocation2] sm:$0xf] }
  0x19   : > { %s1325_s22 = smov (!%p412_p8, %s1106_s22), 1  ;;  %p426_p10 = scmp.lt.s32.totalorder %s423_s20, 17  ;;  %v535_v2 = vsel %vm491_vm0, %v530_v0, 0  ;;  %v512_v3 = vsel %vm491_vm0, %v472_v1, 0  ;;  %v474_v4 = vld [vmem:[#allocation2 + $0x4] sm:$0xf] }
  0x1a   : > { %s449_s26 = sadd.s32 3, %s1223_s19  ;;  %s1233_s29 = smul.u32 36, %s1325_s22  ;;  %544 = vmatpush.bf16.msra.mxu2 %v535_v2  ;;  %521 = vmatpush.bf16.msra.mxu1 %v512_v3  ;;  %v493_v5 = vsel %vm491_vm0, %v474_v4, 0  ;;  %v552_v6 = vld [vmem:[#allocation2 + $0xc] sm:$0xf] }
  0x1b   : > { %p1237_p11 = scmp.lt.s32.totalorder %s449_s26, 17  ;;  %s1327_s20 = smov (!%p426_p10, %s423_s20), 17  ;;  %v646_v7 = vld [vmem:[#allocation2 + $0x18] sm:$0xf]  ;;  %502 = vmatpush.bf16.msra.mxu0 %v493_v5  ;;  %v569_v8 = vsel %vm491_vm0, %v552_v6, 0 }
  0x1c   : > { %s415_s7 = scalar_select %p414_p9, %s1223_s19, 17  ;;  %v651_v9 = vsel %vm491_vm0, %v646_v7, 0  ;;  %v588_v10 = vld [vmem:[#allocation2 + $0x10] sm:$0xf]  ;;  %578 = vmatpush.bf16.msra.mxu3 %v569_v8  ;;  %v668_v20 = vld [vmem:[#allocation2 + $0x1c] sm:$0xf] }
  0x1d   : > { %s907_s8 = sshll.u32 %s1327_s20, 1  ;;  %s436_s9 = sadd.s32 2, %s1223_s19  ;;  %v593_v19 = vsel %vm491_vm0, %v588_v10, 0  ;;  %v610_v21 = vld [vmem:[#allocation2 + $0x14] sm:$0xf]  ;;  %v685_v24 = vsel %vm491_vm0, %v668_v20, 0 }
  0x1e   : > { %s430_s10 = sadd.s32 %s1233_s29, %s907_s8  ;;  %s904_s11 = sshll.u32 %s415_s7, 1  ;;  %660 = vmatpush.bf16.msrb.mxu2 %v651_v9  ;;  %v627_v25 = vsel %vm491_vm0, %v610_v21, 0  ;;  %v1011_v2 = vld [vmem:[#allocation4] ss:$0 sm:$0xff] }
  0x1f   : > { %s908_s12 = sshll.u32 %s430_s10, 2  ;;  %s418_s13 = sadd.s32 %s1233_s29, %s904_s11  ;;  %602 = vmatpush.bf16.msrb.mxu0 %v593_v19  ;;  %636 = vmatpush.bf16.msrb.mxu1 %v627_v25 }
  0x20   : > { %s432_s16 = scalar_lea.vmem %s1305_s1, %s908_s12  ;;  %s905_s17 = sshll.u32 %s418_s13, 2  ;;  %694 = vmatpush.bf16.msrb.mxu3 %v685_v24 }
  0x21   : > { %v527_v11 = vld [vmem:[%s432_s16] sm:$0xf]  ;;  %v944_v13 = vld [vmem:[%s432_s16] sm:$0x10]  ;;  %s420_s7 = scalar_lea.vmem %s1304_s0, %s905_s17  ;;  %s1329_s26 = smov (!%p1237_p11, %s449_s26), 17 }
  0x22   : > { %v926_v12 = vld [vmem:[%s432_s16] sm:$0xf]  ;;  %923 = vmatmul.msk.bf16.vlgmr.msra.gmra.mxu2 %vm487_vm1, %v527_v11  ;;  %v943_v17 = vld [vmem:[%s420_s7] sm:$0x10]  ;;  %s913_s8 = sshll.u32 %s1329_s26, 1  ;;  %p439_p12 = scmp.lt.s32.totalorder %s436_s9, 17 }
  0x23   : > { %v927_v14 = vor.u32 %v944_v13, %v926_v12  ;;  %v470_v15 = vld [vmem:[%s420_s7] sm:$0xf]  ;;  %s456_s10 = sadd.s32 %s1233_s29, %s913_s8  ;;  %p463_p13 = scmp.lt.s32.totalorder %s1102_s21, 7 }
  0x24   : > { %v919_v16 = vld [vmem:[%s420_s7] sm:$0xf]  ;;  %922 = vmatmul.msk.bf16.vlgmr.msra.gmra.mxu1 %vm487_vm1, %v470_v15  ;;  %s914_s30 = sshll.u32 %s456_s10, 2  ;;  %s1331_s9 = smov (!%p439_p12, %s436_s9), 17 }
  0x25   : > { %v920_v18 = vor.u32 %v943_v17, %v919_v16  ;;  %v559_v22 = vshrl.u32 %v927_v14, 16  ;;  %v561_v23 = vshll.u32 %v927_v14, 16  ;;  %s458_s13 = scalar_lea.vmem %s1307_s3, %s914_s30  ;;  %s910_s26 = sshll.u32 %s1331_s9, 1 }
  0x26   : > { %v938_v32 = vld [vmem:[%s458_s13] sm:$0xf]  ;;  %v946_v33 = vld [vmem:[%s458_s13] sm:$0x10]  ;;  %s443_s14 = sadd.s32 %s1233_s29, %s910_s26  ;;  %s1333_s21 = smov (!%p463_p13, %s1102_s21), 7 }
  0x27   : > { %v481_v26 = vshrl.u32 %v920_v18, 16  ;;  %v483_v27 = vshll.u32 %v920_v18, 16  ;;  %v563_v28 = vrot.slane %v561_v23, 1  ;;  %v939_v34 = vor.u32 %v946_v33, %v938_v32  ;;  %s911_s15 = sshll.u32 %s443_s14, 2  ;;  %v643_v36 = vld [vmem:[%s458_s13] sm:$0xf] }
  0x28   : > { %s445_s18 = scalar_lea.vmem %s1306_s2, %s911_s15  ;;  %s915_s19 = sshll.u32 %s1325_s22, 3 }
  0x29   : > { %v485_v29 = vrot.slane %v483_v27, 1  ;;  %v564_v30 = vor.u32 %v563_v28, %v559_v22  ;;  %v677_v35 = vshll.u32 %v939_v34, 16  ;;  %v932_v37 = vld [vmem:[%s445_s18] sm:$0xf]  ;;  %v945_v38 = vld [vmem:[%s445_s18] sm:$0x10]  ;;  %s466_s29 = sadd.s32 %s915_s19, %s1333_s21 }
  0x2a   : > { %v933_v39 = vor.u32 %v945_v38, %v932_v37  ;;  %v675_v40 = vshrl.u32 %v939_v34, 16  ;;  %v585_v47 = vld [vmem:[%s445_s18] sm:$0xf]  ;;  %s916_s9 = sshll.u32 %s466_s29, 2 }
  0x2b   : > { %v486_v31 = vor.u32 %v485_v29, %v481_v26  ;;  %928 = vmatmul.msk.bf16.vlgmr.msra.gmra.mxu3 %vm487_vm1, %v564_v30  ;;  %v679_v41 = vrot.slane %v677_v35, 1  ;;  %s468_s8 = scalar_lea.vmem %s1310_s6, %s916_s9 }
  0x2c   : > { %v617_v42 = vshrl.u32 %v933_v39, 16  ;;  %v619_v43 = vshll.u32 %v933_v39, 16 }
  0x2d   : > { %921 = vmatmul.msk.bf16.vlgmr.msra.gmra.mxu0 %vm487_vm1, %v486_v31  ;;  %v680_v45 = vor.u32 %v679_v41, %v675_v40 }
  0x2e   : > { %v621_v44 = vrot.slane %v619_v43, 1 }
  0x30   : > { %v622_v46 = vor.u32 %v621_v44, %v617_v42 }
  0x32   : > { %935 = vmatmul.msk.bf16.vlgmr.msrb.gmra.mxu2 %vm487_vm1, %v643_v36 }
  0x34   : > { %934 = vmatmul.msk.bf16.vlgmr.msrb.gmra.mxu1 %vm487_vm1, %v622_v46 }
  0x3b   : > { %940 = vmatmul.msk.bf16.vlgmr.msrb.gmra.mxu3 %vm487_vm1, %v680_v45 }
  0x3d   : > { %929 = vmatmul.msk.bf16.vlgmr.msrb.gmra.mxu0 %vm487_vm1, %v585_v47 }
  0xa1   : > { %v523_v48 = vpop.f32.mrf.mxu1 }
  0xa5   : > { %v546_v49 = vpop.f32.mrf.mxu2 }
  0xa9   : > { %v525_v51 = vpop.f32.mrf.mxu1 }
  0xaa   : > { %v504_v50 = vpop.f32.mrf.mxu0 }
  0xab   : > { %v524_v55 = vadd.f32 %v523_v48, %v504_v50 }
  0xad   : > { %v548_v53 = vpop.f32.mrf.mxu2  ;;  %v550_v56 = vadd.f32 %v546_v49, %v524_v55 }
  0xae   : > { %v580_v52 = vpop.f32.mrf.mxu3 }
  0xaf   : > { %v584_v60 = vadd.f32 %v580_v52, %v550_v56 }
  0xb1   : > { %v638_v59 = vpop.f32.mrf.mxu1 }
  0xb2   : > { %v506_v54 = vpop.f32.mrf.mxu0 }
  0xb5   : > { %v662_v58 = vpop.f32.mrf.mxu2 }
  0xb6   : > { %v582_v57 = vpop.f32.mrf.mxu3 }
  0xb9   : > { %v640_v4 = vpop.f32.mrf.mxu1 }
  0xba   : > { %v604_v61 = vpop.f32.mrf.mxu0 }
  0xbb   : > { %v608_v62 = vadd.f32 %v604_v61, %v584_v60 }
  0xbd   : > { %v642_v63 = vadd.f32 %v638_v59, %v608_v62  ;;  %v664_v3 = vpop.f32.mrf.mxu2 }
  0xbe   : > { %v696_v1 = vpop.f32.mrf.mxu3 }
  0xbf   : > { %v666_v0 = vadd.f32 %v662_v58, %v642_v63 }
  0xc1   : > { %v700_v5 = vadd.f32 %v696_v1, %v666_v0 }
  0xc2   : > { %v606_v6 = vpop.f32.mrf.mxu0 }
  0xc3   : > { %v705_v7 = vadd.f32 %v1011_v2, %v700_v5 }
  0xc5   : > { %vm706_vm2 = vcmp.gt.f32.partialorder %v705_v7, 0.0  ;;  %v707_v8 = vmul.f32 0.2, %v705_v7 }
  0xc6   : > { %v698_v10 = vpop.f32.mrf.mxu3 }
  0xc7   : > { %v708_v9 = vsel %vm706_vm2, %v705_v7, %v707_v8 }
  0xc8   : > { %v709_v11 = vpack.c.bf16 %v708_v9, %v708_v9 }
  0xca   : > { %710 = vst [vmem:[%s468_s8] sm:$0xf] %v709_v11 }
  0xcb PF: > { %s18_s25 = sadd.s32 1, %s1118_s25   ;;  %s1314_s21 = smov %s1110_s23 }
  0xcc   : > { %p15_p0 = scmp.ge.s32.totalorder %s18_s25, 18   ;;  %s1315_s22 = smov %s1114_s24 }
  0xcd   : > { %s1316_s23 = smov %s1319_s27  ;;  %s1317_s24 = smov %s1323_s28 }
  0xce   :  { %17 = sbr.rel (!%p15_p0) target bundleno = 4 (0x4), region = 99 }
  0xd3   :  { %738 = vsyncpa [#allocation3], 1 }
  0xd4   :  { %740 = vsyncpa [#allocation3 + $0x1], 1 }
  0xd5   :  { %741 = vsyncpa [#allocation5], 1 }

// kernel: _lambda_.8
= control target key start
LH: loop header
LB: loop body
LE: loop exit
PB: predicated region body
PF: predicated region fallthrough
CT: control target
= control target key end

     0   :  { %s418_s12 = smov 0   ;;  %s420_s13 = smov 0   ;;  %s472_s0 = inlined_call_operand.vmem [shape: bf16[2,4,4,128], index: 0, kind: input, shape index: {}]   ;;  %s473_s1 = inlined_call_operand.vmem [shape: f32[1,128], index: 1, kind: input, shape index: {}]   ;;  %s474_s2 = inlined_call_operand.vmem [shape: f32[1,128], index: 2, kind: input, shape index: {}]   ;;  %s475_s3 = inlined_call_operand.vmem [shape: bf16[2,4,4,128], index: 3, kind: output, shape index: {}]  }
   0x1   :  { %s422_s14 = smov 0   ;;  %s424_s15 = smov 0  }
   0x2   :  { %s426_s16 = smov 0  }
   0x3 LB: > { %s22_s17 = sadd.s32 1, %s388_s14  ;;  %s25_s18 = sadd.s32 1, %s392_s15  ;;  %s396_s16 = sphi %s426_s16, %s13_s16   ;;  %s392_s15 = sphi %s424_s15, %s479_s15   ;;  %s388_s14 = sphi %s422_s14, %s478_s14   ;;  %s384_s13 = sphi %s420_s13, %s477_s13   ;;  %s380_s12 = sphi %s418_s12, %s476_s12  }
   0x4   : > { %p23_p0 = scmp.ge.s32.totalorder %s22_s17, 4  ;;  %p309_p1 = scmp.ge.s32.totalorder %s396_s16, 1 }
   0x5   : > { %p156_p2 = scmp.lt.s32.totalorder %s396_s16, 9 }
   0x6   : > { %s481_s17 = smov (%p23_p0, %s22_s17), 0  ;;  %s483_s18 = smov (!%p23_p0, %s25_s18), %s392_s15 }
   0x7   : > { %p157_p3 = pnand %p309_p1, %p156_p2  ;;  %p27_p4 = scmp.ge.s32.totalorder %s483_s18, 2 }
   0x8   : > { %p186_p5 = scmp.lt.s32.totalorder (!%p157_p3), %s384_s13, 1  ;;  %p188_p6 = scmp.lt.s32.totalorder (!%p157_p3), %s380_s12, 3 }
   0x9   : > { %s485_s18 = smov (%p27_p4, %s483_s18), 0  ;;  %160 = sbr.rel (%p157_p3) target bundleno = 32 (0x20), region = 32 }
   0xe   : > { %s487_s13 = smov (!%p186_p5, %s384_s13), 1  ;;  %s489_s12 = smov (!%p188_p6, %s380_s12), 3  ;;  %v356_v0 = vld [vmem:[%s473_s1] ss:$0 sm:$0xff] }
   0xf   : > { %s310_s19 = sshll.u32 %s487_s13, 2  ;;  %v357_v3 = vld [vmem:[%s474_s2] ss:$0 sm:$0xff] }
  0x10   : > { %s191_s20 = sadd.s32 %s310_s19, %s489_s12 }
  0x11   : > { %s311_s21 = sshll.u32 %s191_s20, 1 }
  0x12   : > { %s193_s24 = scalar_lea.vmem %s472_s0, %s311_s21  ;;  %s201_s4 = scalar_lea.vmem %s475_s3, %s311_s21 }
  0x13   : > { %v202_v1 = vld [vmem:[%s193_s24] sm:$0x3] }
  0x14   : > { %v203_v2 = vunpack.c.l.bf16 %v202_v1 }
  0x16   : > { %v208_v4 = vmul.f32 %v356_v0, %v203_v2 }
  0x18   : > { %v213_v5 = vadd.f32 %v357_v3, %v208_v4 }
  0x1a   : > { %vm214_vm0 = vcmp.gt.f32.partialorder %v213_v5, 0.0  ;;  %v215_v6 = vmul.f32 0.2, %v213_v5 }
  0x1c   : > { %v216_v7 = vsel %vm214_vm0, %v213_v5, %v215_v6 }
  0x1d   : > { %v217_v8 = vpack.c.bf16 %v216_v7, %v216_v7 }
  0x1f   : > { %218 = vst [vmem:[%s201_s4] sm:$0x3] %v217_v8 }
  0x20 PF: > { %s13_s16 = sadd.s32 1, %s396_s16   ;;  %s476_s12 = smov %s388_s14 }
  0x21   : > { %p10_p7 = scmp.ge.s32.totalorder %s13_s16, 10   ;;  %s477_s13 = smov %s392_s15 }
  0x22   : > { %s478_s14 = smov %s481_s17  ;;  %s479_s15 = smov %s485_s18 }
  0x23   :  { %12 = sbr.rel (!%p10_p7) target bundleno = 3 (0x3), region = 62 }

// kernel: _lambda_.7
= control target key start
LH: loop header
LB: loop body
LE: loop exit
PB: predicated region body
PF: predicated region fallthrough
CT: control target
= control target key end

     0   :  { %s3030_s21 = smov 0   ;;  %s3032_s22 = smov 0   ;;  %s3511_s0 = inlined_call_operand.vmem [shape: bf16[2,10,5,256], index: 0, kind: input, shape index: {}, may-alias: {0,1,2,3}]   ;;  %s3512_s1 = inlined_call_operand.vmem [shape: bf16[2,10,5,256], index: 1, kind: input, shape index: {}, may-alias: {0,1,2,3}]   ;;  %s3513_s2 = inlined_call_operand.vmem [shape: bf16[2,10,5,256], index: 2, kind: input, shape index: {}, may-alias: {0,1,2,3}]   ;;  %s3514_s3 = inlined_call_operand.vmem [shape: bf16[2,10,5,256], index: 3, kind: input, shape index: {}, may-alias: {0,1,2,3}]   ;;  %s3515_s4 = inlined_call_operand.vmem [shape: bf16[4,2,256,128], index: 4, kind: input, shape index: {}]   ;;  %s3516_s5 = inlined_call_operand.vmem [shape: bf16[2,4,4,128], index: 5, kind: output, shape index: {0}]   ;;  %s3517_s6 = inlined_call_operand.vmem [shape: f32[2,4,2,128], index: 6, kind: output, shape index: {1}]  }
   0x1   :  { %s3034_s23 = smov 0   ;;  %s3036_s24 = smov 0  }
   0x2   :  { %s3038_s25 = smov 0  }
   0x3 LB: > { %s26_s26 = sadd.s32 1, %s2985_s23  ;;  %s29_s27 = sadd.s32 1, %s2989_s24  ;;  %s2993_s25 = sphi %s3038_s25, %s17_s25   ;;  %s2989_s24 = sphi %s3036_s24, %s3521_s24   ;;  %s2985_s23 = sphi %s3034_s23, %s3520_s23   ;;  %s2981_s22 = sphi %s3032_s22, %s3519_s22   ;;  %s2977_s21 = sphi %s3030_s21, %s3518_s21  }
   0x4   : > { %p27_p0 = scmp.ge.s32.totalorder %s26_s26, 4  ;;  %p2031_p1 = scmp.ge.s32.totalorder %s2993_s25, 1 }
   0x5   : > { %p313_p2 = scmp.lt.s32.totalorder %s2993_s25, 9 }
   0x6   : > { %s3523_s26 = smov (%p27_p0, %s26_s26), 0  ;;  %s3525_s27 = smov (!%p27_p0, %s29_s27), %s2989_s24 }
   0x7   : > { %p314_p3 = pnand %p2031_p1, %p313_p2  ;;  %p31_p4 = scmp.ge.s32.totalorder %s3525_s27, 2 }
   0x8   : > { %s3072_s10 = sshll.u32 (!%p314_p3), %s2977_s21, 1  ;;  %p393_p5 = scmp.lt.s32.totalorder (!%p314_p3), %s2981_s22, 1 }
   0x9   : > { %s3527_s27 = smov (%p31_p4, %s3525_s27), 0  ;;  %317 = sbr.rel (%p314_p3) target bundleno = 298 (0x12a), region = 40 }
   0xa   : > { %p395_p6 = scmp.lt.s32.totalorder (!%p314_p3), %s3072_s10, 9  ;;  %s430_s17 = sadd.s32 (!%p314_p3), 3, %s3072_s10 }
   0xb   : > { %p433_p7 = scmp.lt.s32.totalorder (!%p314_p3), %s430_s17, 9  ;;  %s404_s13 = sadd.s32 (!%p314_p3), 1, %s3072_s10 }
   0xc   : > { %p407_p8 = scmp.lt.s32.totalorder (!%p314_p3), %s404_s13, 9  ;;  %s417_s19 = sadd.s32 (!%p314_p3), 2, %s3072_s10 }
   0xd   : > { %p420_p9 = scmp.lt.s32.totalorder (!%p314_p3), %s417_s19, 9  ;;  %p444_p10 = scmp.lt.s32.totalorder (!%p314_p3), %s2977_s21, 3 }
   0xe   : > { %v2809_v0 = vld [vmem:[%s3515_s4 + $0xb8] sm:$0xff]  ;;  %v2808_v4 = vld [vmem:[%s3515_s4 + $0xb0] sm:$0xff]  ;;  %s3529_s22 = smov (!%p393_p5, %s2981_s22), 1  ;;  %v2807_v8 = vld [vmem:[%s3515_s4 + $0xa8] sm:$0xff]  ;;  %s3531_s17 = smov (!%p433_p7, %s430_s17), 9  ;;  %vm1799_vm0 = vcmask 1043456  }
   0xf   : > { %v2817_v1 = vld [vmem:[%s3515_s4 + $0xf8] sm:$0xff]  ;;  %641 = vmatpush.bf16.msra.mxu0 %v2809_v0  ;;  %v2816_v5 = vld [vmem:[%s3515_s4 + $0xf0] sm:$0xff]  ;;  %s396_s28 = scalar_select %p395_p6, %s3072_s10, 9  ;;  %v2815_v9 = vld [vmem:[%s3515_s4 + $0xe8] sm:$0xff]  ;;  %vm1815_vm1 = vcmask 1040384  }
  0x10   : > { %v2793_v2 = vld [vmem:[%s3515_s4 + $0x38] sm:$0xff]  ;;  %654 = vmatpush.bf16.msra.mxu1 %v2817_v1  ;;  %v2792_v6 = vld [vmem:[%s3515_s4 + $0x30] sm:$0xff]  ;;  %s3094_s29 = smul.u32 20, %s3529_s22  ;;  %v2791_v10 = vld [vmem:[%s3515_s4 + $0x28] sm:$0xff]  ;;  %s2042_s15 = sshll.u32 %s3531_s17, 1 }
  0x11   : > { %v2801_v3 = vld [vmem:[%s3515_s4 + $0x78] sm:$0xff]  ;;  %765 = vmatpush.bf16.msra.mxu2 %v2793_v2  ;;  %v2800_v7 = vld [vmem:[%s3515_s4 + $0x70] sm:$0xff]  ;;  %s2033_s30 = sshll.u32 %s396_s28, 1  ;;  %v2799_v11 = vld [vmem:[%s3515_s4 + $0x68] sm:$0xff]  ;;  %s3533_s13 = smov (!%p407_p8, %s404_s13), 9 }
  0x12   : > { %778 = vmatpush.bf16.msra.mxu3 %v2801_v3  ;;  %s399_s16 = sadd.s32 %s3094_s29, %s2033_s30  ;;  %v2806_v12 = vld [vmem:[%s3515_s4 + $0xa0] sm:$0xff]  ;;  %v2805_v16 = vld [vmem:[%s3515_s4 + $0x98] sm:$0xff]  ;;  %v2804_v23 = vld [vmem:[%s3515_s4 + $0x90] sm:$0xff]  ;;  %s3151_s20 = sadd.s32 %s3094_s29, %s2042_s15 }
  0x13   : > { %642 = vmatpush.bf16.msra.mxu0 %v2808_v4  ;;  %v2814_v13 = vld [vmem:[%s3515_s4 + $0xe0] sm:$0xff]  ;;  %s2034_s7 = sshll.u32 %s399_s16, 2  ;;  %v2813_v17 = vld [vmem:[%s3515_s4 + $0xd8] sm:$0xff]  ;;  %v2812_v24 = vld [vmem:[%s3515_s4 + $0xd0] sm:$0xff]  ;;  %s2036_s18 = sshll.u32 %s3533_s13, 1 }
  0x14   : > { %655 = vmatpush.bf16.msra.mxu1 %v2816_v5  ;;  %v2790_v14 = vld [vmem:[%s3515_s4 + $0x20] sm:$0xff]  ;;  %s401_s14 = scalar_lea.vmem %s3511_s0, %s2034_s7  ;;  %v2789_v18 = vld [vmem:[%s3515_s4 + $0x18] sm:$0xff]  ;;  %v2788_v25 = vld [vmem:[%s3515_s4 + $0x10] sm:$0xff]  ;;  %s411_s9 = sadd.s32 %s3094_s29, %s2036_s18 }
  0x15   : > { %766 = vmatpush.bf16.msra.mxu2 %v2792_v6  ;;  %v2798_v15 = vld [vmem:[%s3515_s4 + $0x60] sm:$0xff]  ;;  %v2797_v19 = vld [vmem:[%s3515_s4 + $0x58] sm:$0xff]  ;;  %v2796_v26 = vld [vmem:[%s3515_s4 + $0x50] sm:$0xff]  ;;  %s2037_s12 = sshll.u32 %s411_s9, 2  ;;  %s3535_s19 = smov (!%p420_p9, %s417_s19), 9 }
  0x16   : > { %779 = vmatpush.bf16.msra.mxu3 %v2800_v7  ;;  %v458_v20 = vld [vmem:[%s401_s14] sm:$0x77]  ;;  %v2803_v29 = vld [vmem:[%s3515_s4 + $0x88] sm:$0xff]  ;;  %v2825_v43 = vld [vmem:[%s3515_s4 + $0x138] sm:$0xff]  ;;  %s413_s7 = scalar_lea.vmem %s3512_s1, %s2037_s12  ;;  %s2039_s28 = sshll.u32 %s3535_s19, 1 }
  0x17   : > { %643 = vmatpush.bf16.msra.mxu0 %v2807_v8  ;;  %v525_v21 = vunpack.c.l.b16 %v458_v20  ;;  %v526_v22 = vunpack.c.h.b16 %v458_v20  ;;  %v2811_v30 = vld [vmem:[%s3515_s4 + $0xc8] sm:$0xff]  ;;  %v2802_v35 = vld [vmem:[%s3515_s4 + $0x80] sm:$0xff]  ;;  %v2833_v44 = vld [vmem:[%s3515_s4 + $0x178] sm:$0xff]  ;;  %s424_s10 = sadd.s32 %s3094_s29, %s2039_s28  ;;  %s3537_s21 = smov (!%p444_p10, %s2977_s21), 3 }
  0x18   : > { %656 = vmatpush.bf16.msra.mxu1 %v2815_v9  ;;  %v2787_v31 = vld [vmem:[%s3515_s4 + $0x8] sm:$0xff]  ;;  %v2810_v36 = vld [vmem:[%s3515_s4 + $0xc0] sm:$0xff]  ;;  %v2841_v45 = vld [vmem:[%s3515_s4 + $0x1b8] sm:$0xff]  ;;  %s2040_s18 = sshll.u32 %s424_s10, 2  ;;  %s2044_s8 = sshll.u32 %s3529_s22, 2 }
  0x19   : > { %767 = vmatpush.bf16.msra.mxu2 %v2791_v10  ;;  %v527_v27 = vpack.c.b16 %v525_v21, %v525_v21  ;;  %v528_v28 = vpack.c.b16 %v526_v22, %v526_v22  ;;  %v2795_v32 = vld [vmem:[%s3515_s4 + $0x48] sm:$0xff]  ;;  %v2786_v37 = vld [vmem:[%s3515_s4] sm:$0xff]  ;;  %v2849_v46 = vld [vmem:[%s3515_s4 + $0x1f8] sm:$0xff]  ;;  %s426_s13 = scalar_lea.vmem %s3513_s2, %s2040_s18  ;;  %s2043_s18 = sshll.u32 %s3151_s20, 2 }
  0x1a   : > { %780 = vmatpush.bf16.msra.mxu3 %v2799_v11  ;;  %v2794_v38 = vld [vmem:[%s3515_s4 + $0x40] sm:$0xff]  ;;  %v2824_v49 = vld [vmem:[%s3515_s4 + $0x130] sm:$0xff]  ;;  %v2823_v53 = vld [vmem:[%s3515_s4 + $0x128] sm:$0xff]  ;;  %s439_s19 = scalar_lea.vmem %s3514_s3, %s2043_s18  ;;  %s3487_s29 = sadd.s32 %s2044_s8, %s3537_s21 }
  0x1b   : > { %644 = vmatpush.bf16.msra.mxu0 %v2806_v12  ;;  %v532_v33 = vshll.u32 %v527_v27, 16  ;;  %v539_v34 = vshll.u32 %v528_v28, 16  ;;  %v530_v39 = vshrl.u32 %v527_v27, 16  ;;  %v537_v41 = vshrl.u32 %v528_v28, 16  ;;  %v2832_v50 = vld [vmem:[%s3515_s4 + $0x170] sm:$0xff]  ;;  %v2831_v54 = vld [vmem:[%s3515_s4 + $0x168] sm:$0xff] }
  0x1c   : > { %657 = vmatpush.bf16.msra.mxu1 %v2814_v13  ;;  %v2840_v51 = vld [vmem:[%s3515_s4 + $0x1b0] sm:$0xff]  ;;  %v2839_v55 = vld [vmem:[%s3515_s4 + $0x1a8] sm:$0xff]  ;;  %v2822_v57 = vld [vmem:[%s3515_s4 + $0x120] sm:$0xff]  ;;  %s2045_s18 = sshll.u32 %s3487_s29, 1 }
  0x1d   : > { %768 = vmatpush.bf16.msra.mxu2 %v2790_v14  ;;  %v534_v40 = vrot.slane %v532_v33, 1  ;;  %v541_v42 = vrot.slane %v539_v34, 1  ;;  %v2848_v52 = vld [vmem:[%s3515_s4 + $0x1f0] sm:$0xff]  ;;  %v2847_v56 = vld [vmem:[%s3515_s4 + $0x1e8] sm:$0xff]  ;;  %v2830_v58 = vld [vmem:[%s3515_s4 + $0x160] sm:$0xff]  ;;  %s449_s9 = scalar_lea.vmem %s3516_s5, %s2045_s18  ;;  %s457_s11 = scalar_lea.vmem %s3517_s6, %s2045_s18 }
  0x1e   : > { %781 = vmatpush.bf16.msra.mxu3 %v2798_v15  ;;  %v2838_v59 = vld [vmem:[%s3515_s4 + $0x1a0] sm:$0xff]  ;;  %v2821_v62 = vld [vmem:[%s3515_s4 + $0x118] sm:$0xff]  ;;  %v2820_v4 = vld [vmem:[%s3515_s4 + $0x110] sm:$0xff] }
  0x1f   : > { %645 = vmatpush.bf16.msra.mxu0 %v2805_v16  ;;  %v535_v47 = vor.u32 %v534_v40, %v530_v39  ;;  %v542_v48 = vor.u32 %v541_v42, %v537_v41  ;;  %v2846_v60 = vld [vmem:[%s3515_s4 + $0x1e0] sm:$0xff]  ;;  %v2829_v63 = vld [vmem:[%s3515_s4 + $0x158] sm:$0xff]  ;;  %v2828_v5 = vld [vmem:[%s3515_s4 + $0x150] sm:$0xff] }
  0x20   : > { %658 = vmatpush.bf16.msra.mxu1 %v2813_v17  ;;  %v791_v61 = vld [vmem:[%s413_s7] sm:$0x77]  ;;  %v2837_v2 = vld [vmem:[%s3515_s4 + $0x198] sm:$0xff]  ;;  %v2836_v8 = vld [vmem:[%s3515_s4 + $0x190] sm:$0xff] }
  0x21   : > { %769 = vmatpush.bf16.msra.mxu2 %v2789_v18  ;;  %v826_v0 = vunpack.c.l.b16 %v791_v61  ;;  %v827_v1 = vunpack.c.h.b16 %v791_v61  ;;  %v2845_v3 = vld [vmem:[%s3515_s4 + $0x1d8] sm:$0xff]  ;;  %v2844_v9 = vld [vmem:[%s3515_s4 + $0x1d0] sm:$0xff]  ;;  %v2819_v10 = vld [vmem:[%s3515_s4 + $0x108] sm:$0xff] }
  0x22   : > { %782 = vmatpush.bf16.msra.mxu3 %v2797_v19  ;;  %v2827_v11 = vld [vmem:[%s3515_s4 + $0x148] sm:$0xff]  ;;  %v2818_v16 = vld [vmem:[%s3515_s4 + $0x100] sm:$0xff]  ;;  %v2880_v33 = vld [vmem:[%s3515_s4 + $0x2f0] sm:$0xff] }
  0x23   : > { %646 = vmatpush.bf16.msra.mxu0 %v2804_v23  ;;  %v828_v6 = vpack.c.b16 %v826_v0, %v826_v0  ;;  %v829_v7 = vpack.c.b16 %v827_v1, %v827_v1  ;;  %v2835_v14 = vld [vmem:[%s3515_s4 + $0x188] sm:$0xff]  ;;  %v2826_v17 = vld [vmem:[%s3515_s4 + $0x140] sm:$0xff] }
  0x24   : > { %659 = vmatpush.bf16.msra.mxu1 %v2812_v24  ;;  %v2843_v15 = vld [vmem:[%s3515_s4 + $0x1c8] sm:$0xff]  ;;  %v2834_v22 = vld [vmem:[%s3515_s4 + $0x180] sm:$0xff]  ;;  %v2857_v24 = vld [vmem:[%s3515_s4 + $0x238] sm:$0xff] }
  0x25   : > { %770 = vmatpush.bf16.msra.mxu2 %v2788_v25  ;;  %v991_v12 = vshll.u32 %v828_v6, 16  ;;  %v998_v13 = vshll.u32 %v829_v7, 16  ;;  %v989_v18 = vshrl.u32 %v828_v6, 16  ;;  %v996_v20 = vshrl.u32 %v829_v7, 16  ;;  %v2842_v23 = vld [vmem:[%s3515_s4 + $0x1c0] sm:$0xff]  ;;  %v2865_v25 = vld [vmem:[%s3515_s4 + $0x278] sm:$0xff] }
  0x26   : > { %783 = vmatpush.bf16.msra.mxu3 %v2796_v26  ;;  %v2873_v26 = vld [vmem:[%s3515_s4 + $0x2b8] sm:$0xff]  ;;  %v2855_v34 = vld [vmem:[%s3515_s4 + $0x228] sm:$0xff]  ;;  %v2862_v39 = vld [vmem:[%s3515_s4 + $0x260] sm:$0xff] }
  0x27   : > { %647 = vmatpush.bf16.msra.mxu0 %v2803_v29  ;;  %v993_v19 = vrot.slane %v991_v12, 1  ;;  %v1000_v21 = vrot.slane %v998_v13, 1  ;;  %v2870_v40 = vld [vmem:[%s3515_s4 + $0x2a0] sm:$0xff]  ;;  %v2896_v12 = vld [vmem:[%s3515_s4 + $0x370] sm:$0xff] }
  0x28   : > { %660 = vmatpush.bf16.msra.mxu1 %v2811_v30  ;;  %v2856_v30 = vld [vmem:[%s3515_s4 + $0x230] sm:$0xff]  ;;  %v2878_v41 = vld [vmem:[%s3515_s4 + $0x2e0] sm:$0xff] }
  0x29   : > { %771 = vmatpush.bf16.msra.mxu2 %v2787_v31  ;;  %v1001_v29 = vor.u32 %v1000_v21, %v996_v20  ;;  %v2864_v31 = vld [vmem:[%s3515_s4 + $0x270] sm:$0xff]  ;;  %v1127_v42 = vld [vmem:[%s426_s13] sm:$0x77] }
  0x2a   : > { %784 = vmatpush.bf16.msra.mxu3 %v2795_v32  ;;  %v2872_v32 = vld [vmem:[%s3515_s4 + $0x2b0] sm:$0xff]  ;;  %v2850_v61 = vld [vmem:[%s3515_s4 + $0x200] sm:$0xff] }
  0x2b   : > { %648 = vmatpush.bf16.msra.mxu0 %v2802_v35  ;;  %v2863_v35 = vld [vmem:[%s3515_s4 + $0x268] sm:$0xff]  ;;  %v2874_v0 = vld [vmem:[%s3515_s4 + $0x2c0] sm:$0xff]  ;;  %v2904_v13 = vld [vmem:[%s3515_s4 + $0x3b0] sm:$0xff] }
  0x2c   : > { %661 = vmatpush.bf16.msra.mxu1 %v2810_v36  ;;  %v2871_v36 = vld [vmem:[%s3515_s4 + $0x2a8] sm:$0xff]  ;;  %v2894_v20 = vld [vmem:[%s3515_s4 + $0x360] sm:$0xff] }
  0x2d   : > { %772 = vmatpush.bf16.msra.mxu2 %v2786_v37  ;;  %v2879_v37 = vld [vmem:[%s3515_s4 + $0x2e8] sm:$0xff]  ;;  %v2902_v21 = vld [vmem:[%s3515_s4 + $0x3a0] sm:$0xff] }
  0x2e   : > { %785 = vmatpush.bf16.msra.mxu3 %v2794_v38  ;;  %649 = vmatmul.bf16.vlgmr.msra.gmra.mxu0 %v535_v47  ;;  %v2854_v38 = vld [vmem:[%s3515_s4 + $0x220] sm:$0xff]  ;;  %v1162_v47 = vunpack.c.l.b16 %v1127_v42 }
  0x2f   : > { %928 = vmatpush.bf16.msrb.mxu0 %v2825_v43  ;;  %662 = vmatmul.bf16.vlgmr.msra.gmra.mxu1 %v542_v48  ;;  %v2853_v43 = vld [vmem:[%s3515_s4 + $0x218] sm:$0xff]  ;;  %v1163_v48 = vunpack.c.h.b16 %v1127_v42  ;;  %v2882_v42 = vld [vmem:[%s3515_s4 + $0x300] sm:$0xff] }
  0x30   : > { %941 = vmatpush.bf16.msrb.mxu1 %v2833_v44  ;;  %773 = vmatmul.bf16.vlgmr.msra.gmra.mxu2 %v527_v27  ;;  %v2881_v27 = vld [vmem:[%s3515_s4 + $0x2f8] sm:$0xff] }
  0x31   : > { %1100 = vmatpush.bf16.msrb.mxu2 %v2841_v45  ;;  %786 = vmatmul.bf16.vlgmr.msra.gmra.mxu3 %v528_v28  ;;  %v994_v28 = vor.u32 %v993_v19, %v989_v18  ;;  %v2861_v44 = vld [vmem:[%s3515_s4 + $0x258] sm:$0xff]  ;;  %v2911_v18 = vld [vmem:[%s3515_s4 + $0x3e8] sm:$0xff]  ;;  %v2886_v19 = vld [vmem:[%s3515_s4 + $0x320] sm:$0xff] }
  0x32   : > { %1113 = vmatpush.bf16.msrb.mxu3 %v2849_v46  ;;  %v2869_v45 = vld [vmem:[%s3515_s4 + $0x298] sm:$0xff] }
  0x33   : > { %929 = vmatpush.bf16.msrb.mxu0 %v2824_v49  ;;  %v2877_v46 = vld [vmem:[%s3515_s4 + $0x2d8] sm:$0xff]  ;;  %v2852_v49 = vld [vmem:[%s3515_s4 + $0x210] sm:$0xff] }
  0x34   : > { %942 = vmatpush.bf16.msrb.mxu1 %v2832_v50  ;;  %v2860_v50 = vld [vmem:[%s3515_s4 + $0x250] sm:$0xff] }
  0x35   : > { %1101 = vmatpush.bf16.msrb.mxu2 %v2840_v51  ;;  %v2868_v51 = vld [vmem:[%s3515_s4 + $0x290] sm:$0xff] }
  0x36   : > { %1114 = vmatpush.bf16.msrb.mxu3 %v2848_v52  ;;  %v2876_v52 = vld [vmem:[%s3515_s4 + $0x2d0] sm:$0xff] }
  0x37   : > { %930 = vmatpush.bf16.msrb.mxu0 %v2823_v53  ;;  %v1164_v53 = vpack.c.b16 %v1162_v47, %v1162_v47 }
  0x38   : > { %943 = vmatpush.bf16.msrb.mxu1 %v2831_v54  ;;  %v1165_v54 = vpack.c.b16 %v1163_v48, %v1163_v48  ;;  %v2898_v48 = vld [vmem:[%s3515_s4 + $0x380] sm:$0xff] }
  0x39   : > { %1102 = vmatpush.bf16.msrb.mxu2 %v2839_v55  ;;  %v2851_v55 = vld [vmem:[%s3515_s4 + $0x208] sm:$0xff]  ;;  %v1325_v1 = vshrl.u32 %v1164_v53, 16 }
  0x3a   : > { %1115 = vmatpush.bf16.msrb.mxu3 %v2847_v56  ;;  %v2859_v56 = vld [vmem:[%s3515_s4 + $0x248] sm:$0xff] }
  0x3b   : > { %931 = vmatpush.bf16.msrb.mxu0 %v2822_v57  ;;  %v2867_v57 = vld [vmem:[%s3515_s4 + $0x288] sm:$0xff] }
  0x3c   : > { %944 = vmatpush.bf16.msrb.mxu1 %v2830_v58  ;;  %v2875_v58 = vld [vmem:[%s3515_s4 + $0x2c8] sm:$0xff] }
  0x3d   : > { %1103 = vmatpush.bf16.msrb.mxu2 %v2838_v59  ;;  %v1327_v59 = vshll.u32 %v1164_v53, 16 }
  0x3e   : > { %1116 = vmatpush.bf16.msrb.mxu3 %v2846_v60  ;;  %v1334_v60 = vshll.u32 %v1165_v54, 16 }
  0x3f   : > { %932 = vmatpush.bf16.msrb.mxu0 %v2821_v62  ;;  %v2858_v62 = vld [vmem:[%s3515_s4 + $0x240] sm:$0xff] }
  0x40   : > { %945 = vmatpush.bf16.msrb.mxu1 %v2829_v63  ;;  %v2866_v63 = vld [vmem:[%s3515_s4 + $0x280] sm:$0xff] }
  0x41   : > { %1104 = vmatpush.bf16.msrb.mxu2 %v2837_v2  ;;  %v1329_v2 = vrot.slane %v1327_v59, 1 }
  0x42   : > { %1117 = vmatpush.bf16.msrb.mxu3 %v2845_v3  ;;  %v1332_v3 = vshrl.u32 %v1165_v54, 16 }
  0x43   : > { %933 = vmatpush.bf16.msrb.mxu0 %v2820_v4  ;;  %v1336_v4 = vrot.slane %v1334_v60, 1 }
  0x44   : > { %946 = vmatpush.bf16.msrb.mxu1 %v2828_v5  ;;  %v2889_v5 = vld [vmem:[%s3515_s4 + $0x338] sm:$0xff] }
  0x45   : > { %1105 = vmatpush.bf16.msrb.mxu2 %v2836_v8  ;;  %v2913_v8 = vld [vmem:[%s3515_s4 + $0x3f8] sm:$0xff] }
  0x46   : > { %1118 = vmatpush.bf16.msrb.mxu3 %v2844_v9  ;;  %v1330_v9 = vor.u32 %v1329_v2, %v1325_v1 }
  0x47   : > { %934 = vmatpush.bf16.msrb.mxu0 %v2819_v10  ;;  %v1337_v10 = vor.u32 %v1336_v4, %v1332_v3 }
  0x48   : > { %947 = vmatpush.bf16.msrb.mxu1 %v2827_v11  ;;  %v2888_v11 = vld [vmem:[%s3515_s4 + $0x330] sm:$0xff] }
  0x49   : > { %1106 = vmatpush.bf16.msrb.mxu2 %v2835_v14  ;;  %v2912_v14 = vld [vmem:[%s3515_s4 + $0x3f0] sm:$0xff] }
  0x4a   : > { %1119 = vmatpush.bf16.msrb.mxu3 %v2843_v15  ;;  %v2887_v15 = vld [vmem:[%s3515_s4 + $0x328] sm:$0xff] }
  0x4b   : > { %935 = vmatpush.bf16.msrb.mxu0 %v2818_v16  ;;  %v2895_v16 = vld [vmem:[%s3515_s4 + $0x368] sm:$0xff] }
  0x4c   : > { %948 = vmatpush.bf16.msrb.mxu1 %v2826_v17  ;;  %v2903_v17 = vld [vmem:[%s3515_s4 + $0x3a8] sm:$0xff] }
  0x4d   : > { %1107 = vmatpush.bf16.msrb.mxu2 %v2834_v22  ;;  %v2910_v22 = vld [vmem:[%s3515_s4 + $0x3e0] sm:$0xff] }
  0x4e   : > { %1120 = vmatpush.bf16.msrb.mxu3 %v2842_v23  ;;  %936 = vmatmul.bf16.vlgmr.msrb.gmra.mxu0 %v828_v6  ;;  %v2897_v6 = vld [vmem:[%s3515_s4 + $0x378] sm:$0xff]  ;;  %v1463_v23 = vld [vmem:[%s439_s19] sm:$0x77] }
  0x4f   : > { %1264 = vmatpush.bf16.msra.mxu0 %v2857_v24  ;;  %949 = vmatmul.bf16.vlgmr.msrb.gmra.mxu1 %v829_v7  ;;  %v2905_v7 = vld [vmem:[%s3515_s4 + $0x3b8] sm:$0xff] }
  0x50   : > { %1277 = vmatpush.bf16.msra.mxu1 %v2865_v25  ;;  %1108 = vmatmul.bf16.vlgmr.msrb.gmra.mxu2 %v994_v28  ;;  %v2885_v24 = vld [vmem:[%s3515_s4 + $0x318] sm:$0xff] }
  0x51   : > { %1436 = vmatpush.bf16.msra.mxu2 %v2873_v26  ;;  %1121 = vmatmul.bf16.vlgmr.msrb.gmra.mxu3 %v1001_v29  ;;  %v2893_v25 = vld [vmem:[%s3515_s4 + $0x358] sm:$0xff]  ;;  %v1498_v26 = vunpack.c.l.b16 %v1463_v23 }
  0x52   : > { %1449 = vmatpush.bf16.msra.mxu3 %v2881_v27  ;;  %v1499_v27 = vunpack.c.h.b16 %v1463_v23  ;;  %v2901_v28 = vld [vmem:[%s3515_s4 + $0x398] sm:$0xff] }
  0x53   : > { %1265 = vmatpush.bf16.msra.mxu0 %v2856_v30  ;;  %v2909_v29 = vld [vmem:[%s3515_s4 + $0x3d8] sm:$0xff]  ;;  %v2884_v30 = vld [vmem:[%s3515_s4 + $0x310] sm:$0xff] }
  0x54   : > { %1278 = vmatpush.bf16.msra.mxu1 %v2864_v31  ;;  %v2892_v31 = vld [vmem:[%s3515_s4 + $0x350] sm:$0xff] }
  0x55   : > { %1437 = vmatpush.bf16.msra.mxu2 %v2872_v32  ;;  %v1500_v32 = vpack.c.b16 %v1498_v26, %v1498_v26 }
  0x56   : > { %1450 = vmatpush.bf16.msra.mxu3 %v2880_v33  ;;  %v1501_v33 = vpack.c.b16 %v1499_v27, %v1499_v27 }
  0x57   : > { %1266 = vmatpush.bf16.msra.mxu0 %v2855_v34  ;;  %v2900_v34 = vld [vmem:[%s3515_s4 + $0x390] sm:$0xff] }
  0x58   : > { %1279 = vmatpush.bf16.msra.mxu1 %v2863_v35  ;;  %v2908_v35 = vld [vmem:[%s3515_s4 + $0x3d0] sm:$0xff] }
  0x59   : > { %1438 = vmatpush.bf16.msra.mxu2 %v2871_v36  ;;  %v2883_v36 = vld [vmem:[%s3515_s4 + $0x308] sm:$0xff] }
  0x5a   : > { %1451 = vmatpush.bf16.msra.mxu3 %v2879_v37  ;;  %v2891_v37 = vld [vmem:[%s3515_s4 + $0x348] sm:$0xff] }
  0x5b   : > { %1267 = vmatpush.bf16.msra.mxu0 %v2854_v38  ;;  %v1663_v38 = vshll.u32 %v1500_v32, 16 }
  0x5c   : > { %1280 = vmatpush.bf16.msra.mxu1 %v2862_v39  ;;  %v1670_v39 = vshll.u32 %v1501_v33, 16 }
  0x5d   : > { %1439 = vmatpush.bf16.msra.mxu2 %v2870_v40  ;;  %v2899_v40 = vld [vmem:[%s3515_s4 + $0x388] sm:$0xff] }
  0x5e   : > { %1452 = vmatpush.bf16.msra.mxu3 %v2878_v41  ;;  %v2907_v41 = vld [vmem:[%s3515_s4 + $0x3c8] sm:$0xff]  ;;  %v1672_v47 = vrot.slane %v1670_v39, 1 }
  0x5f   : > { %1268 = vmatpush.bf16.msra.mxu0 %v2853_v43  ;;  %v2890_v43 = vld [vmem:[%s3515_s4 + $0x340] sm:$0xff] }
  0x60   : > { %1281 = vmatpush.bf16.msra.mxu1 %v2861_v44  ;;  %v1661_v44 = vshrl.u32 %v1500_v32, 16 }
  0x61   : > { %1440 = vmatpush.bf16.msra.mxu2 %v2869_v45  ;;  %v1665_v45 = vrot.slane %v1663_v38, 1 }
  0x62   : > { %1453 = vmatpush.bf16.msra.mxu3 %v2877_v46  ;;  %v1668_v46 = vshrl.u32 %v1501_v33, 16 }
  0x63   : > { %1269 = vmatpush.bf16.msra.mxu0 %v2852_v49  ;;  %v2906_v49 = vld [vmem:[%s3515_s4 + $0x3c0] sm:$0xff] }
  0x64   : > { %1282 = vmatpush.bf16.msra.mxu1 %v2860_v50  ;;  %v1666_v50 = vor.u32 %v1665_v45, %v1661_v44 }
  0x65   : > { %1441 = vmatpush.bf16.msra.mxu2 %v2868_v51  ;;  %v1673_v51 = vor.u32 %v1672_v47, %v1668_v46 }
  0x66   : > { %1454 = vmatpush.bf16.msra.mxu3 %v2876_v52 }
  0x67   : > { %1270 = vmatpush.bf16.msra.mxu0 %v2851_v55 }
  0x68   : > { %1283 = vmatpush.bf16.msra.mxu1 %v2859_v56 }
  0x69   : > { %1442 = vmatpush.bf16.msra.mxu2 %v2867_v57 }
  0x6a   : > { %1455 = vmatpush.bf16.msra.mxu3 %v2875_v58 }
  0x6b   : > { %1271 = vmatpush.bf16.msra.mxu0 %v2850_v61 }
  0x6c   : > { %1284 = vmatpush.bf16.msra.mxu1 %v2858_v62 }
  0x6d   : > { %1443 = vmatpush.bf16.msra.mxu2 %v2866_v63 }
  0x6e   : > { %1456 = vmatpush.bf16.msra.mxu3 %v2874_v0  ;;  %1272 = vmatmul.bf16.vlgmr.msra.gmra.mxu0 %v1164_v53 }
  0x6f   : > { %1600 = vmatpush.bf16.msrb.mxu0 %v2889_v5  ;;  %1285 = vmatmul.bf16.vlgmr.msra.gmra.mxu1 %v1165_v54 }
  0x70   : > { %1613 = vmatpush.bf16.msrb.mxu1 %v2897_v6  ;;  %1444 = vmatmul.bf16.vlgmr.msra.gmra.mxu2 %v1330_v9 }
  0x71   : > { %1772 = vmatpush.bf16.msrb.mxu2 %v2905_v7  ;;  %1457 = vmatmul.bf16.vlgmr.msra.gmra.mxu3 %v1337_v10 }
  0x72   : > { %1785 = vmatpush.bf16.msrb.mxu3 %v2913_v8 }
  0x73   : > { %1601 = vmatpush.bf16.msrb.mxu0 %v2888_v11 }
  0x74   : > { %1614 = vmatpush.bf16.msrb.mxu1 %v2896_v12 }
  0x75   : > { %1773 = vmatpush.bf16.msrb.mxu2 %v2904_v13 }
  0x76   : > { %1786 = vmatpush.bf16.msrb.mxu3 %v2912_v14 }
  0x77   : > { %1602 = vmatpush.bf16.msrb.mxu0 %v2887_v15 }
  0x78   : > { %1615 = vmatpush.bf16.msrb.mxu1 %v2895_v16 }
  0x79   : > { %1774 = vmatpush.bf16.msrb.mxu2 %v2903_v17 }
  0x7a   : > { %1787 = vmatpush.bf16.msrb.mxu3 %v2911_v18 }
  0x7b   : > { %1603 = vmatpush.bf16.msrb.mxu0 %v2886_v19 }
  0x7c   : > { %1616 = vmatpush.bf16.msrb.mxu1 %v2894_v20 }
  0x7d   : > { %1775 = vmatpush.bf16.msrb.mxu2 %v2902_v21 }
  0x7e   : > { %1788 = vmatpush.bf16.msrb.mxu3 %v2910_v22 }
  0x7f   : > { %1604 = vmatpush.bf16.msrb.mxu0 %v2885_v24 }
  0x80   : > { %1617 = vmatpush.bf16.msrb.mxu1 %v2893_v25 }
  0x81   : > { %1776 = vmatpush.bf16.msrb.mxu2 %v2901_v28 }
  0x82   : > { %1789 = vmatpush.bf16.msrb.mxu3 %v2909_v29 }
  0x83   : > { %1605 = vmatpush.bf16.msrb.mxu0 %v2884_v30 }
  0x84   : > { %1618 = vmatpush.bf16.msrb.mxu1 %v2892_v31 }
  0x85   : > { %1777 = vmatpush.bf16.msrb.mxu2 %v2900_v34 }
  0x86   : > { %1790 = vmatpush.bf16.msrb.mxu3 %v2908_v35 }
  0x87   : > { %1606 = vmatpush.bf16.msrb.mxu0 %v2883_v36 }
  0x88   : > { %1619 = vmatpush.bf16.msrb.mxu1 %v2891_v37 }
  0x89   : > { %1778 = vmatpush.bf16.msrb.mxu2 %v2899_v40 }
  0x8a   : > { %1791 = vmatpush.bf16.msrb.mxu3 %v2907_v41 }
  0x8b   : > { %1607 = vmatpush.bf16.msrb.mxu0 %v2882_v42 }
  0x8c   : > { %1620 = vmatpush.bf16.msrb.mxu1 %v2890_v43 }
  0x8d   : > { %1779 = vmatpush.bf16.msrb.mxu2 %v2898_v48 }
  0x8e   : > { %1792 = vmatpush.bf16.msrb.mxu3 %v2906_v49  ;;  %1608 = vmatmul.bf16.vlgmr.msrb.gmra.mxu0 %v1500_v32 }
  0x8f   : > { %1621 = vmatmul.bf16.vlgmr.msrb.gmra.mxu1 %v1501_v33 }
  0x90   : > { %1780 = vmatmul.bf16.vlgmr.msrb.gmra.mxu2 %v1666_v50 }
  0x91   : > { %1793 = vmatmul.bf16.vlgmr.msrb.gmra.mxu3 %v1673_v51 }
  0xab   : > { %v650_v52 = vpop.f32.mrf.mxu0 }
  0xac   : > { %v663_v53 = vpop.f32.mrf.mxu1 }
  0xad   : > { %v664_v54 = vadd.f32 %v663_v53, %v650_v52 }
  0xb3   : > { %v774_v55 = vpop.f32.mrf.mxu2  ;;  %v652_v59 = vpop.f32.mrf.mxu0 }
  0xb4   : > { %v787_v56 = vpop.f32.mrf.mxu3  ;;  %v775_v57 = vadd.f32 %v774_v55, %v664_v54  ;;  %v665_v60 = vpop.f32.mrf.mxu1 }
  0xb6   : > { %v788_v58 = vadd.f32 %v787_v56, %v775_v57 }
  0xbb   : > { %v776_v61 = vpop.f32.mrf.mxu2 }
  0xbc   : > { %v789_v62 = vpop.f32.mrf.mxu3 }
  0xcb   : > { %v937_v63 = vpop.f32.mrf.mxu0 }
  0xcc   : > { %v950_v0 = vpop.f32.mrf.mxu1 }
  0xcd   : > { %v951_v15 = vadd.f32 %v950_v0, %v937_v63 }
  0xcf   : > { %v954_v16 = vadd.f32 %v951_v15, %v788_v58 }
  0xd3   : > { %v1109_v1 = vpop.f32.mrf.mxu2  ;;  %v939_v3 = vpop.f32.mrf.mxu0 }
  0xd4   : > { %v1122_v2 = vpop.f32.mrf.mxu3  ;;  %v952_v4 = vpop.f32.mrf.mxu1 }
  0xd5   : > { %v1123_v17 = vadd.f32 %v1122_v2, %v1109_v1 }
  0xd7   : > { %v1126_v21 = vadd.f32 %v1123_v17, %v954_v16 }
  0xdb   : > { %v1111_v5 = vpop.f32.mrf.mxu2 }
  0xdc   : > { %v1124_v6 = vpop.f32.mrf.mxu3 }
  0xeb   : > { %v1273_v7 = vpop.f32.mrf.mxu0 }
  0xec   : > { %v1286_v8 = vpop.f32.mrf.mxu1 }
  0xed   : > { %v1287_v18 = vadd.f32 %v1286_v8, %v1273_v7 }
  0xef   : > { %v1290_v23 = vadd.f32 %v1287_v18, %v1126_v21 }
  0xf3   : > { %v1445_v9 = vpop.f32.mrf.mxu2  ;;  %v1275_v11 = vpop.f32.mrf.mxu0 }
  0xf4   : > { %v1458_v10 = vpop.f32.mrf.mxu3  ;;  %v1288_v12 = vpop.f32.mrf.mxu1 }
  0xf5   : > { %v1459_v22 = vadd.f32 %v1458_v10, %v1445_v9 }
  0xf7   : > { %v1462_v25 = vadd.f32 %v1459_v22, %v1290_v23 }
  0xfb   : > { %v1447_v13 = vpop.f32.mrf.mxu2 }
  0xfc   : > { %v1460_v14 = vpop.f32.mrf.mxu3 }
 0x10b   : > { %v1609_v19 = vpop.f32.mrf.mxu0 }
 0x10c   : > { %v1622_v20 = vpop.f32.mrf.mxu1 }
 0x10d   : > { %v1623_v24 = vadd.f32 %v1622_v20, %v1609_v19 }
 0x10f   : > { %v1626_v28 = vadd.f32 %v1623_v24, %v1462_v25 }
 0x113   : > { %v1781_v26 = vpop.f32.mrf.mxu2  ;;  %v1611_v30 = vpop.f32.mrf.mxu0 }
 0x114   : > { %v1794_v27 = vpop.f32.mrf.mxu3  ;;  %v1624_v31 = vpop.f32.mrf.mxu1 }
 0x115   : > { %v1795_v29 = vadd.f32 %v1794_v27, %v1781_v26 }
 0x117   : > { %v1798_v32 = vadd.f32 %v1795_v29, %v1626_v28 }
 0x119   : > { %v1800_v33 = vsel %vm1799_vm0, %v1798_v32, 0.0  ;;  %v1807_v34 = vmul.f32 %v1798_v32, %v1798_v32  ;;  %v1818_v35 = vpack.c.bf16 %v1798_v32, %v1798_v32 }
 0x11a   : > { %v1801_v36 = vrot.slane %v1800_v33, 4 }
 0x11b   : > { %v1808_v37 = vsel %vm1799_vm0, %v1807_v34, 0.0  ;;  %1819 = vst [vmem:[%s449_s9] sm:$0x3] %v1818_v35  ;;  %v1783_v40 = vpop.f32.mrf.mxu2 }
 0x11c   : > { %v1802_v38 = vadd.f32 %v1801_v36, %v1800_v33  ;;  %v1809_v39 = vrot.slane %v1808_v37, 4  ;;  %v1796_v41 = vpop.f32.mrf.mxu3 }
 0x11e   : > { %v1803_v42 = vrot.slane %v1802_v38, 2  ;;  %v1810_v43 = vadd.f32 %v1809_v39, %v1808_v37 }
 0x120   : > { %v1804_v44 = vadd.f32 %v1803_v42, %v1802_v38  ;;  %v1811_v45 = vrot.slane %v1810_v43, 2 }
 0x122   : > { %v1805_v46 = vrot.slane %v1804_v44, 1  ;;  %v1812_v47 = vadd.f32 %v1811_v45, %v1810_v43 }
 0x124   : > { %v1813_v48 = vrot.slane %v1812_v47, 1  ;;  %v1806_v49 = vadd.f32 %v1805_v46, %v1804_v44 }
 0x126   : > { %v1814_v50 = vadd.f32 %v1813_v48, %v1812_v47 }
 0x128   : > { %v1816_v51 = vsel %vm1815_vm1, %v1806_v49, %v1814_v50 }
 0x129   : > { %1817 = vst [vmem:[%s457_s11] sm:$0x3] %v1816_v51 }
 0x12a PF: > { %s17_s25 = sadd.s32 1, %s2993_s25   ;;  %s3518_s21 = smov %s2985_s23 }
 0x12b   : > { %p14_p11 = scmp.ge.s32.totalorder %s17_s25, 10   ;;  %s3519_s22 = smov %s2989_s24 }
 0x12c   : > { %s3520_s23 = smov %s3523_s26  ;;  %s3521_s24 = smov %s3527_s27 }
 0x12d   :  { %16 = sbr.rel (!%p14_p11) target bundleno = 3 (0x3), region = 98 }

// kernel: _lambda_.10
= control target key start
LH: loop header
LB: loop body
LE: loop exit
PB: predicated region body
PF: predicated region fallthrough
CT: control target
= control target key end

     0   :  { %s422_s12 = smov 0   ;;  %s424_s13 = smov 0   ;;  %s479_s0 = inlined_call_operand.vmem [shape: bf16[2,3,3,128], index: 0, kind: input, shape index: {}]   ;;  %s480_s1 = inlined_call_operand.vmem [shape: f32[1,128], index: 1, kind: input, shape index: {}]   ;;  %s481_s2 = inlined_call_operand.vmem [shape: f32[1,128], index: 2, kind: input, shape index: {}]   ;;  %s482_s3 = inlined_call_operand.vmem [shape: bf16[2,3,3,128], index: 3, kind: output, shape index: {}]  }
   0x1   :  { %s426_s14 = smov 0   ;;  %s428_s15 = smov 0  }
   0x2   :  { %s430_s16 = smov 0  }
   0x3 LB: > { %s22_s17 = sadd.s32 1, %s392_s14  ;;  %s25_s18 = sadd.s32 1, %s396_s15  ;;  %s400_s16 = sphi %s430_s16, %s13_s16   ;;  %s396_s15 = sphi %s428_s15, %s486_s15   ;;  %s392_s14 = sphi %s426_s14, %s485_s14   ;;  %s388_s13 = sphi %s424_s13, %s484_s13   ;;  %s384_s12 = sphi %s422_s12, %s483_s12  }
   0x4   : > { %p23_p0 = scmp.ge.s32.totalorder %s22_s17, 3  ;;  %p314_p1 = scmp.ge.s32.totalorder %s400_s16, 1 }
   0x5   : > { %p156_p2 = scmp.lt.s32.totalorder %s400_s16, 7 }
   0x6   : > { %s488_s17 = smov (%p23_p0, %s22_s17), 0  ;;  %s490_s18 = smov (!%p23_p0, %s25_s18), %s396_s15 }
   0x7   : > { %p157_p3 = pnand %p314_p1, %p156_p2  ;;  %p27_p4 = scmp.ge.s32.totalorder %s490_s18, 2 }
   0x8   : > { %p186_p5 = scmp.lt.s32.totalorder (!%p157_p3), %s388_s13, 1  ;;  %p188_p6 = scmp.lt.s32.totalorder (!%p157_p3), %s384_s12, 2 }
   0x9   : > { %s492_s18 = smov (%p27_p4, %s490_s18), 0  ;;  %160 = sbr.rel (%p157_p3) target bundleno = 34 (0x22), region = 32 }
   0xe   : > { %s494_s13 = smov (!%p186_p5, %s388_s13), 1  ;;  %s496_s12 = smov (!%p188_p6, %s384_s12), 2  ;;  %v360_v0 = vld [vmem:[%s480_s1] ss:$0 sm:$0xff]  ;;  %vm218_vm0 = vcmask 1041408  }
   0xf   : > { %s319_s19 = smul.u32 3, %s494_s13  ;;  %v361_v3 = vld [vmem:[%s481_s2] ss:$0 sm:$0xff]  ;;  %vm219_vm1 = vsmask.f32 1280 }
  0x10   : > { %vm220_vm3 = vmand %vm218_vm0, %vm219_vm1 }
  0x11   : > { %s191_s20 = sadd.s32 %s319_s19, %s496_s12 }
  0x12   : > { %s315_s21 = sshll.u32 %s191_s20, 1 }
  0x13   : > { %s193_s24 = scalar_lea.vmem %s479_s0, %s315_s21  ;;  %s201_s4 = scalar_lea.vmem %s482_s3, %s315_s21 }
  0x14   : > { %v202_v1 = vld [vmem:[%s193_s24] sm:$0x3] }
  0x15   : > { %v203_v2 = vunpack.c.l.bf16 %v202_v1  ;;  %v221_v8 = vld [vmem:[%s201_s4] sm:$0x3] }
  0x17   : > { %v208_v4 = vmul.f32 %v360_v0, %v203_v2 }
  0x19   : > { %v213_v5 = vadd.f32 %v361_v3, %v208_v4 }
  0x1b   : > { %vm214_vm2 = vcmp.gt.f32.partialorder %v213_v5, 0.0  ;;  %v215_v6 = vmul.f32 0.2, %v213_v5 }
  0x1d   : > { %v216_v7 = vsel %vm214_vm2, %v213_v5, %v215_v6 }
  0x1e   : > { %v217_v9 = vpack.c.bf16 %v216_v7, %v216_v7 }
  0x20   : > { %v222_v10 = vsel %vm220_vm3, %v217_v9, %v221_v8 }
  0x21   : > { %223 = vst [vmem:[%s201_s4] sm:$0x3] %v222_v10 }
  0x22 PF: > { %s13_s16 = sadd.s32 1, %s400_s16   ;;  %s483_s12 = smov %s392_s14 }
  0x23   : > { %p10_p7 = scmp.ge.s32.totalorder %s13_s16, 8   ;;  %s484_s13 = smov %s396_s15 }
  0x24   : > { %s485_s14 = smov %s488_s17  ;;  %s486_s15 = smov %s492_s18 }
  0x25   :  { %12 = sbr.rel (!%p10_p7) target bundleno = 3 (0x3), region = 62 }

// kernel: _lambda_.9
= control target key start
LH: loop header
LB: loop body
LE: loop exit
PB: predicated region body
PF: predicated region fallthrough
CT: control target
= control target key end

     0   :  { %s2974_s21 = smov 0   ;;  %s2976_s22 = smov 0   ;;  %s3463_s0 = inlined_call_operand.vmem [shape: bf16[2,6,6,128], index: 0, kind: input, shape index: {}, may-alias: {0,1,2,3}]   ;;  %s3464_s1 = inlined_call_operand.vmem [shape: bf16[2,6,6,128], index: 1, kind: input, shape index: {}, may-alias: {0,1,2,3}]   ;;  %s3465_s2 = inlined_call_operand.vmem [shape: bf16[2,6,6,128], index: 2, kind: input, shape index: {}, may-alias: {0,1,2,3}]   ;;  %s3466_s3 = inlined_call_operand.vmem [shape: bf16[2,6,6,128], index: 3, kind: input, shape index: {}, may-alias: {0,1,2,3}]   ;;  %s3467_s4 = inlined_call_operand.vmem [shape: bf16[4,4,128,128], index: 4, kind: input, shape index: {}]   ;;  %s3468_s5 = inlined_call_operand.vmem [shape: bf16[2,3,3,128], index: 5, kind: output, shape index: {0}]   ;;  %s3469_s6 = inlined_call_operand.vmem [shape: f32[2,3,2,128], index: 6, kind: output, shape index: {1}]  }
   0x1   :  { %s2978_s23 = smov 0   ;;  %s2980_s24 = smov 0  }
   0x2   :  { %s2982_s25 = smov 0  }
   0x3 LB: > { %s26_s26 = sadd.s32 1, %s2929_s23  ;;  %s29_s27 = sadd.s32 1, %s2933_s24  ;;  %s2937_s25 = sphi %s2982_s25, %s17_s25   ;;  %s2933_s24 = sphi %s2980_s24, %s3475_s24   ;;  %s2929_s23 = sphi %s2978_s23, %s3474_s23   ;;  %s2925_s22 = sphi %s2976_s22, %s3473_s22   ;;  %s2921_s21 = sphi %s2974_s21, %s3472_s21  }
   0x4   : > { %p27_p0 = scmp.ge.s32.totalorder %s26_s26, 3  ;;  %p1968_p1 = scmp.ge.s32.totalorder %s2937_s25, 1 }
   0x5   : > { %p293_p2 = scmp.lt.s32.totalorder %s2937_s25, 7 }
   0x6   : > { %s3477_s26 = smov (%p27_p0, %s26_s26), 0  ;;  %s3479_s27 = smov (!%p27_p0, %s29_s27), %s2933_s24 }
   0x7   : > { %p294_p3 = pnand %p1968_p1, %p293_p2  ;;  %p31_p4 = scmp.ge.s32.totalorder %s3479_s27, 2 }
   0x8   : > { %p364_p5 = scmp.lt.s32.totalorder (!%p294_p3), %s2925_s22, 1  ;;  %p366_p6 = scmp.lt.s32.totalorder (!%p294_p3), %s2921_s21, 5 }
   0x9   : > { %s3481_s27 = smov (%p31_p4, %s3479_s27), 0  ;;  %297 = sbr.rel (%p294_p3) target bundleno = 297 (0x129), region = 40 }
   0xa   : > { %s372_s15 = sadd.s32 (!%p294_p3), 1, %s2921_s21  ;;  %s382_s7 = sadd.s32 (!%p294_p3), 2, %s2921_s21 }
   0xb   : > { %p3102_p7 = scmp.lt.s32.totalorder (!%p294_p3), %s372_s15, 5  ;;  %p3212_p8 = scmp.lt.s32.totalorder (!%p294_p3), %s382_s7, 5 }
   0xc   : > { %p404_p10 = scmp.lt.s32.totalorder (!%p294_p3), %s2921_s21, 2 }
   0xe   : > { %v2744_v0 = vld [vmem:[%s3467_s4 + $0x78] sm:$0xff]  ;;  %v2743_v4 = vld [vmem:[%s3467_s4 + $0x70] sm:$0xff]  ;;  %s3483_s22 = smov (!%p364_p5, %s2925_s22), 1  ;;  %v2742_v8 = vld [vmem:[%s3467_s4 + $0x68] sm:$0xff]  ;;  %s3485_s15 = smov (!%p3102_p7, %s372_s15), 5  ;;  %vm1771_vm0 = vcmask 1041408  }
   0xf   : > { %v2736_v1 = vld [vmem:[%s3467_s4 + $0x38] sm:$0xff]  ;;  %511 = vmatpush.bf16.msra.mxu0 %v2744_v0  ;;  %v2735_v5 = vld [vmem:[%s3467_s4 + $0x30] sm:$0xff]  ;;  %s367_s20 = scalar_select %p366_p6, %s2921_s21, 5  ;;  %v2734_v9 = vld [vmem:[%s3467_s4 + $0x28] sm:$0xff]  ;;  %vm1772_vm1 = vsmask.f32 1280 }
  0x10   : > { %v2752_v2 = vld [vmem:[%s3467_s4 + $0xb8] sm:$0xff]  ;;  %572 = vmatpush.bf16.msra.mxu1 %v2736_v1  ;;  %v2751_v6 = vld [vmem:[%s3467_s4 + $0xb0] sm:$0xff]  ;;  %s3035_s28 = smul.u32 6, %s3483_s22  ;;  %v2750_v10 = vld [vmem:[%s3467_s4 + $0xa8] sm:$0xff]  ;;  %s3487_s7 = smov (!%p3212_p8, %s382_s7), 5  ;;  %vm1751_vm2 = vcmask 1042432  }
  0x11   : > { %v2760_v3 = vld [vmem:[%s3467_s4 + $0xf8] sm:$0xff]  ;;  %652 = vmatpush.bf16.msra.mxu2 %v2752_v2  ;;  %v2759_v7 = vld [vmem:[%s3467_s4 + $0xf0] sm:$0xff]  ;;  %v2758_v11 = vld [vmem:[%s3467_s4 + $0xe8] sm:$0xff]  ;;  %vm1767_vm4 = vcmask 1040384  }
  0x12   : > { %735 = vmatpush.bf16.msra.mxu3 %v2760_v3  ;;  %s369_s13 = sadd.s32 %s3035_s28, %s367_s20  ;;  %v2741_v12 = vld [vmem:[%s3467_s4 + $0x60] sm:$0xff]  ;;  %v2740_v16 = vld [vmem:[%s3467_s4 + $0x58] sm:$0xff]  ;;  %v2739_v21 = vld [vmem:[%s3467_s4 + $0x50] sm:$0xff] }
  0x13   : > { %512 = vmatpush.bf16.msra.mxu0 %v2743_v4  ;;  %v2733_v13 = vld [vmem:[%s3467_s4 + $0x20] sm:$0xff]  ;;  %s1969_s20 = sshll.u32 %s369_s13, 2  ;;  %v2732_v17 = vld [vmem:[%s3467_s4 + $0x18] sm:$0xff]  ;;  %v2731_v22 = vld [vmem:[%s3467_s4 + $0x10] sm:$0xff]  ;;  %s2858_s13 = smul.u32 3, %s3483_s22 }
  0x14   : > { %573 = vmatpush.bf16.msra.mxu1 %v2735_v5  ;;  %v2749_v14 = vld [vmem:[%s3467_s4 + $0xa0] sm:$0xff]  ;;  %s371_s14 = scalar_lea.vmem %s3463_s0, %s1969_s20  ;;  %v2748_v18 = vld [vmem:[%s3467_s4 + $0x98] sm:$0xff]  ;;  %v2747_v24 = vld [vmem:[%s3467_s4 + $0x90] sm:$0xff] }
  0x15   : > { %653 = vmatpush.bf16.msra.mxu2 %v2751_v6  ;;  %v2757_v15 = vld [vmem:[%s3467_s4 + $0xe0] sm:$0xff]  ;;  %v2756_v19 = vld [vmem:[%s3467_s4 + $0xd8] sm:$0xff]  ;;  %v2755_v25 = vld [vmem:[%s3467_s4 + $0xd0] sm:$0xff] }
  0x16   : > { %736 = vmatpush.bf16.msra.mxu3 %v2759_v7  ;;  %v418_v20 = vld [vmem:[%s371_s14] sm:$0x7]  ;;  %v2738_v27 = vld [vmem:[%s3467_s4 + $0x48] sm:$0xff]  ;;  %v2768_v40 = vld [vmem:[%s3467_s4 + $0x138] sm:$0xff]  ;;  %s378_s14 = sadd.s32 %s3035_s28, %s3485_s15  ;;  %s388_s15 = sadd.s32 %s3035_s28, %s3487_s7 }
  0x17   : > { %513 = vmatpush.bf16.msra.mxu0 %v2742_v8  ;;  %v453_v23 = vunpack.c.l.b16 %v418_v20  ;;  %v2730_v28 = vld [vmem:[%s3467_s4 + $0x8] sm:$0xff]  ;;  %v2737_v33 = vld [vmem:[%s3467_s4 + $0x40] sm:$0xff]  ;;  %v2776_v41 = vld [vmem:[%s3467_s4 + $0x178] sm:$0xff]  ;;  %s1970_s29 = sshll.u32 %s378_s14, 2  ;;  %s1971_s12 = sshll.u32 %s388_s15, 2 }
  0x18   : > { %574 = vmatpush.bf16.msra.mxu1 %v2734_v9  ;;  %v2746_v30 = vld [vmem:[%s3467_s4 + $0x88] sm:$0xff]  ;;  %v2729_v34 = vld [vmem:[%s3467_s4] sm:$0xff]  ;;  %v2784_v42 = vld [vmem:[%s3467_s4 + $0x1b8] sm:$0xff]  ;;  %s380_s19 = scalar_lea.vmem %s3464_s1, %s1970_s29  ;;  %s390_s11 = scalar_lea.vmem %s3465_s2, %s1971_s12 }
  0x19   : > { %654 = vmatpush.bf16.msra.mxu2 %v2750_v10  ;;  %v454_v26 = vpack.c.b16 %v453_v23, %v453_v23  ;;  %v2754_v31 = vld [vmem:[%s3467_s4 + $0xc8] sm:$0xff]  ;;  %v2745_v36 = vld [vmem:[%s3467_s4 + $0x80] sm:$0xff]  ;;  %v2792_v43 = vld [vmem:[%s3467_s4 + $0x1f8] sm:$0xff]  ;;  %s392_s12 = sadd.s32 3, %s2921_s21  ;;  %s3491_s21 = smov (!%p404_p10, %s2921_s21), 2 }
  0x1a   : > { %737 = vmatpush.bf16.msra.mxu3 %v2758_v11  ;;  %v2753_v37 = vld [vmem:[%s3467_s4 + $0xc0] sm:$0xff]  ;;  %v2767_v47 = vld [vmem:[%s3467_s4 + $0x130] sm:$0xff]  ;;  %v2766_v51 = vld [vmem:[%s3467_s4 + $0x128] sm:$0xff]  ;;  %p395_p9 = scmp.lt.s32.totalorder %s392_s12, 5  ;;  %s3435_s17 = sadd.s32 %s2858_s13, %s3491_s21 }
  0x1b   : > { %514 = vmatpush.bf16.msra.mxu0 %v2741_v12  ;;  %v458_v29 = vshll.u32 %v454_v26, 16  ;;  %v456_v32 = vshrl.u32 %v454_v26, 16  ;;  %v602_v44 = vrot.slane %v454_v26, 1  ;;  %v2775_v48 = vld [vmem:[%s3467_s4 + $0x170] sm:$0xff]  ;;  %v2774_v52 = vld [vmem:[%s3467_s4 + $0x168] sm:$0xff]  ;;  %v2765_v55 = vld [vmem:[%s3467_s4 + $0x120] sm:$0xff] }
  0x1c   : > { %575 = vmatpush.bf16.msra.mxu1 %v2733_v13  ;;  %v2783_v49 = vld [vmem:[%s3467_s4 + $0x1b0] sm:$0xff]  ;;  %v2782_v53 = vld [vmem:[%s3467_s4 + $0x1a8] sm:$0xff]  ;;  %v2773_v56 = vld [vmem:[%s3467_s4 + $0x160] sm:$0xff]  ;;  %s3489_s12 = smov (!%p395_p9, %s392_s12), 5 }
  0x1d   : > { %655 = vmatpush.bf16.msra.mxu2 %v2749_v14  ;;  %v460_v35 = vrot.slane %v458_v29, 1  ;;  %v683_v38 = vrot.slane %v456_v32, 1  ;;  %v684_v39 = vrot.slane %v458_v29, 2  ;;  %v2791_v50 = vld [vmem:[%s3467_s4 + $0x1f0] sm:$0xff]  ;;  %v2790_v54 = vld [vmem:[%s3467_s4 + $0x1e8] sm:$0xff]  ;;  %v2781_v57 = vld [vmem:[%s3467_s4 + $0x1a0] sm:$0xff]  ;;  %s398_s20 = sadd.s32 %s3035_s28, %s3489_s12 }
  0x1e   : > { %738 = vmatpush.bf16.msra.mxu3 %v2757_v15  ;;  %v2789_v58 = vld [vmem:[%s3467_s4 + $0x1e0] sm:$0xff]  ;;  %v2764_v60 = vld [vmem:[%s3467_s4 + $0x118] sm:$0xff]  ;;  %v2763_v1 = vld [vmem:[%s3467_s4 + $0x110] sm:$0xff]  ;;  %s1972_s28 = sshll.u32 %s398_s20, 2 }
  0x1f   : > { %515 = vmatpush.bf16.msra.mxu0 %v2740_v16  ;;  %v461_v45 = vor.u32 %v460_v35, %v456_v32  ;;  %v685_v46 = vor.u32 %v684_v39, %v683_v38  ;;  %v3172_v59 = vld [vmem:[%s380_s19] sm:$0x7]  ;;  %v2772_v61 = vld [vmem:[%s3467_s4 + $0x158] sm:$0xff]  ;;  %v2771_v2 = vld [vmem:[%s3467_s4 + $0x150] sm:$0xff]  ;;  %s400_s9 = scalar_lea.vmem %s3466_s3, %s1972_s28  ;;  %s1973_s28 = sshll.u32 %s3435_s17, 1 }
  0x20   : > { %576 = vmatpush.bf16.msra.mxu1 %v2732_v17  ;;  %v2780_v62 = vld [vmem:[%s3467_s4 + $0x198] sm:$0xff]  ;;  %v847_v0 = vunpack.c.l.b16 %v3172_v59  ;;  %v2779_v3 = vld [vmem:[%s3467_s4 + $0x190] sm:$0xff]  ;;  %v2762_v6 = vld [vmem:[%s3467_s4 + $0x108] sm:$0xff]  ;;  %s417_s30 = scalar_lea.vmem %s3469_s6, %s1973_s28 }
  0x21   : > { %656 = vmatpush.bf16.msra.mxu2 %v2748_v18  ;;  %v2788_v63 = vld [vmem:[%s3467_s4 + $0x1d8] sm:$0xff]  ;;  %v2787_v4 = vld [vmem:[%s3467_s4 + $0x1d0] sm:$0xff]  ;;  %v2770_v7 = vld [vmem:[%s3467_s4 + $0x148] sm:$0xff] }
  0x22   : > { %739 = vmatpush.bf16.msra.mxu3 %v2756_v19  ;;  %v848_v5 = vpack.c.b16 %v847_v0, %v847_v0  ;;  %v2778_v8 = vld [vmem:[%s3467_s4 + $0x188] sm:$0xff]  ;;  %v2761_v12 = vld [vmem:[%s3467_s4 + $0x100] sm:$0xff]  ;;  %v2800_v19 = vld [vmem:[%s3467_s4 + $0x238] sm:$0xff] }
  0x23   : > { %516 = vmatpush.bf16.msra.mxu0 %v2739_v21  ;;  %v2786_v9 = vld [vmem:[%s3467_s4 + $0x1c8] sm:$0xff]  ;;  %v2769_v13 = vld [vmem:[%s3467_s4 + $0x140] sm:$0xff]  ;;  %v2816_v21 = vld [vmem:[%s3467_s4 + $0x2b8] sm:$0xff] }
  0x24   : > { %577 = vmatpush.bf16.msra.mxu1 %v2731_v22  ;;  %v850_v10 = vshrl.u32 %v848_v5, 16  ;;  %v852_v11 = vshll.u32 %v848_v5, 16  ;;  %v2777_v14 = vld [vmem:[%s3467_s4 + $0x180] sm:$0xff]  ;;  %v2824_v22 = vld [vmem:[%s3467_s4 + $0x2f8] sm:$0xff]  ;;  %v936_v23 = vrot.slane %v848_v5, 1  ;;  %v2799_v26 = vld [vmem:[%s3467_s4 + $0x230] sm:$0xff] }
  0x25   : > { %657 = vmatpush.bf16.msra.mxu2 %v2747_v24  ;;  %v2785_v15 = vld [vmem:[%s3467_s4 + $0x1c0] sm:$0xff]  ;;  %v2823_v29 = vld [vmem:[%s3467_s4 + $0x2f0] sm:$0xff]  ;;  %v2814_v32 = vld [vmem:[%s3467_s4 + $0x2a8] sm:$0xff] }
  0x26   : > { %740 = vmatpush.bf16.msra.mxu3 %v2755_v25  ;;  %v1017_v16 = vrot.slane %v850_v10, 1  ;;  %v1018_v17 = vrot.slane %v852_v11, 2  ;;  %v854_v18 = vrot.slane %v852_v11, 1  ;;  %v2805_v35 = vld [vmem:[%s3467_s4 + $0x260] sm:$0xff]  ;;  %v2796_v39 = vld [vmem:[%s3467_s4 + $0x218] sm:$0xff]  ;;  %v2831_v5 = vld [vmem:[%s3467_s4 + $0x330] sm:$0xff] }
  0x27   : > { %517 = vmatpush.bf16.msra.mxu0 %v2738_v27  ;;  %v2807_v27 = vld [vmem:[%s3467_s4 + $0x270] sm:$0xff]  ;;  %v1083_v38 = vld [vmem:[%s390_s11] sm:$0x7]  ;;  %v2848_v0 = vld [vmem:[%s3467_s4 + $0x3b8] sm:$0xff]  ;;  %s409_s11 = scalar_lea.vmem %s3468_s5, %s1973_s28 }
  0x28   : > { %578 = vmatpush.bf16.msra.mxu1 %v2730_v28  ;;  %v1019_v24 = vor.u32 %v1018_v17, %v1017_v16  ;;  %v855_v25 = vor.u32 %v854_v18, %v850_v10  ;;  %v2815_v28 = vld [vmem:[%s3467_s4 + $0x2b0] sm:$0xff]  ;;  %v2838_v10 = vld [vmem:[%s3467_s4 + $0x368] sm:$0xff]  ;;  %v2845_v16 = vld [vmem:[%s3467_s4 + $0x3a0] sm:$0xff] }
  0x29   : > { %658 = vmatpush.bf16.msra.mxu2 %v2746_v30  ;;  %v2798_v30 = vld [vmem:[%s3467_s4 + $0x228] sm:$0xff]  ;;  %v2853_v17 = vld [vmem:[%s3467_s4 + $0x3e0] sm:$0xff]  ;;  %vm1773_vm3 = vmand %vm1771_vm0, %vm1772_vm1 }
  0x2a   : > { %741 = vmatpush.bf16.msra.mxu3 %v2754_v31  ;;  %v2806_v31 = vld [vmem:[%s3467_s4 + $0x268] sm:$0xff] }
  0x2b   : > { %518 = vmatpush.bf16.msra.mxu0 %v2737_v33  ;;  %v2822_v33 = vld [vmem:[%s3467_s4 + $0x2e8] sm:$0xff] }
  0x2c   : > { %579 = vmatpush.bf16.msra.mxu1 %v2729_v34  ;;  %v2797_v34 = vld [vmem:[%s3467_s4 + $0x220] sm:$0xff]  ;;  %v2846_v11 = vld [vmem:[%s3467_s4 + $0x3a8] sm:$0xff] }
  0x2d   : > { %659 = vmatpush.bf16.msra.mxu2 %v2745_v36  ;;  %v2813_v36 = vld [vmem:[%s3467_s4 + $0x2a0] sm:$0xff] }
  0x2e   : > { %742 = vmatpush.bf16.msra.mxu3 %v2753_v37  ;;  %519 = vmatmul.bf16.vlgmr.msra.gmra.mxu0 %v461_v45  ;;  %v2821_v37 = vld [vmem:[%s3467_s4 + $0x2e0] sm:$0xff]  ;;  %v2803_v45 = vld [vmem:[%s3467_s4 + $0x250] sm:$0xff] }
  0x2f   : > { %815 = vmatpush.bf16.msrb.mxu0 %v2768_v40  ;;  %580 = vmatmul.bf16.vlgmr.msra.gmra.mxu1 %v418_v20  ;;  %v2808_v20 = vld [vmem:[%s3467_s4 + $0x278] sm:$0xff] }
  0x30   : > { %905 = vmatpush.bf16.msrb.mxu1 %v2776_v41  ;;  %660 = vmatmul.bf16.vlgmr.msra.gmra.mxu2 %v602_v44  ;;  %v2804_v40 = vld [vmem:[%s3467_s4 + $0x258] sm:$0xff]  ;;  %v2795_v44 = vld [vmem:[%s3467_s4 + $0x210] sm:$0xff] }
  0x31   : > { %986 = vmatpush.bf16.msrb.mxu2 %v2784_v42  ;;  %743 = vmatmul.bf16.vlgmr.msra.gmra.mxu3 %v685_v46  ;;  %v2812_v41 = vld [vmem:[%s3467_s4 + $0x298] sm:$0xff]  ;;  %v2811_v46 = vld [vmem:[%s3467_s4 + $0x290] sm:$0xff] }
  0x32   : > { %1069 = vmatpush.bf16.msrb.mxu3 %v2792_v43  ;;  %v2820_v42 = vld [vmem:[%s3467_s4 + $0x2d8] sm:$0xff]  ;;  %v1181_v43 = vunpack.c.l.b16 %v1083_v38 }
  0x33   : > { %816 = vmatpush.bf16.msrb.mxu0 %v2767_v47  ;;  %v2819_v47 = vld [vmem:[%s3467_s4 + $0x2d0] sm:$0xff] }
  0x34   : > { %906 = vmatpush.bf16.msrb.mxu1 %v2775_v48  ;;  %v1182_v48 = vpack.c.b16 %v1181_v43, %v1181_v43 }
  0x35   : > { %987 = vmatpush.bf16.msrb.mxu2 %v2783_v49  ;;  %v2794_v49 = vld [vmem:[%s3467_s4 + $0x208] sm:$0xff] }
  0x36   : > { %1070 = vmatpush.bf16.msrb.mxu3 %v2791_v50  ;;  %v2802_v50 = vld [vmem:[%s3467_s4 + $0x248] sm:$0xff] }
  0x37   : > { %817 = vmatpush.bf16.msrb.mxu0 %v2766_v51  ;;  %v2810_v51 = vld [vmem:[%s3467_s4 + $0x288] sm:$0xff] }
  0x38   : > { %907 = vmatpush.bf16.msrb.mxu1 %v2774_v52  ;;  %v2818_v52 = vld [vmem:[%s3467_s4 + $0x2c8] sm:$0xff] }
  0x39   : > { %988 = vmatpush.bf16.msrb.mxu2 %v2782_v53  ;;  %v1186_v53 = vshll.u32 %v1182_v48, 16 }
  0x3a   : > { %1071 = vmatpush.bf16.msrb.mxu3 %v2790_v54  ;;  %v1184_v54 = vshrl.u32 %v1182_v48, 16 }
  0x3b   : > { %818 = vmatpush.bf16.msrb.mxu0 %v2765_v55  ;;  %v2793_v55 = vld [vmem:[%s3467_s4 + $0x200] sm:$0xff] }
  0x3c   : > { %908 = vmatpush.bf16.msrb.mxu1 %v2773_v56  ;;  %v2801_v56 = vld [vmem:[%s3467_s4 + $0x240] sm:$0xff] }
  0x3d   : > { %989 = vmatpush.bf16.msrb.mxu2 %v2781_v57  ;;  %v2809_v57 = vld [vmem:[%s3467_s4 + $0x280] sm:$0xff] }
  0x3e   : > { %1072 = vmatpush.bf16.msrb.mxu3 %v2789_v58  ;;  %v2817_v58 = vld [vmem:[%s3467_s4 + $0x2c0] sm:$0xff] }
  0x3f   : > { %819 = vmatpush.bf16.msrb.mxu0 %v2764_v60  ;;  %v1351_v60 = vrot.slane %v1184_v54, 1 }
  0x40   : > { %909 = vmatpush.bf16.msrb.mxu1 %v2772_v61  ;;  %v1352_v61 = vrot.slane %v1186_v53, 2 }
  0x41   : > { %990 = vmatpush.bf16.msrb.mxu2 %v2780_v62  ;;  %v2832_v62 = vld [vmem:[%s3467_s4 + $0x338] sm:$0xff] }
  0x42   : > { %1073 = vmatpush.bf16.msrb.mxu3 %v2788_v63  ;;  %v2840_v63 = vld [vmem:[%s3467_s4 + $0x378] sm:$0xff] }
  0x43   : > { %820 = vmatpush.bf16.msrb.mxu0 %v2763_v1  ;;  %v2856_v1 = vld [vmem:[%s3467_s4 + $0x3f8] sm:$0xff] }
  0x44   : > { %910 = vmatpush.bf16.msrb.mxu1 %v2771_v2  ;;  %v1270_v2 = vrot.slane %v1182_v48, 1 }
  0x45   : > { %991 = vmatpush.bf16.msrb.mxu2 %v2779_v3 }
  0x46   : > { %1074 = vmatpush.bf16.msrb.mxu3 %v2787_v4  ;;  %v1353_v4 = vor.u32 %v1352_v61, %v1351_v60 }
  0x47   : > { %821 = vmatpush.bf16.msrb.mxu0 %v2762_v6  ;;  %v2839_v6 = vld [vmem:[%s3467_s4 + $0x370] sm:$0xff] }
  0x48   : > { %911 = vmatpush.bf16.msrb.mxu1 %v2770_v7  ;;  %v2847_v7 = vld [vmem:[%s3467_s4 + $0x3b0] sm:$0xff] }
  0x49   : > { %992 = vmatpush.bf16.msrb.mxu2 %v2778_v8  ;;  %v2855_v8 = vld [vmem:[%s3467_s4 + $0x3f0] sm:$0xff] }
  0x4a   : > { %1075 = vmatpush.bf16.msrb.mxu3 %v2786_v9  ;;  %v2830_v9 = vld [vmem:[%s3467_s4 + $0x328] sm:$0xff] }
  0x4b   : > { %822 = vmatpush.bf16.msrb.mxu0 %v2761_v12  ;;  %v2854_v12 = vld [vmem:[%s3467_s4 + $0x3e8] sm:$0xff] }
  0x4c   : > { %912 = vmatpush.bf16.msrb.mxu1 %v2769_v13  ;;  %v2829_v13 = vld [vmem:[%s3467_s4 + $0x320] sm:$0xff] }
  0x4d   : > { %993 = vmatpush.bf16.msrb.mxu2 %v2777_v14  ;;  %v2837_v14 = vld [vmem:[%s3467_s4 + $0x360] sm:$0xff] }
  0x4e   : > { %1076 = vmatpush.bf16.msrb.mxu3 %v2785_v15  ;;  %823 = vmatmul.bf16.vlgmr.msrb.gmra.mxu0 %v3172_v59  ;;  %v1188_v59 = vrot.slane %v1186_v53, 1  ;;  %v1417_v15 = vld [vmem:[%s400_s9] sm:$0x7] }
  0x4f   : > { %1149 = vmatpush.bf16.msra.mxu0 %v2800_v19  ;;  %913 = vmatmul.bf16.vlgmr.msrb.gmra.mxu1 %v855_v25  ;;  %v1515_v18 = vunpack.c.l.b16 %v1417_v15  ;;  %v2828_v19 = vld [vmem:[%s3467_s4 + $0x318] sm:$0xff]  ;;  %v2835_v25 = vld [vmem:[%s3467_s4 + $0x350] sm:$0xff] }
  0x50   : > { %1239 = vmatpush.bf16.msra.mxu1 %v2808_v20  ;;  %994 = vmatmul.bf16.vlgmr.msrb.gmra.mxu2 %v936_v23  ;;  %v1189_v3 = vor.u32 %v1188_v59, %v1184_v54  ;;  %v2836_v20 = vld [vmem:[%s3467_s4 + $0x358] sm:$0xff] }
  0x51   : > { %1320 = vmatpush.bf16.msra.mxu2 %v2816_v21  ;;  %1077 = vmatmul.bf16.vlgmr.msrb.gmra.mxu3 %v1019_v24  ;;  %v2844_v21 = vld [vmem:[%s3467_s4 + $0x398] sm:$0xff]  ;;  %v1516_v23 = vpack.c.b16 %v1515_v18, %v1515_v18  ;;  %v2827_v24 = vld [vmem:[%s3467_s4 + $0x310] sm:$0xff] }
  0x52   : > { %1403 = vmatpush.bf16.msra.mxu3 %v2824_v22  ;;  %v2852_v22 = vld [vmem:[%s3467_s4 + $0x3d8] sm:$0xff] }
  0x53   : > { %1150 = vmatpush.bf16.msra.mxu0 %v2799_v26  ;;  %v2843_v26 = vld [vmem:[%s3467_s4 + $0x390] sm:$0xff] }
  0x54   : > { %1240 = vmatpush.bf16.msra.mxu1 %v2807_v27  ;;  %v2851_v27 = vld [vmem:[%s3467_s4 + $0x3d0] sm:$0xff] }
  0x55   : > { %1321 = vmatpush.bf16.msra.mxu2 %v2815_v28  ;;  %v1520_v28 = vshll.u32 %v1516_v23, 16 }
  0x56   : > { %1404 = vmatpush.bf16.msra.mxu3 %v2823_v29  ;;  %v2826_v29 = vld [vmem:[%s3467_s4 + $0x308] sm:$0xff] }
  0x57   : > { %1151 = vmatpush.bf16.msra.mxu0 %v2798_v30  ;;  %v2834_v30 = vld [vmem:[%s3467_s4 + $0x348] sm:$0xff] }
  0x58   : > { %1241 = vmatpush.bf16.msra.mxu1 %v2806_v31  ;;  %v1518_v31 = vshrl.u32 %v1516_v23, 16 }
  0x59   : > { %1322 = vmatpush.bf16.msra.mxu2 %v2814_v32  ;;  %v2842_v32 = vld [vmem:[%s3467_s4 + $0x388] sm:$0xff] }
  0x5a   : > { %1405 = vmatpush.bf16.msra.mxu3 %v2822_v33  ;;  %v2850_v33 = vld [vmem:[%s3467_s4 + $0x3c8] sm:$0xff] }
  0x5b   : > { %1152 = vmatpush.bf16.msra.mxu0 %v2797_v34  ;;  %v1522_v34 = vrot.slane %v1520_v28, 1 }
  0x5c   : > { %1242 = vmatpush.bf16.msra.mxu1 %v2805_v35  ;;  %v2825_v35 = vld [vmem:[%s3467_s4 + $0x300] sm:$0xff] }
  0x5d   : > { %1323 = vmatpush.bf16.msra.mxu2 %v2813_v36  ;;  %v2833_v36 = vld [vmem:[%s3467_s4 + $0x340] sm:$0xff] }
  0x5e   : > { %1406 = vmatpush.bf16.msra.mxu3 %v2821_v37  ;;  %v1685_v37 = vrot.slane %v1518_v31, 1 }
  0x5f   : > { %1153 = vmatpush.bf16.msra.mxu0 %v2796_v39  ;;  %v2841_v39 = vld [vmem:[%s3467_s4 + $0x380] sm:$0xff] }
  0x60   : > { %1243 = vmatpush.bf16.msra.mxu1 %v2804_v40  ;;  %v2849_v40 = vld [vmem:[%s3467_s4 + $0x3c0] sm:$0xff] }
  0x61   : > { %1324 = vmatpush.bf16.msra.mxu2 %v2812_v41  ;;  %v1523_v41 = vor.u32 %v1522_v34, %v1518_v31 }
  0x62   : > { %1407 = vmatpush.bf16.msra.mxu3 %v2820_v42  ;;  %v1604_v42 = vrot.slane %v1516_v23, 1 }
  0x63   : > { %1154 = vmatpush.bf16.msra.mxu0 %v2795_v44 }
  0x64   : > { %1244 = vmatpush.bf16.msra.mxu1 %v2803_v45 }
  0x65   : > { %1325 = vmatpush.bf16.msra.mxu2 %v2811_v46 }
  0x66   : > { %1408 = vmatpush.bf16.msra.mxu3 %v2819_v47 }
  0x67   : > { %1155 = vmatpush.bf16.msra.mxu0 %v2794_v49 }
  0x68   : > { %1245 = vmatpush.bf16.msra.mxu1 %v2802_v50 }
  0x69   : > { %1326 = vmatpush.bf16.msra.mxu2 %v2810_v51 }
  0x6a   : > { %1409 = vmatpush.bf16.msra.mxu3 %v2818_v52 }
  0x6b   : > { %1156 = vmatpush.bf16.msra.mxu0 %v2793_v55 }
  0x6c   : > { %1246 = vmatpush.bf16.msra.mxu1 %v2801_v56 }
  0x6d   : > { %1327 = vmatpush.bf16.msra.mxu2 %v2809_v57 }
  0x6e   : > { %1410 = vmatpush.bf16.msra.mxu3 %v2817_v58  ;;  %1157 = vmatmul.bf16.vlgmr.msra.gmra.mxu0 %v1083_v38  ;;  %v1686_v38 = vrot.slane %v1520_v28, 2 }
  0x6f   : > { %1483 = vmatpush.bf16.msrb.mxu0 %v2832_v62  ;;  %1247 = vmatmul.bf16.vlgmr.msra.gmra.mxu1 %v1189_v3 }
  0x70   : > { %1573 = vmatpush.bf16.msrb.mxu1 %v2840_v63  ;;  %1328 = vmatmul.bf16.vlgmr.msra.gmra.mxu2 %v1270_v2  ;;  %v1687_v43 = vor.u32 %v1686_v38, %v1685_v37 }
  0x71   : > { %1654 = vmatpush.bf16.msrb.mxu2 %v2848_v0  ;;  %1411 = vmatmul.bf16.vlgmr.msra.gmra.mxu3 %v1353_v4 }
  0x72   : > { %1737 = vmatpush.bf16.msrb.mxu3 %v2856_v1 }
  0x73   : > { %1484 = vmatpush.bf16.msrb.mxu0 %v2831_v5 }
  0x74   : > { %1574 = vmatpush.bf16.msrb.mxu1 %v2839_v6 }
  0x75   : > { %1655 = vmatpush.bf16.msrb.mxu2 %v2847_v7 }
  0x76   : > { %1738 = vmatpush.bf16.msrb.mxu3 %v2855_v8 }
  0x77   : > { %1485 = vmatpush.bf16.msrb.mxu0 %v2830_v9 }
  0x78   : > { %1575 = vmatpush.bf16.msrb.mxu1 %v2838_v10 }
  0x79   : > { %1656 = vmatpush.bf16.msrb.mxu2 %v2846_v11 }
  0x7a   : > { %1739 = vmatpush.bf16.msrb.mxu3 %v2854_v12 }
  0x7b   : > { %1486 = vmatpush.bf16.msrb.mxu0 %v2829_v13 }
  0x7c   : > { %1576 = vmatpush.bf16.msrb.mxu1 %v2837_v14 }
  0x7d   : > { %1657 = vmatpush.bf16.msrb.mxu2 %v2845_v16 }
  0x7e   : > { %1740 = vmatpush.bf16.msrb.mxu3 %v2853_v17 }
  0x7f   : > { %1487 = vmatpush.bf16.msrb.mxu0 %v2828_v19 }
  0x80   : > { %1577 = vmatpush.bf16.msrb.mxu1 %v2836_v20 }
  0x81   : > { %1658 = vmatpush.bf16.msrb.mxu2 %v2844_v21 }
  0x82   : > { %1741 = vmatpush.bf16.msrb.mxu3 %v2852_v22 }
  0x83   : > { %1488 = vmatpush.bf16.msrb.mxu0 %v2827_v24 }
  0x84   : > { %1578 = vmatpush.bf16.msrb.mxu1 %v2835_v25  ;;  %v1774_v25 = vld [vmem:[%s409_s11] sm:$0x3] }
  0x85   : > { %1659 = vmatpush.bf16.msrb.mxu2 %v2843_v26 }
  0x86   : > { %1742 = vmatpush.bf16.msrb.mxu3 %v2851_v27 }
  0x87   : > { %1489 = vmatpush.bf16.msrb.mxu0 %v2826_v29 }
  0x88   : > { %1579 = vmatpush.bf16.msrb.mxu1 %v2834_v30 }
  0x89   : > { %1660 = vmatpush.bf16.msrb.mxu2 %v2842_v32 }
  0x8a   : > { %1743 = vmatpush.bf16.msrb.mxu3 %v2850_v33 }
  0x8b   : > { %1490 = vmatpush.bf16.msrb.mxu0 %v2825_v35 }
  0x8c   : > { %1580 = vmatpush.bf16.msrb.mxu1 %v2833_v36 }
  0x8d   : > { %1661 = vmatpush.bf16.msrb.mxu2 %v2841_v39 }
  0x8e   : > { %1744 = vmatpush.bf16.msrb.mxu3 %v2849_v40  ;;  %1491 = vmatmul.bf16.vlgmr.msrb.gmra.mxu0 %v1417_v15 }
  0x8f   : > { %1581 = vmatmul.bf16.vlgmr.msrb.gmra.mxu1 %v1523_v41 }
  0x90   : > { %1662 = vmatmul.bf16.vlgmr.msrb.gmra.mxu2 %v1604_v42 }
  0x91   : > { %1745 = vmatmul.bf16.vlgmr.msrb.gmra.mxu3 %v1687_v43 }
  0xab   : > { %v520_v44 = vpop.f32.mrf.mxu0 }
  0xac   : > { %v581_v45 = vpop.f32.mrf.mxu1 }
  0xad   : > { %v582_v46 = vadd.f32 %v581_v45, %v520_v44 }
  0xb3   : > { %v661_v47 = vpop.f32.mrf.mxu2  ;;  %v522_v50 = vpop.f32.mrf.mxu0 }
  0xb4   : > { %v665_v48 = vadd.f32 %v661_v47, %v582_v46  ;;  %v744_v49 = vpop.f32.mrf.mxu3  ;;  %v583_v52 = vpop.f32.mrf.mxu1 }
  0xb6   : > { %v748_v51 = vadd.f32 %v744_v49, %v665_v48 }
  0xbb   : > { %v663_v53 = vpop.f32.mrf.mxu2 }
  0xbc   : > { %v746_v54 = vpop.f32.mrf.mxu3 }
  0xcb   : > { %v824_v55 = vpop.f32.mrf.mxu0 }
  0xcc   : > { %v914_v56 = vpop.f32.mrf.mxu1  ;;  %v828_v1 = vadd.f32 %v824_v55, %v748_v51 }
  0xce   : > { %v918_v5 = vadd.f32 %v914_v56, %v828_v1 }
  0xd3   : > { %v995_v57 = vpop.f32.mrf.mxu2  ;;  %v826_v59 = vpop.f32.mrf.mxu0 }
  0xd4   : > { %v1078_v58 = vpop.f32.mrf.mxu3  ;;  %v916_v60 = vpop.f32.mrf.mxu1  ;;  %v999_v7 = vadd.f32 %v995_v57, %v918_v5 }
  0xd6   : > { %v1082_v10 = vadd.f32 %v1078_v58, %v999_v7 }
  0xdb   : > { %v997_v61 = vpop.f32.mrf.mxu2 }
  0xdc   : > { %v1080_v62 = vpop.f32.mrf.mxu3 }
  0xeb   : > { %v1158_v63 = vpop.f32.mrf.mxu0 }
  0xec   : > { %v1248_v0 = vpop.f32.mrf.mxu1  ;;  %v1162_v11 = vadd.f32 %v1158_v63, %v1082_v10 }
  0xee   : > { %v1252_v12 = vadd.f32 %v1248_v0, %v1162_v11 }
  0xf3   : > { %v1329_v2 = vpop.f32.mrf.mxu2  ;;  %v1160_v4 = vpop.f32.mrf.mxu0 }
  0xf4   : > { %v1412_v3 = vpop.f32.mrf.mxu3  ;;  %v1250_v6 = vpop.f32.mrf.mxu1  ;;  %v1333_v13 = vadd.f32 %v1329_v2, %v1252_v12 }
  0xf6   : > { %v1416_v14 = vadd.f32 %v1412_v3, %v1333_v13 }
  0xfb   : > { %v1331_v8 = vpop.f32.mrf.mxu2 }
  0xfc   : > { %v1414_v9 = vpop.f32.mrf.mxu3 }
 0x10b   : > { %v1492_v15 = vpop.f32.mrf.mxu0 }
 0x10c   : > { %v1582_v16 = vpop.f32.mrf.mxu1  ;;  %v1496_v17 = vadd.f32 %v1492_v15, %v1416_v14 }
 0x10e   : > { %v1586_v18 = vadd.f32 %v1582_v16, %v1496_v17 }
 0x113   : > { %v1663_v19 = vpop.f32.mrf.mxu2  ;;  %v1494_v22 = vpop.f32.mrf.mxu0 }
 0x114   : > { %v1746_v20 = vpop.f32.mrf.mxu3  ;;  %v1667_v21 = vadd.f32 %v1663_v19, %v1586_v18  ;;  %v1584_v23 = vpop.f32.mrf.mxu1 }
 0x116   : > { %v1750_v24 = vadd.f32 %v1746_v20, %v1667_v21 }
 0x118   : > { %v1752_v26 = vsel %vm1751_vm2, %v1750_v24, 0.0  ;;  %v1759_v27 = vmul.f32 %v1750_v24, %v1750_v24  ;;  %v1770_v28 = vpack.c.bf16 %v1750_v24, %v1750_v24 }
 0x119   : > { %v1753_v29 = vrot.slane %v1752_v26, 4 }
 0x11a   : > { %v1760_v30 = vsel %vm1751_vm2, %v1759_v27, 0.0  ;;  %v1775_v31 = vsel %vm1773_vm3, %v1770_v28, %v1774_v25 }
 0x11b   : > { %v1754_v32 = vadd.f32 %v1753_v29, %v1752_v26  ;;  %v1761_v33 = vrot.slane %v1760_v30, 4  ;;  %1776 = vst [vmem:[%s409_s11] sm:$0x3] %v1775_v31  ;;  %v1665_v34 = vpop.f32.mrf.mxu2 }
 0x11c   : > { %v1748_v35 = vpop.f32.mrf.mxu3 }
 0x11d   : > { %v1755_v36 = vrot.slane %v1754_v32, 2  ;;  %v1762_v37 = vadd.f32 %v1761_v33, %v1760_v30 }
 0x11f   : > { %v1756_v38 = vadd.f32 %v1755_v36, %v1754_v32  ;;  %v1763_v39 = vrot.slane %v1762_v37, 2 }
 0x121   : > { %v1757_v40 = vrot.slane %v1756_v38, 1  ;;  %v1764_v41 = vadd.f32 %v1763_v39, %v1762_v37 }
 0x123   : > { %v1765_v42 = vrot.slane %v1764_v41, 1  ;;  %v1758_v43 = vadd.f32 %v1757_v40, %v1756_v38 }
 0x125   : > { %v1766_v44 = vadd.f32 %v1765_v42, %v1764_v41 }
 0x127   : > { %v1768_v45 = vsel %vm1767_vm4, %v1758_v43, %v1766_v44 }
 0x128   : > { %1769 = vst [vmem:[%s417_s30] sm:$0x3] %v1768_v45 }
 0x129 PF: > { %s17_s25 = sadd.s32 1, %s2937_s25   ;;  %s3472_s21 = smov %s2929_s23 }
 0x12a   : > { %p14_p11 = scmp.ge.s32.totalorder %s17_s25, 8   ;;  %s3473_s22 = smov %s2933_s24 }
 0x12b   : > { %s3474_s23 = smov %s3477_s26  ;;  %s3475_s24 = smov %s3481_s27 }
 0x12c   :  { %16 = sbr.rel (!%p14_p11) target bundleno = 3 (0x3), region = 106 }

// kernel: _lambda_.11
= control target key start
LH: loop header
LB: loop body
LE: loop exit
PB: predicated region body
PF: predicated region fallthrough
CT: control target
= control target key end

     0   :  { %s2886_s21 = smov 0   ;;  %s2888_s22 = smov 0   ;;  %s3368_s0 = inlined_call_operand.vmem [shape: bf16[2,5,5,128], index: 0, kind: input, shape index: {}, may-alias: {0,1,2,3}]   ;;  %s3369_s1 = inlined_call_operand.vmem [shape: bf16[2,5,5,128], index: 1, kind: input, shape index: {}, may-alias: {0,1,2,3}]   ;;  %s3370_s2 = inlined_call_operand.vmem [shape: bf16[2,5,5,128], index: 2, kind: input, shape index: {}, may-alias: {0,1,2,3}]   ;;  %s3371_s3 = inlined_call_operand.vmem [shape: bf16[2,5,5,128], index: 3, kind: input, shape index: {}, may-alias: {0,1,2,3}]   ;;  %s3372_s4 = inlined_call_operand.vmem [shape: bf16[4,4,128,128], index: 4, kind: input, shape index: {}]   ;;  %s3373_s5 = inlined_call_operand.vmem [shape: f32[1,128], index: 5, kind: input, shape index: {}]   ;;  %s3374_s6 = inlined_call_operand.vmem [shape: f32[2,2,2,128], index: 6, kind: output, shape index: {}]  }
   0x1   :  { %s2890_s23 = smov 0   ;;  %s2892_s24 = smov 0  }
   0x2   :  { %s2894_s25 = smov 0  }
   0x3 LB: > { %s25_s26 = sadd.s32 1, %s2841_s23  ;;  %s28_s27 = sadd.s32 1, %s2845_s24  ;;  %s2849_s25 = sphi %s2894_s25, %s16_s25   ;;  %s2845_s24 = sphi %s2892_s24, %s3380_s24   ;;  %s2841_s23 = sphi %s2890_s23, %s3379_s23   ;;  %s2837_s22 = sphi %s2888_s22, %s3378_s22   ;;  %s2833_s21 = sphi %s2886_s21, %s3377_s21  }
   0x4   : > { %p26_p0 = scmp.ge.s32.totalorder %s25_s26, 2  ;;  %p1880_p1 = scmp.ge.s32.totalorder %s2849_s25, 1 }
   0x5   : > { %p288_p2 = scmp.lt.s32.totalorder %s2849_s25, 5 }
   0x6   : > { %s3382_s26 = smov (%p26_p0, %s25_s26), 0  ;;  %s3384_s27 = smov (!%p26_p0, %s28_s27), %s2845_s24 }
   0x7   : > { %p289_p3 = pnand %p1880_p1, %p288_p2  ;;  %p30_p4 = scmp.ge.s32.totalorder %s3384_s27, 2 }
   0x8   : > { %p351_p5 = scmp.lt.s32.totalorder (!%p289_p3), %s2837_s22, 1  ;;  %p353_p6 = scmp.lt.s32.totalorder (!%p289_p3), %s2833_s21, 4 }
   0x9   : > { %s3386_s27 = smov (%p30_p4, %s3384_s27), 0  ;;  %292 = sbr.rel (%p289_p3) target bundleno = 285 (0x11d), region = 44 }
   0xa   : > { %s359_s15 = sadd.s32 (!%p289_p3), 1, %s2833_s21  ;;  %s369_s7 = sadd.s32 (!%p289_p3), 2, %s2833_s21 }
   0xb   : > { %p3014_p7 = scmp.lt.s32.totalorder (!%p289_p3), %s359_s15, 4  ;;  %p3124_p8 = scmp.lt.s32.totalorder (!%p289_p3), %s369_s7, 4 }
   0xc   : > { %p391_p10 = scmp.lt.s32.totalorder (!%p289_p3), %s2833_s21, 1 }
   0xe   : > { %v2656_v0 = vld [vmem:[%s3372_s4 + $0x78] sm:$0xff]  ;;  %v2655_v4 = vld [vmem:[%s3372_s4 + $0x70] sm:$0xff]  ;;  %s3388_s22 = smov (!%p351_p5, %s2837_s22), 1  ;;  %v2654_v8 = vld [vmem:[%s3372_s4 + $0x68] sm:$0xff]  ;;  %s3390_s15 = smov (!%p3014_p7, %s359_s15), 4 }
   0xf   : > { %v2648_v1 = vld [vmem:[%s3372_s4 + $0x38] sm:$0xff]  ;;  %490 = vmatpush.bf16.msra.mxu0 %v2656_v0  ;;  %v2647_v5 = vld [vmem:[%s3372_s4 + $0x30] sm:$0xff]  ;;  %s354_s20 = scalar_select %p353_p6, %s2833_s21, 4  ;;  %v2646_v9 = vld [vmem:[%s3372_s4 + $0x28] sm:$0xff] }
  0x10   : > { %v2664_v2 = vld [vmem:[%s3372_s4 + $0xb8] sm:$0xff]  ;;  %551 = vmatpush.bf16.msra.mxu1 %v2648_v1  ;;  %v2663_v6 = vld [vmem:[%s3372_s4 + $0xb0] sm:$0xff]  ;;  %s2947_s28 = smul.u32 5, %s3388_s22  ;;  %v2662_v10 = vld [vmem:[%s3372_s4 + $0xa8] sm:$0xff]  ;;  %s3392_s7 = smov (!%p3124_p8, %s369_s7), 4 }
  0x11   : > { %v2672_v3 = vld [vmem:[%s3372_s4 + $0xf8] sm:$0xff]  ;;  %631 = vmatpush.bf16.msra.mxu2 %v2664_v2  ;;  %v2671_v7 = vld [vmem:[%s3372_s4 + $0xf0] sm:$0xff]  ;;  %v2670_v11 = vld [vmem:[%s3372_s4 + $0xe8] sm:$0xff] }
  0x12   : > { %714 = vmatpush.bf16.msra.mxu3 %v2672_v3  ;;  %s356_s13 = sadd.s32 %s2947_s28, %s354_s20  ;;  %v2653_v12 = vld [vmem:[%s3372_s4 + $0x60] sm:$0xff]  ;;  %v2652_v16 = vld [vmem:[%s3372_s4 + $0x58] sm:$0xff]  ;;  %v2651_v21 = vld [vmem:[%s3372_s4 + $0x50] sm:$0xff] }
  0x13   : > { %491 = vmatpush.bf16.msra.mxu0 %v2655_v4  ;;  %v2645_v13 = vld [vmem:[%s3372_s4 + $0x20] sm:$0xff]  ;;  %s1881_s20 = sshll.u32 %s356_s13, 2  ;;  %v2644_v17 = vld [vmem:[%s3372_s4 + $0x18] sm:$0xff]  ;;  %v2643_v22 = vld [vmem:[%s3372_s4 + $0x10] sm:$0xff]  ;;  %s1885_s13 = sshll.u32 %s3388_s22, 1 }
  0x14   : > { %552 = vmatpush.bf16.msra.mxu1 %v2647_v5  ;;  %v2661_v14 = vld [vmem:[%s3372_s4 + $0xa0] sm:$0xff]  ;;  %s358_s14 = scalar_lea.vmem %s3368_s0, %s1881_s20  ;;  %v2660_v18 = vld [vmem:[%s3372_s4 + $0x98] sm:$0xff]  ;;  %v2659_v24 = vld [vmem:[%s3372_s4 + $0x90] sm:$0xff] }
  0x15   : > { %632 = vmatpush.bf16.msra.mxu2 %v2663_v6  ;;  %v2669_v15 = vld [vmem:[%s3372_s4 + $0xe0] sm:$0xff]  ;;  %v2668_v19 = vld [vmem:[%s3372_s4 + $0xd8] sm:$0xff]  ;;  %v2667_v25 = vld [vmem:[%s3372_s4 + $0xd0] sm:$0xff] }
  0x16   : > { %715 = vmatpush.bf16.msra.mxu3 %v2671_v7  ;;  %v397_v20 = vld [vmem:[%s358_s14] sm:$0x7]  ;;  %v2650_v27 = vld [vmem:[%s3372_s4 + $0x48] sm:$0xff]  ;;  %v2680_v40 = vld [vmem:[%s3372_s4 + $0x138] sm:$0xff]  ;;  %s365_s14 = sadd.s32 %s2947_s28, %s3390_s15  ;;  %s375_s15 = sadd.s32 %s2947_s28, %s3392_s7 }
  0x17   : > { %492 = vmatpush.bf16.msra.mxu0 %v2654_v8  ;;  %v432_v23 = vunpack.c.l.b16 %v397_v20  ;;  %v2642_v28 = vld [vmem:[%s3372_s4 + $0x8] sm:$0xff]  ;;  %v2649_v33 = vld [vmem:[%s3372_s4 + $0x40] sm:$0xff]  ;;  %v2688_v41 = vld [vmem:[%s3372_s4 + $0x178] sm:$0xff]  ;;  %s1882_s29 = sshll.u32 %s365_s14, 2  ;;  %s1883_s12 = sshll.u32 %s375_s15, 2 }
  0x18   : > { %553 = vmatpush.bf16.msra.mxu1 %v2646_v9  ;;  %v2658_v30 = vld [vmem:[%s3372_s4 + $0x88] sm:$0xff]  ;;  %v2641_v34 = vld [vmem:[%s3372_s4] sm:$0xff]  ;;  %v2696_v42 = vld [vmem:[%s3372_s4 + $0x1b8] sm:$0xff]  ;;  %s367_s19 = scalar_lea.vmem %s3369_s1, %s1882_s29  ;;  %s377_s11 = scalar_lea.vmem %s3370_s2, %s1883_s12 }
  0x19   : > { %633 = vmatpush.bf16.msra.mxu2 %v2662_v10  ;;  %v433_v26 = vpack.c.b16 %v432_v23, %v432_v23  ;;  %v2666_v31 = vld [vmem:[%s3372_s4 + $0xc8] sm:$0xff]  ;;  %v2657_v36 = vld [vmem:[%s3372_s4 + $0x80] sm:$0xff]  ;;  %v2704_v43 = vld [vmem:[%s3372_s4 + $0x1f8] sm:$0xff]  ;;  %s379_s12 = sadd.s32 3, %s2833_s21  ;;  %s3396_s21 = smov (!%p391_p10, %s2833_s21), 1 }
  0x1a   : > { %716 = vmatpush.bf16.msra.mxu3 %v2670_v11  ;;  %v2665_v37 = vld [vmem:[%s3372_s4 + $0xc0] sm:$0xff]  ;;  %v2679_v47 = vld [vmem:[%s3372_s4 + $0x130] sm:$0xff]  ;;  %v2678_v51 = vld [vmem:[%s3372_s4 + $0x128] sm:$0xff]  ;;  %p382_p9 = scmp.lt.s32.totalorder %s379_s12, 4  ;;  %s394_s17 = sadd.s32 %s1885_s13, %s3396_s21 }
  0x1b   : > { %493 = vmatpush.bf16.msra.mxu0 %v2653_v12  ;;  %v437_v29 = vshll.u32 %v433_v26, 16  ;;  %v435_v32 = vshrl.u32 %v433_v26, 16  ;;  %v581_v44 = vrot.slane %v433_v26, 1  ;;  %v2687_v48 = vld [vmem:[%s3372_s4 + $0x170] sm:$0xff]  ;;  %v2686_v52 = vld [vmem:[%s3372_s4 + $0x168] sm:$0xff]  ;;  %v2677_v55 = vld [vmem:[%s3372_s4 + $0x120] sm:$0xff] }
  0x1c   : > { %554 = vmatpush.bf16.msra.mxu1 %v2645_v13  ;;  %v2695_v49 = vld [vmem:[%s3372_s4 + $0x1b0] sm:$0xff]  ;;  %v2694_v53 = vld [vmem:[%s3372_s4 + $0x1a8] sm:$0xff]  ;;  %v2685_v56 = vld [vmem:[%s3372_s4 + $0x160] sm:$0xff]  ;;  %s3394_s12 = smov (!%p382_p9, %s379_s12), 4 }
  0x1d   : > { %634 = vmatpush.bf16.msra.mxu2 %v2661_v14  ;;  %v439_v35 = vrot.slane %v437_v29, 1  ;;  %v662_v38 = vrot.slane %v435_v32, 1  ;;  %v663_v39 = vrot.slane %v437_v29, 2  ;;  %v2703_v50 = vld [vmem:[%s3372_s4 + $0x1f0] sm:$0xff]  ;;  %v2702_v54 = vld [vmem:[%s3372_s4 + $0x1e8] sm:$0xff]  ;;  %v2693_v57 = vld [vmem:[%s3372_s4 + $0x1a0] sm:$0xff]  ;;  %s385_s20 = sadd.s32 %s2947_s28, %s3394_s12 }
  0x1e   : > { %717 = vmatpush.bf16.msra.mxu3 %v2669_v15  ;;  %v2701_v58 = vld [vmem:[%s3372_s4 + $0x1e0] sm:$0xff]  ;;  %v2676_v60 = vld [vmem:[%s3372_s4 + $0x118] sm:$0xff]  ;;  %v2675_v1 = vld [vmem:[%s3372_s4 + $0x110] sm:$0xff]  ;;  %s1884_s28 = sshll.u32 %s385_s20, 2 }
  0x1f   : > { %494 = vmatpush.bf16.msra.mxu0 %v2652_v16  ;;  %v440_v45 = vor.u32 %v439_v35, %v435_v32  ;;  %v664_v46 = vor.u32 %v663_v39, %v662_v38  ;;  %v3084_v59 = vld [vmem:[%s367_s19] sm:$0x7]  ;;  %v2684_v61 = vld [vmem:[%s3372_s4 + $0x158] sm:$0xff]  ;;  %v2683_v2 = vld [vmem:[%s3372_s4 + $0x150] sm:$0xff]  ;;  %s387_s9 = scalar_lea.vmem %s3371_s3, %s1884_s28  ;;  %s1886_s28 = sshll.u32 %s394_s17, 1 }
  0x20   : > { %555 = vmatpush.bf16.msra.mxu1 %v2644_v17  ;;  %v2692_v62 = vld [vmem:[%s3372_s4 + $0x198] sm:$0xff]  ;;  %v826_v0 = vunpack.c.l.b16 %v3084_v59  ;;  %v2691_v3 = vld [vmem:[%s3372_s4 + $0x190] sm:$0xff]  ;;  %v2674_v6 = vld [vmem:[%s3372_s4 + $0x108] sm:$0xff]  ;;  %s396_s20 = scalar_lea.vmem %s3374_s6, %s1886_s28 }
  0x21   : > { %635 = vmatpush.bf16.msra.mxu2 %v2660_v18  ;;  %v2700_v63 = vld [vmem:[%s3372_s4 + $0x1d8] sm:$0xff]  ;;  %v2699_v4 = vld [vmem:[%s3372_s4 + $0x1d0] sm:$0xff]  ;;  %v2682_v7 = vld [vmem:[%s3372_s4 + $0x148] sm:$0xff] }
  0x22   : > { %718 = vmatpush.bf16.msra.mxu3 %v2668_v19  ;;  %v827_v5 = vpack.c.b16 %v826_v0, %v826_v0  ;;  %v2690_v8 = vld [vmem:[%s3372_s4 + $0x188] sm:$0xff]  ;;  %v2673_v12 = vld [vmem:[%s3372_s4 + $0x100] sm:$0xff]  ;;  %v2712_v19 = vld [vmem:[%s3372_s4 + $0x238] sm:$0xff] }
  0x23   : > { %495 = vmatpush.bf16.msra.mxu0 %v2651_v21  ;;  %v2698_v9 = vld [vmem:[%s3372_s4 + $0x1c8] sm:$0xff]  ;;  %v2681_v13 = vld [vmem:[%s3372_s4 + $0x140] sm:$0xff]  ;;  %v2728_v21 = vld [vmem:[%s3372_s4 + $0x2b8] sm:$0xff] }
  0x24   : > { %556 = vmatpush.bf16.msra.mxu1 %v2643_v22  ;;  %v829_v10 = vshrl.u32 %v827_v5, 16  ;;  %v831_v11 = vshll.u32 %v827_v5, 16  ;;  %v2689_v14 = vld [vmem:[%s3372_s4 + $0x180] sm:$0xff]  ;;  %v2736_v22 = vld [vmem:[%s3372_s4 + $0x2f8] sm:$0xff]  ;;  %v915_v23 = vrot.slane %v827_v5, 1  ;;  %v2711_v26 = vld [vmem:[%s3372_s4 + $0x230] sm:$0xff] }
  0x25   : > { %636 = vmatpush.bf16.msra.mxu2 %v2659_v24  ;;  %v2697_v15 = vld [vmem:[%s3372_s4 + $0x1c0] sm:$0xff]  ;;  %v2735_v29 = vld [vmem:[%s3372_s4 + $0x2f0] sm:$0xff]  ;;  %v2726_v32 = vld [vmem:[%s3372_s4 + $0x2a8] sm:$0xff] }
  0x26   : > { %719 = vmatpush.bf16.msra.mxu3 %v2667_v25  ;;  %v996_v16 = vrot.slane %v829_v10, 1  ;;  %v997_v17 = vrot.slane %v831_v11, 2  ;;  %v833_v18 = vrot.slane %v831_v11, 1  ;;  %v2717_v35 = vld [vmem:[%s3372_s4 + $0x260] sm:$0xff]  ;;  %v2708_v39 = vld [vmem:[%s3372_s4 + $0x218] sm:$0xff]  ;;  %v2743_v5 = vld [vmem:[%s3372_s4 + $0x330] sm:$0xff] }
  0x27   : > { %496 = vmatpush.bf16.msra.mxu0 %v2650_v27  ;;  %v2719_v27 = vld [vmem:[%s3372_s4 + $0x270] sm:$0xff]  ;;  %v1062_v38 = vld [vmem:[%s377_s11] sm:$0x7]  ;;  %v2760_v0 = vld [vmem:[%s3372_s4 + $0x3b8] sm:$0xff] }
  0x28   : > { %557 = vmatpush.bf16.msra.mxu1 %v2642_v28  ;;  %v998_v24 = vor.u32 %v997_v17, %v996_v16  ;;  %v834_v25 = vor.u32 %v833_v18, %v829_v10  ;;  %v2727_v28 = vld [vmem:[%s3372_s4 + $0x2b0] sm:$0xff]  ;;  %v2750_v10 = vld [vmem:[%s3372_s4 + $0x368] sm:$0xff]  ;;  %v2757_v16 = vld [vmem:[%s3372_s4 + $0x3a0] sm:$0xff] }
  0x29   : > { %637 = vmatpush.bf16.msra.mxu2 %v2658_v30  ;;  %v2710_v30 = vld [vmem:[%s3372_s4 + $0x228] sm:$0xff]  ;;  %v2765_v17 = vld [vmem:[%s3372_s4 + $0x3e0] sm:$0xff] }
  0x2a   : > { %720 = vmatpush.bf16.msra.mxu3 %v2666_v31  ;;  %v2718_v31 = vld [vmem:[%s3372_s4 + $0x268] sm:$0xff] }
  0x2b   : > { %497 = vmatpush.bf16.msra.mxu0 %v2649_v33  ;;  %v2734_v33 = vld [vmem:[%s3372_s4 + $0x2e8] sm:$0xff] }
  0x2c   : > { %558 = vmatpush.bf16.msra.mxu1 %v2641_v34  ;;  %v2709_v34 = vld [vmem:[%s3372_s4 + $0x220] sm:$0xff]  ;;  %v2758_v11 = vld [vmem:[%s3372_s4 + $0x3a8] sm:$0xff] }
  0x2d   : > { %638 = vmatpush.bf16.msra.mxu2 %v2657_v36  ;;  %v2725_v36 = vld [vmem:[%s3372_s4 + $0x2a0] sm:$0xff] }
  0x2e   : > { %721 = vmatpush.bf16.msra.mxu3 %v2665_v37  ;;  %498 = vmatmul.bf16.vlgmr.msra.gmra.mxu0 %v440_v45  ;;  %v2733_v37 = vld [vmem:[%s3372_s4 + $0x2e0] sm:$0xff]  ;;  %v2715_v45 = vld [vmem:[%s3372_s4 + $0x250] sm:$0xff] }
  0x2f   : > { %794 = vmatpush.bf16.msrb.mxu0 %v2680_v40  ;;  %559 = vmatmul.bf16.vlgmr.msra.gmra.mxu1 %v397_v20  ;;  %v2720_v20 = vld [vmem:[%s3372_s4 + $0x278] sm:$0xff] }
  0x30   : > { %884 = vmatpush.bf16.msrb.mxu1 %v2688_v41  ;;  %639 = vmatmul.bf16.vlgmr.msra.gmra.mxu2 %v581_v44  ;;  %v2716_v40 = vld [vmem:[%s3372_s4 + $0x258] sm:$0xff]  ;;  %v2707_v44 = vld [vmem:[%s3372_s4 + $0x210] sm:$0xff] }
  0x31   : > { %965 = vmatpush.bf16.msrb.mxu2 %v2696_v42  ;;  %722 = vmatmul.bf16.vlgmr.msra.gmra.mxu3 %v664_v46  ;;  %v2724_v41 = vld [vmem:[%s3372_s4 + $0x298] sm:$0xff]  ;;  %v2723_v46 = vld [vmem:[%s3372_s4 + $0x290] sm:$0xff] }
  0x32   : > { %1048 = vmatpush.bf16.msrb.mxu3 %v2704_v43  ;;  %v2732_v42 = vld [vmem:[%s3372_s4 + $0x2d8] sm:$0xff]  ;;  %v1160_v43 = vunpack.c.l.b16 %v1062_v38 }
  0x33   : > { %795 = vmatpush.bf16.msrb.mxu0 %v2679_v47  ;;  %v2731_v47 = vld [vmem:[%s3372_s4 + $0x2d0] sm:$0xff] }
  0x34   : > { %885 = vmatpush.bf16.msrb.mxu1 %v2687_v48  ;;  %v1161_v48 = vpack.c.b16 %v1160_v43, %v1160_v43 }
  0x35   : > { %966 = vmatpush.bf16.msrb.mxu2 %v2695_v49  ;;  %v2706_v49 = vld [vmem:[%s3372_s4 + $0x208] sm:$0xff] }
  0x36   : > { %1049 = vmatpush.bf16.msrb.mxu3 %v2703_v50  ;;  %v2714_v50 = vld [vmem:[%s3372_s4 + $0x248] sm:$0xff] }
  0x37   : > { %796 = vmatpush.bf16.msrb.mxu0 %v2678_v51  ;;  %v2722_v51 = vld [vmem:[%s3372_s4 + $0x288] sm:$0xff] }
  0x38   : > { %886 = vmatpush.bf16.msrb.mxu1 %v2686_v52  ;;  %v2730_v52 = vld [vmem:[%s3372_s4 + $0x2c8] sm:$0xff] }
  0x39   : > { %967 = vmatpush.bf16.msrb.mxu2 %v2694_v53  ;;  %v1165_v53 = vshll.u32 %v1161_v48, 16 }
  0x3a   : > { %1050 = vmatpush.bf16.msrb.mxu3 %v2702_v54  ;;  %v1163_v54 = vshrl.u32 %v1161_v48, 16 }
  0x3b   : > { %797 = vmatpush.bf16.msrb.mxu0 %v2677_v55  ;;  %v2705_v55 = vld [vmem:[%s3372_s4 + $0x200] sm:$0xff] }
  0x3c   : > { %887 = vmatpush.bf16.msrb.mxu1 %v2685_v56  ;;  %v2713_v56 = vld [vmem:[%s3372_s4 + $0x240] sm:$0xff] }
  0x3d   : > { %968 = vmatpush.bf16.msrb.mxu2 %v2693_v57  ;;  %v2721_v57 = vld [vmem:[%s3372_s4 + $0x280] sm:$0xff] }
  0x3e   : > { %1051 = vmatpush.bf16.msrb.mxu3 %v2701_v58  ;;  %v2729_v58 = vld [vmem:[%s3372_s4 + $0x2c0] sm:$0xff] }
  0x3f   : > { %798 = vmatpush.bf16.msrb.mxu0 %v2676_v60  ;;  %v1330_v60 = vrot.slane %v1163_v54, 1 }
  0x40   : > { %888 = vmatpush.bf16.msrb.mxu1 %v2684_v61  ;;  %v1331_v61 = vrot.slane %v1165_v53, 2 }
  0x41   : > { %969 = vmatpush.bf16.msrb.mxu2 %v2692_v62  ;;  %v2744_v62 = vld [vmem:[%s3372_s4 + $0x338] sm:$0xff] }
  0x42   : > { %1052 = vmatpush.bf16.msrb.mxu3 %v2700_v63  ;;  %v2752_v63 = vld [vmem:[%s3372_s4 + $0x378] sm:$0xff] }
  0x43   : > { %799 = vmatpush.bf16.msrb.mxu0 %v2675_v1  ;;  %v2768_v1 = vld [vmem:[%s3372_s4 + $0x3f8] sm:$0xff] }
  0x44   : > { %889 = vmatpush.bf16.msrb.mxu1 %v2683_v2  ;;  %v1249_v2 = vrot.slane %v1161_v48, 1 }
  0x45   : > { %970 = vmatpush.bf16.msrb.mxu2 %v2691_v3 }
  0x46   : > { %1053 = vmatpush.bf16.msrb.mxu3 %v2699_v4  ;;  %v1332_v4 = vor.u32 %v1331_v61, %v1330_v60 }
  0x47   : > { %800 = vmatpush.bf16.msrb.mxu0 %v2674_v6  ;;  %v2751_v6 = vld [vmem:[%s3372_s4 + $0x370] sm:$0xff] }
  0x48   : > { %890 = vmatpush.bf16.msrb.mxu1 %v2682_v7  ;;  %v2759_v7 = vld [vmem:[%s3372_s4 + $0x3b0] sm:$0xff] }
  0x49   : > { %971 = vmatpush.bf16.msrb.mxu2 %v2690_v8  ;;  %v2767_v8 = vld [vmem:[%s3372_s4 + $0x3f0] sm:$0xff] }
  0x4a   : > { %1054 = vmatpush.bf16.msrb.mxu3 %v2698_v9  ;;  %v2742_v9 = vld [vmem:[%s3372_s4 + $0x328] sm:$0xff] }
  0x4b   : > { %801 = vmatpush.bf16.msrb.mxu0 %v2673_v12  ;;  %v2766_v12 = vld [vmem:[%s3372_s4 + $0x3e8] sm:$0xff] }
  0x4c   : > { %891 = vmatpush.bf16.msrb.mxu1 %v2681_v13  ;;  %v2741_v13 = vld [vmem:[%s3372_s4 + $0x320] sm:$0xff] }
  0x4d   : > { %972 = vmatpush.bf16.msrb.mxu2 %v2689_v14  ;;  %v2749_v14 = vld [vmem:[%s3372_s4 + $0x360] sm:$0xff] }
  0x4e   : > { %1055 = vmatpush.bf16.msrb.mxu3 %v2697_v15  ;;  %802 = vmatmul.bf16.vlgmr.msrb.gmra.mxu0 %v3084_v59  ;;  %v1167_v59 = vrot.slane %v1165_v53, 1  ;;  %v1396_v15 = vld [vmem:[%s387_s9] sm:$0x7] }
  0x4f   : > { %1128 = vmatpush.bf16.msra.mxu0 %v2712_v19  ;;  %892 = vmatmul.bf16.vlgmr.msrb.gmra.mxu1 %v834_v25  ;;  %v1494_v18 = vunpack.c.l.b16 %v1396_v15  ;;  %v2740_v19 = vld [vmem:[%s3372_s4 + $0x318] sm:$0xff]  ;;  %v2747_v25 = vld [vmem:[%s3372_s4 + $0x350] sm:$0xff] }
  0x50   : > { %1218 = vmatpush.bf16.msra.mxu1 %v2720_v20  ;;  %973 = vmatmul.bf16.vlgmr.msrb.gmra.mxu2 %v915_v23  ;;  %v1168_v3 = vor.u32 %v1167_v59, %v1163_v54  ;;  %v2748_v20 = vld [vmem:[%s3372_s4 + $0x358] sm:$0xff] }
  0x51   : > { %1299 = vmatpush.bf16.msra.mxu2 %v2728_v21  ;;  %1056 = vmatmul.bf16.vlgmr.msrb.gmra.mxu3 %v998_v24  ;;  %v2756_v21 = vld [vmem:[%s3372_s4 + $0x398] sm:$0xff]  ;;  %v1495_v23 = vpack.c.b16 %v1494_v18, %v1494_v18  ;;  %v2739_v24 = vld [vmem:[%s3372_s4 + $0x310] sm:$0xff] }
  0x52   : > { %1382 = vmatpush.bf16.msra.mxu3 %v2736_v22  ;;  %v2764_v22 = vld [vmem:[%s3372_s4 + $0x3d8] sm:$0xff] }
  0x53   : > { %1129 = vmatpush.bf16.msra.mxu0 %v2711_v26  ;;  %v2755_v26 = vld [vmem:[%s3372_s4 + $0x390] sm:$0xff] }
  0x54   : > { %1219 = vmatpush.bf16.msra.mxu1 %v2719_v27  ;;  %v2763_v27 = vld [vmem:[%s3372_s4 + $0x3d0] sm:$0xff] }
  0x55   : > { %1300 = vmatpush.bf16.msra.mxu2 %v2727_v28  ;;  %v1499_v28 = vshll.u32 %v1495_v23, 16 }
  0x56   : > { %1383 = vmatpush.bf16.msra.mxu3 %v2735_v29  ;;  %v2738_v29 = vld [vmem:[%s3372_s4 + $0x308] sm:$0xff] }
  0x57   : > { %1130 = vmatpush.bf16.msra.mxu0 %v2710_v30  ;;  %v2746_v30 = vld [vmem:[%s3372_s4 + $0x348] sm:$0xff] }
  0x58   : > { %1220 = vmatpush.bf16.msra.mxu1 %v2718_v31  ;;  %v1497_v31 = vshrl.u32 %v1495_v23, 16 }
  0x59   : > { %1301 = vmatpush.bf16.msra.mxu2 %v2726_v32  ;;  %v2754_v32 = vld [vmem:[%s3372_s4 + $0x388] sm:$0xff] }
  0x5a   : > { %1384 = vmatpush.bf16.msra.mxu3 %v2734_v33  ;;  %v2762_v33 = vld [vmem:[%s3372_s4 + $0x3c8] sm:$0xff] }
  0x5b   : > { %1131 = vmatpush.bf16.msra.mxu0 %v2709_v34  ;;  %v1501_v34 = vrot.slane %v1499_v28, 1 }
  0x5c   : > { %1221 = vmatpush.bf16.msra.mxu1 %v2717_v35  ;;  %v2737_v35 = vld [vmem:[%s3372_s4 + $0x300] sm:$0xff] }
  0x5d   : > { %1302 = vmatpush.bf16.msra.mxu2 %v2725_v36  ;;  %v2745_v36 = vld [vmem:[%s3372_s4 + $0x340] sm:$0xff] }
  0x5e   : > { %1385 = vmatpush.bf16.msra.mxu3 %v2733_v37  ;;  %v1664_v37 = vrot.slane %v1497_v31, 1 }
  0x5f   : > { %1132 = vmatpush.bf16.msra.mxu0 %v2708_v39  ;;  %v2753_v39 = vld [vmem:[%s3372_s4 + $0x380] sm:$0xff] }
  0x60   : > { %1222 = vmatpush.bf16.msra.mxu1 %v2716_v40  ;;  %v2761_v40 = vld [vmem:[%s3372_s4 + $0x3c0] sm:$0xff] }
  0x61   : > { %1303 = vmatpush.bf16.msra.mxu2 %v2724_v41  ;;  %v1502_v41 = vor.u32 %v1501_v34, %v1497_v31 }
  0x62   : > { %1386 = vmatpush.bf16.msra.mxu3 %v2732_v42  ;;  %v1583_v42 = vrot.slane %v1495_v23, 1 }
  0x63   : > { %1133 = vmatpush.bf16.msra.mxu0 %v2707_v44 }
  0x64   : > { %1223 = vmatpush.bf16.msra.mxu1 %v2715_v45 }
  0x65   : > { %1304 = vmatpush.bf16.msra.mxu2 %v2723_v46 }
  0x66   : > { %1387 = vmatpush.bf16.msra.mxu3 %v2731_v47 }
  0x67   : > { %1134 = vmatpush.bf16.msra.mxu0 %v2706_v49 }
  0x68   : > { %1224 = vmatpush.bf16.msra.mxu1 %v2714_v50 }
  0x69   : > { %1305 = vmatpush.bf16.msra.mxu2 %v2722_v51 }
  0x6a   : > { %1388 = vmatpush.bf16.msra.mxu3 %v2730_v52 }
  0x6b   : > { %1135 = vmatpush.bf16.msra.mxu0 %v2705_v55 }
  0x6c   : > { %1225 = vmatpush.bf16.msra.mxu1 %v2713_v56 }
  0x6d   : > { %1306 = vmatpush.bf16.msra.mxu2 %v2721_v57 }
  0x6e   : > { %1389 = vmatpush.bf16.msra.mxu3 %v2729_v58  ;;  %1136 = vmatmul.bf16.vlgmr.msra.gmra.mxu0 %v1062_v38  ;;  %v1665_v38 = vrot.slane %v1499_v28, 2 }
  0x6f   : > { %1462 = vmatpush.bf16.msrb.mxu0 %v2744_v62  ;;  %1226 = vmatmul.bf16.vlgmr.msra.gmra.mxu1 %v1168_v3 }
  0x70   : > { %1552 = vmatpush.bf16.msrb.mxu1 %v2752_v63  ;;  %1307 = vmatmul.bf16.vlgmr.msra.gmra.mxu2 %v1249_v2  ;;  %v1666_v43 = vor.u32 %v1665_v38, %v1664_v37 }
  0x71   : > { %1633 = vmatpush.bf16.msrb.mxu2 %v2760_v0  ;;  %1390 = vmatmul.bf16.vlgmr.msra.gmra.mxu3 %v1332_v4 }
  0x72   : > { %1716 = vmatpush.bf16.msrb.mxu3 %v2768_v1 }
  0x73   : > { %1463 = vmatpush.bf16.msrb.mxu0 %v2743_v5 }
  0x74   : > { %1553 = vmatpush.bf16.msrb.mxu1 %v2751_v6 }
  0x75   : > { %1634 = vmatpush.bf16.msrb.mxu2 %v2759_v7 }
  0x76   : > { %1717 = vmatpush.bf16.msrb.mxu3 %v2767_v8 }
  0x77   : > { %1464 = vmatpush.bf16.msrb.mxu0 %v2742_v9 }
  0x78   : > { %1554 = vmatpush.bf16.msrb.mxu1 %v2750_v10 }
  0x79   : > { %1635 = vmatpush.bf16.msrb.mxu2 %v2758_v11 }
  0x7a   : > { %1718 = vmatpush.bf16.msrb.mxu3 %v2766_v12 }
  0x7b   : > { %1465 = vmatpush.bf16.msrb.mxu0 %v2741_v13 }
  0x7c   : > { %1555 = vmatpush.bf16.msrb.mxu1 %v2749_v14 }
  0x7d   : > { %1636 = vmatpush.bf16.msrb.mxu2 %v2757_v16 }
  0x7e   : > { %1719 = vmatpush.bf16.msrb.mxu3 %v2765_v17 }
  0x7f   : > { %1466 = vmatpush.bf16.msrb.mxu0 %v2740_v19 }
  0x80   : > { %1556 = vmatpush.bf16.msrb.mxu1 %v2748_v20 }
  0x81   : > { %1637 = vmatpush.bf16.msrb.mxu2 %v2756_v21 }
  0x82   : > { %1720 = vmatpush.bf16.msrb.mxu3 %v2764_v22  ;;  %v2810_v22 = vld [vmem:[%s3373_s5] ss:$0 sm:$0xff] }
  0x83   : > { %1467 = vmatpush.bf16.msrb.mxu0 %v2739_v24 }
  0x84   : > { %1557 = vmatpush.bf16.msrb.mxu1 %v2747_v25 }
  0x85   : > { %1638 = vmatpush.bf16.msrb.mxu2 %v2755_v26 }
  0x86   : > { %1721 = vmatpush.bf16.msrb.mxu3 %v2763_v27 }
  0x87   : > { %1468 = vmatpush.bf16.msrb.mxu0 %v2738_v29 }
  0x88   : > { %1558 = vmatpush.bf16.msrb.mxu1 %v2746_v30 }
  0x89   : > { %1639 = vmatpush.bf16.msrb.mxu2 %v2754_v32 }
  0x8a   : > { %1722 = vmatpush.bf16.msrb.mxu3 %v2762_v33 }
  0x8b   : > { %1469 = vmatpush.bf16.msrb.mxu0 %v2737_v35 }
  0x8c   : > { %1559 = vmatpush.bf16.msrb.mxu1 %v2745_v36 }
  0x8d   : > { %1640 = vmatpush.bf16.msrb.mxu2 %v2753_v39 }
  0x8e   : > { %1723 = vmatpush.bf16.msrb.mxu3 %v2761_v40  ;;  %1470 = vmatmul.bf16.vlgmr.msrb.gmra.mxu0 %v1396_v15 }
  0x8f   : > { %1560 = vmatmul.bf16.vlgmr.msrb.gmra.mxu1 %v1502_v41 }
  0x90   : > { %1641 = vmatmul.bf16.vlgmr.msrb.gmra.mxu2 %v1583_v42 }
  0x91   : > { %1724 = vmatmul.bf16.vlgmr.msrb.gmra.mxu3 %v1666_v43 }
  0xab   : > { %v499_v44 = vpop.f32.mrf.mxu0 }
  0xac   : > { %v560_v45 = vpop.f32.mrf.mxu1 }
  0xad   : > { %v561_v46 = vadd.f32 %v560_v45, %v499_v44 }
  0xb3   : > { %v640_v47 = vpop.f32.mrf.mxu2  ;;  %v501_v50 = vpop.f32.mrf.mxu0 }
  0xb4   : > { %v644_v48 = vadd.f32 %v640_v47, %v561_v46  ;;  %v723_v49 = vpop.f32.mrf.mxu3  ;;  %v562_v52 = vpop.f32.mrf.mxu1 }
  0xb6   : > { %v727_v51 = vadd.f32 %v723_v49, %v644_v48 }
  0xbb   : > { %v642_v53 = vpop.f32.mrf.mxu2 }
  0xbc   : > { %v725_v54 = vpop.f32.mrf.mxu3 }
  0xcb   : > { %v803_v55 = vpop.f32.mrf.mxu0 }
  0xcc   : > { %v893_v56 = vpop.f32.mrf.mxu1  ;;  %v807_v1 = vadd.f32 %v803_v55, %v727_v51 }
  0xce   : > { %v897_v5 = vadd.f32 %v893_v56, %v807_v1 }
  0xd3   : > { %v974_v57 = vpop.f32.mrf.mxu2  ;;  %v805_v59 = vpop.f32.mrf.mxu0 }
  0xd4   : > { %v1057_v58 = vpop.f32.mrf.mxu3  ;;  %v895_v60 = vpop.f32.mrf.mxu1  ;;  %v978_v7 = vadd.f32 %v974_v57, %v897_v5 }
  0xd6   : > { %v1061_v10 = vadd.f32 %v1057_v58, %v978_v7 }
  0xdb   : > { %v976_v61 = vpop.f32.mrf.mxu2 }
  0xdc   : > { %v1059_v62 = vpop.f32.mrf.mxu3 }
  0xeb   : > { %v1137_v63 = vpop.f32.mrf.mxu0 }
  0xec   : > { %v1227_v0 = vpop.f32.mrf.mxu1  ;;  %v1141_v11 = vadd.f32 %v1137_v63, %v1061_v10 }
  0xee   : > { %v1231_v12 = vadd.f32 %v1227_v0, %v1141_v11 }
  0xf3   : > { %v1308_v2 = vpop.f32.mrf.mxu2  ;;  %v1139_v4 = vpop.f32.mrf.mxu0 }
  0xf4   : > { %v1391_v3 = vpop.f32.mrf.mxu3  ;;  %v1229_v6 = vpop.f32.mrf.mxu1  ;;  %v1312_v13 = vadd.f32 %v1308_v2, %v1231_v12 }
  0xf6   : > { %v1395_v14 = vadd.f32 %v1391_v3, %v1312_v13 }
  0xfb   : > { %v1310_v8 = vpop.f32.mrf.mxu2 }
  0xfc   : > { %v1393_v9 = vpop.f32.mrf.mxu3 }
 0x10b   : > { %v1471_v15 = vpop.f32.mrf.mxu0 }
 0x10c   : > { %v1561_v16 = vpop.f32.mrf.mxu1  ;;  %v1475_v17 = vadd.f32 %v1471_v15, %v1395_v14 }
 0x10e   : > { %v1565_v18 = vadd.f32 %v1561_v16, %v1475_v17 }
 0x113   : > { %v1642_v19 = vpop.f32.mrf.mxu2  ;;  %v1473_v23 = vpop.f32.mrf.mxu0 }
 0x114   : > { %v1725_v20 = vpop.f32.mrf.mxu3  ;;  %v1646_v21 = vadd.f32 %v1642_v19, %v1565_v18  ;;  %v1563_v24 = vpop.f32.mrf.mxu1 }
 0x116   : > { %v1729_v25 = vadd.f32 %v1725_v20, %v1646_v21 }
 0x118   : > { %v1734_v26 = vadd.f32 %v2810_v22, %v1729_v25 }
 0x11a   : > { %1735 = vst [vmem:[%s396_s20] sm:$0x3] %v1734_v26 }
 0x11b   : > { %v1644_v27 = vpop.f32.mrf.mxu2 }
 0x11c   : > { %v1727_v28 = vpop.f32.mrf.mxu3 }
 0x11d PF: > { %s16_s25 = sadd.s32 1, %s2849_s25   ;;  %s3377_s21 = smov %s2841_s23 }
 0x11e   : > { %p13_p11 = scmp.ge.s32.totalorder %s16_s25, 6   ;;  %s3378_s22 = smov %s2845_s24 }
 0x11f   : > { %s3379_s23 = smov %s3382_s26  ;;  %s3380_s24 = smov %s3386_s27 }
 0x120   :  { %15 = sbr.rel (!%p13_p11) target bundleno = 3 (0x3), region = 98 }

</bundles_post_ra>
